<compile_context>
chip_gen: v5e
topology: v5e:2x2
jax: 0.10.0
libtpu: 0.0.40
codegen_flags: <defaults>
</compile_context>

<pallas_src>
import math
import functools

import jax
import jax.numpy as jnp
from jax import lax
from jax.experimental import pallas as pl
from jax.experimental.pallas import tpu as pltpu

_EPS = 1e-6


# ----------------------------------------------------------------- generation-aware budgets
def _tpu_vmem_capacity_bytes() -> int:
    try:
        info = pltpu.get_tpu_info()
        cap = getattr(info, "vmem_capacity_bytes", None)
        if cap:
            return int(cap)
    except Exception:
        pass
    return 128 * 1024 * 1024  # v5e / v6e default


_VMEM_CAP = _tpu_vmem_capacity_bytes()
# ~48 MiB on 128-MiB-VMEM parts (v5e/v6e), ~38 MiB on v7x (64 MiB physical), never < 32 MiB.
_VMEM_LIMIT = max(32 * 1024 * 1024, min(48 * 1024 * 1024, int(_VMEM_CAP * 0.6)))
# Bigger row tiles where VMEM allows it (v5e/v6e), conservative on v7x.
_ROW_TARGET = 512 if _VMEM_CAP >= 96 * 1024 * 1024 else 256


# ------------------------------------------------------------------------------------ helpers
def _pick_tile(n: int, target: int, align: int) -> int:
    """Largest divisor of n that is <= target and a multiple of `align`.
    Falls back to the full extent (always legal: block == full dim).
    Note: bf16 arrays here (weights) are only ever blocked full-dim or in 128-multiples,
    so the tighter bf16 sublane alignment (16) is automatically satisfied."""
    if n <= target:
        return n
    for t in range(target, 0, -1):
        if n % t == 0 and t % align == 0:
            return t
    return n


def _gelu(x):
    # PreSumm gelu (tanh approximation).
    c = math.sqrt(2.0 / math.pi)
    return 0.5 * x * (1.0 + jnp.tanh(c * (x + 0.044715 * x * x * x)))


def _build_pe(max_len: int, dim: int) -> jnp.ndarray:
    pos = jnp.arange(max_len, dtype=jnp.float32)[:, None]
    div = jnp.exp(jnp.arange(0, dim, 2, dtype=jnp.float32) * -(math.log(10000.0) / dim))
    pe = jnp.zeros((max_len, dim), jnp.float32)
    pe = pe.at[:, 0::2].set(jnp.sin(pos * div))
    pe = pe.at[:, 1::2].set(jnp.cos(pos * div))
    return pe


# -------------------------------------------------------------------- kernel 1: mask * x + PE
def _prep_kernel(x_ref, m_ref, pe_ref, o_ref):
    # x_ref/o_ref: (TS, D); m_ref: (TS, 1); pe_ref: (TS, D)
    o_ref[...] = x_ref[...] * m_ref[...] + pe_ref[...]


def prep_pallas(top_vecs, maskf, pe):
    B, S, D = top_vecs.shape
    TS = _pick_tile(S, 512, 8)
    mask3 = maskf.reshape(B, S, 1)
    bytes_acc = (2 * B * S * D + S * D + B * S) * 4
    return pl.pallas_call(
        _prep_kernel,
        out_shape=jax.ShapeDtypeStruct((B, S, D), top_vecs.dtype),
        grid=(S // TS, B),  # B innermost: pe tile DMA'd once per s-tile, reused over batch
        in_specs=[
            pl.BlockSpec((pl.Squeezed(), TS, D), lambda s, b: (b, s, 0)),
            pl.BlockSpec((pl.Squeezed(), TS, 1), lambda s, b: (b, s, 0)),
            pl.BlockSpec((TS, D), lambda s, b: (s, 0)),
        ],
        out_specs=pl.BlockSpec((pl.Squeezed(), TS, D), lambda s, b: (b, s, 0)),
        compiler_params=pltpu.CompilerParams(
            dimension_semantics=("parallel", "parallel")),  # both shardable on v7x megacore
        cost_estimate=pl.CostEstimate(flops=2 * B * S * D, transcendentals=0,
                                      bytes_accessed=bytes_acc),
        input_output_aliases={0: 0},  # shape/dtype preserving; reuse the input HBM buffer
    )(top_vecs, mask3, pe)


# ------------------------------------------------- kernel 2: [LayerNorm ->] GEMM [+ residual]
def _ln_matmul(x_ref, g_ref, bta_ref, w_ref, b_ref, *, eps, apply_ln):
    x = x_ref[...].astype(jnp.float32)
    if apply_ln:
        mu = jnp.mean(x, axis=-1, keepdims=True)
        xc = x - mu
        var = jnp.mean(xc * xc, axis=-1, keepdims=True)
        h = xc * lax.rsqrt(var + eps) * g_ref[...] + bta_ref[...]
    else:
        h = x
    # bf16 MXU, f32 accumulate
    return jnp.dot(h.astype(jnp.bfloat16), w_ref[...],
                   preferred_element_type=jnp.float32) + b_ref[...]


def _linear_kernel(x_ref, g_ref, bta_ref, w_ref, b_ref, o_ref, *, eps, apply_ln):
    y = _ln_matmul(x_ref, g_ref, bta_ref, w_ref, b_ref, eps=eps, apply_ln=apply_ln)
    o_ref[...] = y.astype(o_ref.dtype)


def _linear_residual_kernel(x_ref, g_ref, bta_ref, w_ref, b_ref, r_ref, o_ref,
                            *, eps, apply_ln):
    y = _ln_matmul(x_ref, g_ref, bta_ref, w_ref, b_ref, eps=eps, apply_ln=apply_ln)
    o_ref[...] = (y + r_ref[...].astype(jnp.float32)).astype(o_ref.dtype)


def linear_pallas(x2d, w, b, gamma=None, beta=None, residual=None, apply_ln=False):
    """y = [LN](x2d) @ w + b (+ residual). w is bf16 (K, N); full-K contraction per step."""
    M, K = x2d.shape
    N = w.shape[1]
    TM = _pick_tile(M, _ROW_TARGET, 8)
    TN = _pick_tile(N, 512, 128)
    if gamma is None:
        gamma = jnp.ones((K,), jnp.float32)
        beta = jnp.zeros((K,), jnp.float32)
    g2, bt2, b2 = gamma.reshape(1, K), beta.reshape(1, K), b.reshape(1, N)

    x_spec = pl.BlockSpec((TM, K), lambda i, j: (i, 0))   # resident across j (constant idx)
    g_spec = pl.BlockSpec((1, K), lambda i, j: (0, 0))
    w_spec = pl.BlockSpec((K, TN), lambda i, j: (0, j))
    b_spec = pl.BlockSpec((1, TN), lambda i, j: (0, j))
    o_spec = pl.BlockSpec((TM, TN), lambda i, j: (i, j))

    flops = 2 * M * K * N + (10 * M * K if apply_ln else 0)
    bytes_acc = 4 * M * K + 2 * K * N + 4 * N + 4 * M * N
    if residual is None:
        kern = functools.partial(_linear_kernel, eps=_EPS, apply_ln=apply_ln)
        in_specs = [x_spec, g_spec, g_spec, w_spec, b_spec]
        args = (x2d, g2, bt2, w, b2)
    else:
        kern = functools.partial(_linear_residual_kernel, eps=_EPS, apply_ln=apply_ln)
        in_specs = [x_spec, g_spec, g_spec, w_spec, b_spec, o_spec]
        args = (x2d, g2, bt2, w, b2, residual)
        bytes_acc += 4 * M * N

    return pl.pallas_call(
        kern,
        out_shape=jax.ShapeDtypeStruct((M, N), x2d.dtype),
        grid=(M // TM, N // TN),
        in_specs=in_specs,
        out_specs=o_spec,
        compiler_params=pltpu.CompilerParams(
            dimension_semantics=("parallel", "parallel"),
            vmem_limit_bytes=_VMEM_LIMIT),
        cost_estimate=pl.CostEstimate(flops=flops, transcendentals=0,
                                      bytes_accessed=bytes_acc),
    )(*args)


# ------------------------------------------------------------------- kernel 3: attention core
def _attn_kernel(qkv_ref, pad_ref, o_ref, *, heads, d_model, scale):
    # qkv_ref: (S, 3*D) fused q|k|v slab; pad_ref: (1, S) with 1.0 at padded keys;
    # o_ref: (S, D). All heads of one batch element processed in this single grid step.
    dh = d_model // heads
    pad = pad_ref[...]
    for h in range(heads):  # static unroll; heads is small
        q = qkv_ref[:, h * dh:(h + 1) * dh].astype(jnp.float32) * scale
        k = qkv_ref[:, d_model + h * dh: d_model + (h + 1) * dh]
        v = qkv_ref[:, 2 * d_model + h * dh: 2 * d_model + (h + 1) * dh]
        s = lax.dot_general(q.astype(jnp.bfloat16), k.astype(jnp.bfloat16),
                            (((1,), (1,)), ((), ())),
                            preferred_element_type=jnp.float32)          # (S, S)
        s = jnp.where(pad > 0.5, -1e18, s)                               # key-axis mask
        m = jnp.max(s, axis=-1, keepdims=True)
        e = jnp.exp(s - m)
        p = e / jnp.sum(e, axis=-1, keepdims=True)
        ctx = jnp.dot(p.astype(jnp.bfloat16), v.astype(jnp.bfloat16),
                      preferred_element_type=jnp.float32)
        o_ref[:, h * dh:(h + 1) * dh] = ctx.astype(o_ref.dtype)


def attention_pallas(qkv3, pad3, heads):
    """qkv3: (B, S, 3*D) fused projections; pad3: (B, 1, S) float, 1.0 at padded keys."""
    # TODO(synk): whole-sequence scores per batch element; a flash-style kv-tiled variant
    #             would be needed for long sequences (n_sents is small by construction).
    B, S, threeD = qkv3.shape
    D = threeD // 3
    dh = D // heads
    scale = 1.0 / math.sqrt(dh)
    return pl.pallas_call(
        functools.partial(_attn_kernel, heads=heads, d_model=D, scale=scale),
        out_shape=jax.ShapeDtypeStruct((B, S, D), qkv3.dtype),
        grid=(B,),
        in_specs=[pl.BlockSpec((pl.Squeezed(), S, threeD), lambda b: (b, 0, 0)),
                  pl.BlockSpec((pl.Squeezed(), 1, S), lambda b: (b, 0, 0))],
        out_specs=pl.BlockSpec((pl.Squeezed(), S, D), lambda b: (b, 0, 0)),
        compiler_params=pltpu.CompilerParams(
            dimension_semantics=("parallel",)),
        cost_estimate=pl.CostEstimate(flops=4 * B * S * S * D,
                                      transcendentals=B * heads * S * S,
                                      bytes_accessed=4 * B * S * (3 * D + D) + 4 * B * S),
    )(qkv3, pad3)


# ---------------------------------------------------- kernel 4: fused FFN (F-chunked reduce)
def _ffn_kernel(x_ref, g_ref, bta_ref, w1_ref, b1_ref, w2_ref, b2_ref, o_ref,
                ln_ref, acc_ref, *, eps):
    c = pl.program_id(1)

    @pl.when(c == 0)
    def _():
        x = x_ref[...].astype(jnp.float32)
        mu = jnp.mean(x, axis=-1, keepdims=True)
        xc = x - mu
        var = jnp.mean(xc * xc, axis=-1, keepdims=True)
        ln = xc * lax.rsqrt(var + eps) * g_ref[...] + bta_ref[...]
        ln_ref[...] = ln.astype(ln_ref.dtype)          # bf16 scratch, reused per F-chunk
        acc_ref[...] = jnp.zeros_like(acc_ref)

    # one F-chunk: (TM, FC) intermediate only, never the full (TM, F)
    h = jnp.dot(ln_ref[...], w1_ref[...], preferred_element_type=jnp.float32) + b1_ref[...]
    h = _gelu(h)
    acc_ref[...] += jnp.dot(h.astype(jnp.bfloat16), w2_ref[...],
                            preferred_element_type=jnp.float32)

    @pl.when(c == pl.num_programs(1) - 1)
    def _():
        o_ref[...] = (acc_ref[...] + b2_ref[...]
                      + x_ref[...].astype(jnp.float32)).astype(o_ref.dtype)


def ffn_pallas(x2d, gamma, beta, w1, b1, w2, b2, eps=_EPS):
    M, D = x2d.shape
    F = w1.shape[1]
    TM = _pick_tile(M, _ROW_TARGET, 8)
    FC = _pick_tile(F, 512, 128)
    flops = 4 * M * D * F + 10 * M * D
    bytes_acc = 2 * 4 * M * D + 2 * 2 * D * F + 4 * (F + 3 * D)
    return pl.pallas_call(
        functools.partial(_ffn_kernel, eps=eps),
        out_shape=jax.ShapeDtypeStruct((M, D), x2d.dtype),
        grid=(M // TM, F // FC),
        in_specs=[
            pl.BlockSpec((TM, D), lambda i, c: (i, 0)),   # x: resident across F-chunks
            pl.BlockSpec((1, D), lambda i, c: (0, 0)),
            pl.BlockSpec((1, D), lambda i, c: (0, 0)),
            pl.BlockSpec((D, FC), lambda i, c: (0, c)),   # w1 chunk (bf16)
            pl.BlockSpec((1, FC), lambda i, c: (0, c)),
            pl.BlockSpec((FC, D), lambda i, c: (c, 0)),   # w2 chunk (bf16)
            pl.BlockSpec((1, D), lambda i, c: (0, 0)),
        ],
        out_specs=pl.BlockSpec((TM, D), lambda i, c: (i, 0)),
        scratch_shapes=[pltpu.VMEM((TM, D), jnp.bfloat16),   # LN(x)
                        pltpu.VMEM((TM, D), jnp.float32)],   # f32 accumulator
        compiler_params=pltpu.CompilerParams(
            dimension_semantics=("parallel", "arbitrary"),
            vmem_limit_bytes=_VMEM_LIMIT),
        cost_estimate=pl.CostEstimate(flops=flops, transcendentals=M * F,
                                      bytes_accessed=bytes_acc),
    )(x2d, gamma.reshape(1, D), beta.reshape(1, D), w1, b1.reshape(1, F),
      w2, b2.reshape(1, D))


# --------------------------------------------- kernel 5: LN + wo + sigmoid + mask (final head)
def _score_kernel(x_ref, g_ref, b_ref, w_ref, wb_ref, m_ref, o_ref, *, eps):
    x = x_ref[...].astype(jnp.float32)
    mu = jnp.mean(x, axis=-1, keepdims=True)
    xc = x - mu
    var = jnp.mean(xc * xc, axis=-1, keepdims=True)
    ln = xc * lax.rsqrt(var + eps) * g_ref[...] + b_ref[...]
    logits = jnp.sum(ln * w_ref[...], axis=-1, keepdims=True) + wb_ref[...]   # (TM, 1)
    scores = 1.0 / (1.0 + jnp.exp(-logits))
    o_ref[...] = (scores * m_ref[...]).astype(o_ref.dtype)


def score_pallas(x2d, gamma, beta, w_wo, b_wo, mask_col, eps=_EPS):
    M, D = x2d.shape
    TM = _pick_tile(M, 512, 8)
    return pl.pallas_call(
        functools.partial(_score_kernel, eps=eps),
        out_shape=jax.ShapeDtypeStruct((M, 1), x2d.dtype),
        grid=(M // TM,),
        in_specs=[
            pl.BlockSpec((TM, D), lambda i: (i, 0)),
            pl.BlockSpec((1, D), lambda i: (0, 0)),
            pl.BlockSpec((1, D), lambda i: (0, 0)),
            pl.BlockSpec((1, D), lambda i: (0, 0)),
            pl.BlockSpec((1, 1), lambda i: (0, 0)),
            pl.BlockSpec((TM, 1), lambda i: (i, 0)),
        ],
        out_specs=pl.BlockSpec((TM, 1), lambda i: (i, 0)),
        compiler_params=pltpu.CompilerParams(dimension_semantics=("parallel",)),
        cost_estimate=pl.CostEstimate(flops=12 * M * D, transcendentals=2 * M,
                                      bytes_accessed=4 * M * D + 4 * 4 * D + 8 * M),
    )(x2d, gamma.reshape(1, D), beta.reshape(1, D),
      w_wo.reshape(1, D), b_wo.reshape(1, 1), mask_col)


# ------------------------------------------------------------------------ full forward pass
def ext_transformer_encoder_forward(top_vecs, mask, params, heads):
    """top_vecs: (B, S, D) f32, mask: (B, S) bool (True = valid sentence)."""
    B, S, D = top_vecs.shape
    assert D % heads == 0
    maskf = mask.astype(top_vecs.dtype)
    pad3 = (1.0 - maskf).reshape(B, 1, S)           # 1.0 at padded positions == ~mask
    pe = params["pe"][:S]                           # (S, D)

    x = prep_pallas(top_vecs, maskf, pe)            # x = top_vecs * mask + pe  (fused)

    for i, lp in enumerate(params["layers"]):
        x2d = x.reshape(B * S, D)
        # pre-attention LN fused into the fused Q/K/V GEMM (skipped for layer 0)
        qkv = linear_pallas(x2d, lp["w_qkv"], lp["b_qkv"],
                            gamma=lp["ln_g"], beta=lp["ln_b"], apply_ln=(i != 0))
        # all heads read straight out of the (B, S, 3D) slab; output is (B, S, D)
        ctx = attention_pallas(qkv.reshape(B, S, 3 * D), pad3, heads)
        # output projection + residual (dropout = identity in eval), fused in-GEMM
        attn_out = linear_pallas(ctx.reshape(B * S, D), lp["w_o"], lp["b_o"],
                                 residual=x2d)
        # PositionwiseFeedForward: LN -> W1 -> gelu -> W2 -> +residual, fully fused
        x2d = ffn_pallas(attn_out, lp["ffn_ln_g"], lp["ffn_ln_b"],
                         lp["w_1"], lp["b_1"], lp["w_2"], lp["b_2"])
        x = x2d.reshape(B, S, D)

    scores = score_pallas(x.reshape(B * S, D), params["final_ln_g"], params["final_ln_b"],
                          params["w_wo"], params["b_wo"], maskf.reshape(B * S, 1))
    return scores.reshape(B, S)


# ------------------------------------------------------------------------ pure-JAX reference
def _ref_layernorm(x, g, b, eps=_EPS):
    mu = jnp.mean(x, -1, keepdims=True)
    xc = x - mu
    var = jnp.mean(xc * xc, -1, keepdims=True)
    return xc * lax.rsqrt(var + eps) * g + b


def _ref_forward(top_vecs, mask, params, heads):
    """Mirrors the kernels' mixed precision (bf16 matmul inputs, f32 everything else)."""
    B, S, D = top_vecs.shape
    dh = D // heads
    scale = 1.0 / math.sqrt(dh)
    maskf = mask.astype(jnp.float32)
    x = top_vecs * maskf[:, :, None] + params["pe"][:S][None]
    pad = (1.0 - maskf)[:, None, None, :]                     # (B,1,1,S)

    def bdot(a, w):
        return jnp.dot(a.astype(jnp.bfloat16), w, preferred_element_type=jnp.float32)

    for i, lp in enumerate(params["layers"]):
        inp = _ref_layernorm(x, lp["ln_g"], lp["ln_b"]) if i != 0 else x
        qkv = bdot(inp.reshape(B * S, D), lp["w_qkv"]) + lp["b_qkv"]
        q, k, v = jnp.split(qkv, 3, axis=1)

        def sh(t):
            return t.reshape(B, S, heads, dh).transpose(0, 2, 1, 3)

        q, k, v = sh(q) * scale, sh(k), sh(v)
        s = jnp.einsum("bhqd,bhkd->bhqk", q.astype(jnp.bfloat16), k.astype(jnp.bfloat16),
                       preferred_element_type=jnp.float32)
        s = jnp.where(pad > 0.5, -1e18, s)
        m = jnp.max(s, -1, keepdims=True)
        e = jnp.exp(s - m)
        p = e / jnp.sum(e, -1, keepdims=True)
        ctx = jnp.einsum("bhqk,bhkd->bhqd", p.astype(jnp.bfloat16), v.astype(jnp.bfloat16),
                         preferred_element_type=jnp.float32)
        ctx = ctx.transpose(0, 2, 1, 3).reshape(B * S, D)
        out = (bdot(ctx, lp["w_o"]) + lp["b_o"]).reshape(B, S, D) + x
        ln = _ref_layernorm(out, lp["ffn_ln_g"], lp["ffn_ln_b"])
        h = _gelu(bdot(ln.reshape(B * S, D), lp["w_1"]) + lp["b_1"])
        x = (bdot(h, lp["w_2"]) + lp["b_2"]).reshape(B, S, D) + out

    xl = _ref_layernorm(x, params["final_ln_g"], params["final_ln_b"])
    logits = jnp.sum(xl * params["w_wo"].reshape(1, 1, D), axis=-1) + params["b_wo"][0]
    return (1.0 / (1.0 + jnp.exp(-logits))) * maskf


# ---------------------------------------------------------------------------------- params
def init_params(key, d_model, d_ff, heads, num_layers, max_len=5000):
    keys = iter(jax.random.split(key, 8 * num_layers + 2))

    def dense(n_in, n_out, scale=0.05, dtype=jnp.bfloat16):
        w = scale * jax.random.normal(next(keys), (n_in, n_out), jnp.float32)
        return w.astype(dtype)

    def bias(n, scale=0.02):
        return scale * jax.random.normal(next(keys), (n,), jnp.float32)

    layers = []
    for _ in range(num_layers):
        layers.append(dict(
            ln_g=jnp.ones((d_model,), jnp.float32),
            ln_b=jnp.zeros((d_model,), jnp.float32),
            w_qkv=dense(d_model, 3 * d_model), b_qkv=bias(3 * d_model),
            w_o=dense(d_model, d_model), b_o=bias(d_model),
            ffn_ln_g=jnp.ones((d_model,), jnp.float32),
            ffn_ln_b=jnp.zeros((d_model,), jnp.float32),
            w_1=dense(d_model, d_ff), b_1=bias(d_ff),
            w_2=dense(d_ff, d_model), b_2=bias(d_model),
        ))
    return dict(
        pe=_build_pe(max_len, d_model),
        layers=layers,
        final_ln_g=jnp.ones((d_model,), jnp.float32),
        final_ln_b=jnp.zeros((d_model,), jnp.float32),
        w_wo=dense(d_model, 1, dtype=jnp.float32),    # tiny head kept in f32
        b_wo=bias(1),
    )


if __name__ == "__main__":
    # Small deterministic example: batch=2, n_sents=8, d_model=128, heads=4, d_ff=1024,
    # 2 layers (d_ff=1024 chosen so the FFN F-chunking path is exercised: 2 chunks of 512).
    B, S = 2, 8
    d_model, heads, d_ff, num_layers = 128, 4, 1024, 2

    key = jax.random.PRNGKey(0)
    k_inp, k_par = jax.random.split(key)
    top_vecs = jax.random.normal(k_inp, (B, S, d_model), dtype=jnp.float32)
    lengths = jnp.array([S, 5])
    mask = jnp.arange(S)[None, :] < lengths[:, None]          # bool (B, S), True = valid

    params = init_params(k_par, d_model, d_ff, heads, num_layers, max_len=512)

    forward = jax.jit(ext_transformer_encoder_forward, static_argnums=(3,))
    out = forward(top_vecs, mask, params, heads)
    jax.block_until_ready(out)

    ref = _ref_forward(top_vecs, mask, params, heads)
    assert out.shape == (B, S)
    err = float(jnp.max(jnp.abs(out - ref)))
    assert jnp.allclose(out, ref, atol=5e-3, rtol=5e-3), f"mismatch vs reference: {err}"

    print("KERNEL_OK")
</pallas_src>

<mosaic_0001>
module attributes {stable_mosaic.version = 11 : i64} {
  func.func @_prep_kernel(%arg0: i32, %arg1: i32, %arg2: memref<1x8x128xf32, #tpu.memory_space<vmem>>, %arg3: memref<1x8x1xf32, #tpu.memory_space<vmem>>, %arg4: memref<8x128xf32, #tpu.memory_space<vmem>>, %arg5: memref<1x8x128xf32, #tpu.memory_space<vmem>>) attributes {dimension_semantics = [#tpu.dimension_semantics<parallel>, #tpu.dimension_semantics<parallel>], iteration_bounds = array<i64: 1, 2>, scalar_prefetch = 0 : i64, scratch_operands = 0 : i64, tpu.core_type = #tpu.core_type<tc>, window_params = [{transform_indices = @transform_0, window_bounds = array<i64: 1, 8, 128>}, {transform_indices = @transform_1, window_bounds = array<i64: 1, 8, 1>}, {transform_indices = @transform_2, window_bounds = array<i64: 8, 128>}, {transform_indices = @transform_3, window_bounds = array<i64: 1, 8, 128>}]} {
    %c0 = arith.constant 0 : index
    %c0_0 = arith.constant 0 : index
    %c0_1 = arith.constant 0 : index
    %0 = vector.load %arg2[%c0, %c0_0, %c0_1] : memref<1x8x128xf32, #tpu.memory_space<vmem>>, vector<1x8x128xf32>
    %1 = vector.shape_cast %0 : vector<1x8x128xf32> to vector<8x128xf32>
    %c0_2 = arith.constant 0 : index
    %c0_3 = arith.constant 0 : index
    %c0_4 = arith.constant 0 : index
    %2 = vector.load %arg3[%c0_2, %c0_3, %c0_4] : memref<1x8x1xf32, #tpu.memory_space<vmem>>, vector<1x8x1xf32>
    %3 = vector.shape_cast %2 : vector<1x8x1xf32> to vector<8x1xf32>
    %4 = vector.broadcast %3 : vector<8x1xf32> to vector<8x128xf32>
    %5 = arith.mulf %1, %4 : vector<8x128xf32>
    %c0_5 = arith.constant 0 : index
    %c0_6 = arith.constant 0 : index
    %6 = vector.load %arg4[%c0_5, %c0_6] : memref<8x128xf32, #tpu.memory_space<vmem>>, vector<8x128xf32>
    %7 = arith.addf %5, %6 : vector<8x128xf32>
    %c0_7 = arith.constant 0 : index
    %c0_8 = arith.constant 0 : index
    %c0_9 = arith.constant 0 : index
    %8 = vector.load %arg5[%c0_7, %c0_8, %c0_9] : memref<1x8x128xf32, #tpu.memory_space<vmem>>, vector<1x8x128xf32>
    %9 = vector.shape_cast %8 : vector<1x8x128xf32> to vector<8x128xf32>
    %10 = vector.shape_cast %7 : vector<8x128xf32> to vector<1x8x128xf32>
    tpu.vector_store %arg5[%c0_7, %c0_8, %c0_9], %10 {strides = array<i32>} : memref<1x8x128xf32, #tpu.memory_space<vmem>>, vector<1x8x128xf32>,
    return
  }
  func.func @transform_0(%arg0: i32, %arg1: i32) -> (i32, i32, i32) {
    %c0_i32 = arith.constant 0 : i32
    %c0_i32_0 = arith.constant 0 : i32
    return %arg1, %arg0, %c0_i32 : i32, i32, i32
  }
  func.func @transform_1(%arg0: i32, %arg1: i32) -> (i32, i32, i32) {
    %c0_i32 = arith.constant 0 : i32
    %c0_i32_0 = arith.constant 0 : i32
    return %arg1, %arg0, %c0_i32 : i32, i32, i32
  }
  func.func @transform_2(%arg0: i32, %arg1: i32) -> (i32, i32) {
    %c0_i32 = arith.constant 0 : i32
    %c0_i32_0 = arith.constant 0 : i32
    return %arg0, %c0_i32 : i32, i32
  }
  func.func @transform_3(%arg0: i32, %arg1: i32) -> (i32, i32, i32) {
    %c0_i32 = arith.constant 0 : i32
    %c0_i32_0 = arith.constant 0 : i32
    return %arg1, %arg0, %c0_i32 : i32, i32, i32
  }
}

module attributes {stable_mosaic.version = 11 : i64} {
  func.func @_linear_kernel(%arg0: i32, %arg1: i32, %arg2: memref<16x128xf32, #tpu.memory_space<vmem>>, %arg3: memref<1x128xf32, #tpu.memory_space<vmem>>, %arg4: memref<1x128xf32, #tpu.memory_space<vmem>>, %arg5: memref<128x384xbf16, #tpu.memory_space<vmem>>, %arg6: memref<1x384xf32, #tpu.memory_space<vmem>>, %arg7: memref<16x384xf32, #tpu.memory_space<vmem>>) attributes {dimension_semantics = [#tpu.dimension_semantics<parallel>, #tpu.dimension_semantics<parallel>], iteration_bounds = array<i64: 1, 1>, scalar_prefetch = 0 : i64, scratch_operands = 0 : i64, tpu.core_type = #tpu.core_type<tc>, window_params = [{transform_indices = @transform_0, window_bounds = array<i64: 16, 128>}, {pipeline_mode = #tpu.pipeline_mode<synchronous>, transform_indices = @transform_1, window_bounds = array<i64: 1, 128>}, {pipeline_mode = #tpu.pipeline_mode<synchronous>, transform_indices = @transform_2, window_bounds = array<i64: 1, 128>}, {transform_indices = @transform_3, window_bounds = array<i64: 128, 384>}, {transform_indices = @transform_4, window_bounds = array<i64: 1, 384>}, {transform_indices = @transform_5, window_bounds = array<i64: 16, 384>}]} {
    %c0 = arith.constant 0 : index
    %c0_0 = arith.constant 0 : index
    %0 = vector.load %arg2[%c0, %c0_0] : memref<16x128xf32, #tpu.memory_space<vmem>>, vector<16x128xf32>
    %1 = arith.truncf %0 : vector<16x128xf32> to vector<16x128xbf16>
    %c0_1 = arith.constant 0 : index
    %c0_2 = arith.constant 0 : index
    %2 = vector.load %arg5[%c0_1, %c0_2] : memref<128x384xbf16, #tpu.memory_space<vmem>>, vector<128x384xbf16>
    %cst = arith.constant dense<0.000000e+00> : vector<16x384xf32>
    %3 = tpu.matmul %1, %2, %cst {dimension_numbers = #tpu.dot_dimension_numbers<[1], [0], [0], [1], [0, 0, 1, 1], [], []>} : vector<16x128xbf16>, vector<128x384xbf16>, vector<16x384xf32> -> vector<16x384xf32>
    %c0_3 = arith.constant 0 : index
    %c0_4 = arith.constant 0 : index
    %4 = vector.load %arg6[%c0_3, %c0_4] : memref<1x384xf32, #tpu.memory_space<vmem>>, vector<1x384xf32>
    %5 = vector.broadcast %4 : vector<1x384xf32> to vector<16x384xf32>
    %6 = arith.addf %3, %5 : vector<16x384xf32>
    %c0_5 = arith.constant 0 : index
    %c0_6 = arith.constant 0 : index
    %7 = vector.load %arg7[%c0_5, %c0_6] : memref<16x384xf32, #tpu.memory_space<vmem>>, vector<16x384xf32>
    tpu.vector_store %arg7[%c0_5, %c0_6], %6 {strides = array<i32>} : memref<16x384xf32, #tpu.memory_space<vmem>>, vector<16x384xf32>,
    return
  }
  func.func @transform_0(%arg0: i32, %arg1: i32) -> (i32, i32) {
    %c0_i32 = arith.constant 0 : i32
    %c0_i32_0 = arith.constant 0 : i32
    return %arg0, %c0_i32 : i32, i32
  }
  func.func @transform_1(%arg0: i32, %arg1: i32) -> (i32, i32) {
    %c0_i32 = arith.constant 0 : i32
    %c0_i32_0 = arith.constant 0 : i32
    %c0_i32_1 = arith.constant 0 : i32
    return %c0_i32, %c0_i32_0 : i32, i32
  }
  func.func @transform_2(%arg0: i32, %arg1: i32) -> (i32, i32) {
    %c0_i32 = arith.constant 0 : i32
    %c0_i32_0 = arith.constant 0 : i32
    %c0_i32_1 = arith.constant 0 : i32
    return %c0_i32, %c0_i32_0 : i32, i32
  }
  func.func @transform_3(%arg0: i32, %arg1: i32) -> (i32, i32) {
    %c0_i32 = arith.constant 0 : i32
    %c0_i32_0 = arith.constant 0 : i32
    return %c0_i32, %arg1 : i32, i32
  }
  func.func @transform_4(%arg0: i32, %arg1: i32) -> (i32, i32) {
    %c0_i32 = arith.constant 0 : i32
    %c0_i32_0 = arith.constant 0 : i32
    return %c0_i32, %arg1 : i32, i32
  }
  func.func @transform_5(%arg0: i32, %arg1: i32) -> (i32, i32) {
    %c0_i32 = arith.constant 0 : i32
    return %arg0, %arg1 : i32, i32
  }
}

module attributes {stable_mosaic.version = 11 : i64} {
  func.func @_attn_kernel(%arg0: i32, %arg1: memref<1x8x384xf32, #tpu.memory_space<vmem>>, %arg2: memref<1x1x8xf32, #tpu.memory_space<vmem>>, %arg3: memref<1x8x128xf32, #tpu.memory_space<vmem>>) attributes {dimension_semantics = [#tpu.dimension_semantics<parallel>], iteration_bounds = array<i64: 2>, scalar_prefetch = 0 : i64, scratch_operands = 0 : i64, tpu.core_type = #tpu.core_type<tc>, window_params = [{transform_indices = @transform_0, window_bounds = array<i64: 1, 8, 384>}, {transform_indices = @transform_1, window_bounds = array<i64: 1, 1, 8>}, {transform_indices = @transform_2, window_bounds = array<i64: 1, 8, 128>}]} {
    %c0 = arith.constant 0 : index
    %c0_0 = arith.constant 0 : index
    %c0_1 = arith.constant 0 : index
    %0 = vector.load %arg2[%c0, %c0_0, %c0_1] : memref<1x1x8xf32, #tpu.memory_space<vmem>>, vector<1x1x8xf32>
    %1 = vector.shape_cast %0 : vector<1x1x8xf32> to vector<1x8xf32>
    %c0_2 = arith.constant 0 : index
    %c0_3 = arith.constant 0 : index
    %c0_4 = arith.constant 0 : index
    %2 = vector.load %arg1[%c0_2, %c0_3, %c0_4] : memref<1x8x384xf32, #tpu.memory_space<vmem>>, vector<1x8x32xf32>
    %3 = vector.shape_cast %2 : vector<1x8x32xf32> to vector<8x32xf32>
    %cst = arith.constant 0.176776692 : f32
    %4 = vector.broadcast %cst : f32 to vector<8x32xf32>
    %5 = arith.mulf %3, %4 : vector<8x32xf32>
    %c0_5 = arith.constant 0 : index
    %c0_6 = arith.constant 0 : index
    %c128 = arith.constant 128 : index
    %6 = vector.load %arg1[%c0_5, %c0_6, %c128] : memref<1x8x384xf32, #tpu.memory_space<vmem>>, vector<1x8x32xf32>
    %7 = vector.shape_cast %6 : vector<1x8x32xf32> to vector<8x32xf32>
    %c0_7 = arith.constant 0 : index
    %c0_8 = arith.constant 0 : index
    %c256 = arith.constant 256 : index
    %8 = vector.load %arg1[%c0_7, %c0_8, %c256] : memref<1x8x384xf32, #tpu.memory_space<vmem>>, vector<1x8x32xf32>
    %9 = vector.shape_cast %8 : vector<1x8x32xf32> to vector<8x32xf32>
    %10 = arith.truncf %5 : vector<8x32xf32> to vector<8x32xbf16>
    %11 = arith.truncf %7 : vector<8x32xf32> to vector<8x32xbf16>
    %cst_9 = arith.constant dense<0.000000e+00> : vector<8x8xf32>
    %12 = tpu.matmul %10, %11, %cst_9 {dimension_numbers = #tpu.dot_dimension_numbers<[1], [1], [0], [0], [0, 0, 1, 0], [], []>} : vector<8x32xbf16>, vector<8x32xbf16>, vector<8x8xf32> -> vector<8x8xf32>
    %cst_10 = arith.constant 5.000000e-01 : f32
    %13 = vector.broadcast %cst_10 : f32 to vector<1x8xf32>
    %14 = arith.cmpf ogt, %1, %13 : vector<1x8xf32>
    %cst_11 = arith.constant -9.99999984E+17 : f32
    %15 = vector.shape_cast %14 : vector<1x8xi1> to vector<1x8xi1>
    %16 = vector.broadcast %15 : vector<1x8xi1> to vector<8x8xi1>
    %17 = vector.broadcast %cst_11 : f32 to vector<8x8xf32>
    %18 = arith.select %16, %17, %12 : vector<8x8xi1>, vector<8x8xf32>
    %cst_12 = arith.constant dense<0xFF800000> : vector<8xf32>
    %19 = vector.multi_reduction <maximumf>, %18, %cst_12 [1] : vector<8x8xf32> to vector<8xf32>
    %20 = vector.shape_cast %19 : vector<8xf32> to vector<8x1xf32>
    %21 = vector.broadcast %20 : vector<8x1xf32> to vector<8x8xf32>
    %22 = arith.subf %18, %21 : vector<8x8xf32>
    %23 = math.exp %22 : vector<8x8xf32>
    %cst_13 = arith.constant dense<0.000000e+00> : vector<8xf32>
    %24 = vector.multi_reduction <add>, %23, %cst_13 [1] : vector<8x8xf32> to vector<8xf32>
    %25 = vector.shape_cast %24 : vector<8xf32> to vector<8x1xf32>
    %26 = vector.broadcast %25 : vector<8x1xf32> to vector<8x8xf32>
    %27 = arith.divf %23, %26 : vector<8x8xf32>
    %28 = arith.truncf %27 : vector<8x8xf32> to vector<8x8xbf16>
    %29 = arith.truncf %9 : vector<8x32xf32> to vector<8x32xbf16>
    %cst_14 = arith.constant dense<0.000000e+00> : vector<8x32xf32>
    %30 = tpu.matmul %28, %29, %cst_14 {dimension_numbers = #tpu.dot_dimension_numbers<[1], [0], [0], [1], [0, 0, 1, 1], [], []>} : vector<8x8xbf16>, vector<8x32xbf16>, vector<8x32xf32> -> vector<8x32xf32>
    %c0_15 = arith.constant 0 : index
    %c0_16 = arith.constant 0 : index
    %c0_17 = arith.constant 0 : index
    %31 = vector.load %arg3[%c0_15, %c0_16, %c0_17] : memref<1x8x128xf32, #tpu.memory_space<vmem>>, vector<1x8x32xf32>
    %32 = vector.shape_cast %31 : vector<1x8x32xf32> to vector<8x32xf32>
    %33 = vector.shape_cast %30 : vector<8x32xf32> to vector<1x8x32xf32>
    tpu.vector_store %arg3[%c0_15, %c0_16, %c0_17], %33 {strides = array<i32>} : memref<1x8x128xf32, #tpu.memory_space<vmem>>, vector<1x8x32xf32>,
    %c0_18 = arith.constant 0 : index
    %c0_19 = arith.constant 0 : index
    %c32 = arith.constant 32 : index
    %34 = vector.load %arg1[%c0_18, %c0_19, %c32] : memref<1x8x384xf32, #tpu.memory_space<vmem>>, vector<1x8x32xf32>
    %35 = vector.shape_cast %34 : vector<1x8x32xf32> to vector<8x32xf32>
    %cst_20 = arith.constant 0.176776692 : f32
    %36 = vector.broadcast %cst_20 : f32 to vector<8x32xf32>
    %37 = arith.mulf %35, %36 : vector<8x32xf32>
    %c0_21 = arith.constant 0 : index
    %c0_22 = arith.constant 0 : index
    %c160 = arith.constant 160 : index
    %38 = vector.load %arg1[%c0_21, %c0_22, %c160] : memref<1x8x384xf32, #tpu.memory_space<vmem>>, vector<1x8x32xf32>
    %39 = vector.shape_cast %38 : vector<1x8x32xf32> to vector<8x32xf32>
    %c0_23 = arith.constant 0 : index
    %c0_24 = arith.constant 0 : index
    %c288 = arith.constant 288 : index
    %40 = vector.load %arg1[%c0_23, %c0_24, %c288] : memref<1x8x384xf32, #tpu.memory_space<vmem>>, vector<1x8x32xf32>
    %41 = vector.shape_cast %40 : vector<1x8x32xf32> to vector<8x32xf32>
    %42 = arith.truncf %37 : vector<8x32xf32> to vector<8x32xbf16>
    %43 = arith.truncf %39 : vector<8x32xf32> to vector<8x32xbf16>
    %cst_25 = arith.constant dense<0.000000e+00> : vector<8x8xf32>
    %44 = tpu.matmul %42, %43, %cst_25 {dimension_numbers = #tpu.dot_dimension_numbers<[1], [1], [0], [0], [0, 0, 1, 0], [], []>} : vector<8x32xbf16>, vector<8x32xbf16>, vector<8x8xf32> -> vector<8x8xf32>
    %cst_26 = arith.constant 5.000000e-01 : f32
    %45 = vector.broadcast %cst_26 : f32 to vector<1x8xf32>
    %46 = arith.cmpf ogt, %1, %45 : vector<1x8xf32>
    %cst_27 = arith.constant -9.99999984E+17 : f32
    %47 = vector.shape_cast %46 : vector<1x8xi1> to vector<1x8xi1>
    %48 = vector.broadcast %47 : vector<1x8xi1> to vector<8x8xi1>
    %49 = vector.broadcast %cst_27 : f32 to vector<8x8xf32>
    %50 = arith.select %48, %49, %44 : vector<8x8xi1>, vector<8x8xf32>
    %cst_28 = arith.constant dense<0xFF800000> : vector<8xf32>
    %51 = vector.multi_reduction <maximumf>, %50, %cst_28 [1] : vector<8x8xf32> to vector<8xf32>
    %52 = vector.shape_cast %51 : vector<8xf32> to vector<8x1xf32>
    %53 = vector.broadcast %52 : vector<8x1xf32> to vector<8x8xf32>
    %54 = arith.subf %50, %53 : vector<8x8xf32>
    %55 = math.exp %54 : vector<8x8xf32>
    %cst_29 = arith.constant dense<0.000000e+00> : vector<8xf32>
    %56 = vector.multi_reduction <add>, %55, %cst_29 [1] : vector<8x8xf32> to vector<8xf32>
    %57 = vector.shape_cast %56 : vector<8xf32> to vector<8x1xf32>
    %58 = vector.broadcast %57 : vector<8x1xf32> to vector<8x8xf32>
    %59 = arith.divf %55, %58 : vector<8x8xf32>
    %60 = arith.truncf %59 : vector<8x8xf32> to vector<8x8xbf16>
    %61 = arith.truncf %41 : vector<8x32xf32> to vector<8x32xbf16>
    %cst_30 = arith.constant dense<0.000000e+00> : vector<8x32xf32>
    %62 = tpu.matmul %60, %61, %cst_30 {dimension_numbers = #tpu.dot_dimension_numbers<[1], [0], [0], [1], [0, 0, 1, 1], [], []>} : vector<8x8xbf16>, vector<8x32xbf16>, vector<8x32xf32> -> vector<8x32xf32>
    %c0_31 = arith.constant 0 : index
    %c0_32 = arith.constant 0 : index
    %c32_33 = arith.constant 32 : index
    %63 = vector.load %arg3[%c0_31, %c0_32, %c32_33] : memref<1x8x128xf32, #tpu.memory_space<vmem>>, vector<1x8x32xf32>
    %64 = vector.shape_cast %63 : vector<1x8x32xf32> to vector<8x32xf32>
    %65 = vector.shape_cast %62 : vector<8x32xf32> to vector<1x8x32xf32>
    tpu.vector_store %arg3[%c0_31, %c0_32, %c32_33], %65 {strides = array<i32>} : memref<1x8x128xf32, #tpu.memory_space<vmem>>, vector<1x8x32xf32>,
    %c0_34 = arith.constant 0 : index
    %c0_35 = arith.constant 0 : index
    %c64 = arith.constant 64 : index
    %66 = vector.load %arg1[%c0_34, %c0_35, %c64] : memref<1x8x384xf32, #tpu.memory_space<vmem>>, vector<1x8x32xf32>
    %67 = vector.shape_cast %66 : vector<1x8x32xf32> to vector<8x32xf32>
    %cst_36 = arith.constant 0.176776692 : f32
    %68 = vector.broadcast %cst_36 : f32 to vector<8x32xf32>
    %69 = arith.mulf %67, %68 : vector<8x32xf32>
    %c0_37 = arith.constant 0 : index
    %c0_38 = arith.constant 0 : index
    %c192 = arith.constant 192 : index
    %70 = vector.load %arg1[%c0_37, %c0_38, %c192] : memref<1x8x384xf32, #tpu.memory_space<vmem>>, vector<1x8x32xf32>
    %71 = vector.shape_cast %70 : vector<1x8x32xf32> to vector<8x32xf32>
    %c0_39 = arith.constant 0 : index
    %c0_40 = arith.constant 0 : index
    %c320 = arith.constant 320 : index
    %72 = vector.load %arg1[%c0_39, %c0_40, %c320] : memref<1x8x384xf32, #tpu.memory_space<vmem>>, vector<1x8x32xf32>
    %73 = vector.shape_cast %72 : vector<1x8x32xf32> to vector<8x32xf32>
    %74 = arith.truncf %69 : vector<8x32xf32> to vector<8x32xbf16>
    %75 = arith.truncf %71 : vector<8x32xf32> to vector<8x32xbf16>
    %cst_41 = arith.constant dense<0.000000e+00> : vector<8x8xf32>
    %76 = tpu.matmul %74, %75, %cst_41 {dimension_numbers = #tpu.dot_dimension_numbers<[1], [1], [0], [0], [0, 0, 1, 0], [], []>} : vector<8x32xbf16>, vector<8x32xbf16>, vector<8x8xf32> -> vector<8x8xf32>
    %cst_42 = arith.constant 5.000000e-01 : f32
    %77 = vector.broadcast %cst_42 : f32 to vector<1x8xf32>
    %78 = arith.cmpf ogt, %1, %77 : vector<1x8xf32>
    %cst_43 = arith.constant -9.99999984E+17 : f32
    %79 = vector.shape_cast %78 : vector<1x8xi1> to vector<1x8xi1>
    %80 = vector.broadcast %79 : vector<1x8xi1> to vector<8x8xi1>
    %81 = vector.broadcast %cst_43 : f32 to vector<8x8xf32>
    %82 = arith.select %80, %81, %76 : vector<8x8xi1>, vector<8x8xf32>
    %cst_44 = arith.constant dense<0xFF800000> : vector<8xf32>
    %83 = vector.multi_reduction <maximumf>, %82, %cst_44 [1] : vector<8x8xf32> to vector<8xf32>
    %84 = vector.shape_cast %83 : vector<8xf32> to vector<8x1xf32>
    %85 = vector.broadcast %84 : vector<8x1xf32> to vector<8x8xf32>
    %86 = arith.subf %82, %85 : vector<8x8xf32>
    %87 = math.exp %86 : vector<8x8xf32>
    %cst_45 = arith.constant dense<0.000000e+00> : vector<8xf32>
    %88 = vector.multi_reduction <add>, %87, %cst_45 [1] : vector<8x8xf32> to vector<8xf32>
    %89 = vector.shape_cast %88 : vector<8xf32> to vector<8x1xf32>
    %90 = vector.broadcast %89 : vector<8x1xf32> to vector<8x8xf32>
    %91 = arith.divf %87, %90 : vector<8x8xf32>
    %92 = arith.truncf %91 : vector<8x8xf32> to vector<8x8xbf16>
    %93 = arith.truncf %73 : vector<8x32xf32> to vector<8x32xbf16>
    %cst_46 = arith.constant dense<0.000000e+00> : vector<8x32xf32>
    %94 = tpu.matmul %92, %93, %cst_46 {dimension_numbers = #tpu.dot_dimension_numbers<[1], [0], [0], [1], [0, 0, 1, 1], [], []>} : vector<8x8xbf16>, vector<8x32xbf16>, vector<8x32xf32> -> vector<8x32xf32>
    %c0_47 = arith.constant 0 : index
    %c0_48 = arith.constant 0 : index
    %c64_49 = arith.constant 64 : index
    %95 = vector.load %arg3[%c0_47, %c0_48, %c64_49] : memref<1x8x128xf32, #tpu.memory_space<vmem>>, vector<1x8x32xf32>
    %96 = vector.shape_cast %95 : vector<1x8x32xf32> to vector<8x32xf32>
    %97 = vector.shape_cast %94 : vector<8x32xf32> to vector<1x8x32xf32>
    tpu.vector_store %arg3[%c0_47, %c0_48, %c64_49], %97 {strides = array<i32>} : memref<1x8x128xf32, #tpu.memory_space<vmem>>, vector<1x8x32xf32>,
    %c0_50 = arith.constant 0 : index
    %c0_51 = arith.constant 0 : index
    %c96 = arith.constant 96 : index
    %98 = vector.load %arg1[%c0_50, %c0_51, %c96] : memref<1x8x384xf32, #tpu.memory_space<vmem>>, vector<1x8x32xf32>
    %99 = vector.shape_cast %98 : vector<1x8x32xf32> to vector<8x32xf32>
    %cst_52 = arith.constant 0.176776692 : f32
    %100 = vector.broadcast %cst_52 : f32 to vector<8x32xf32>
    %101 = arith.mulf %99, %100 : vector<8x32xf32>
    %c0_53 = arith.constant 0 : index
    %c0_54 = arith.constant 0 : index
    %c224 = arith.constant 224 : index
    %102 = vector.load %arg1[%c0_53, %c0_54, %c224] : memref<1x8x384xf32, #tpu.memory_space<vmem>>, vector<1x8x32xf32>
    %103 = vector.shape_cast %102 : vector<1x8x32xf32> to vector<8x32xf32>
    %c0_55 = arith.constant 0 : index
    %c0_56 = arith.constant 0 : index
    %c352 = arith.constant 352 : index
    %104 = vector.load %arg1[%c0_55, %c0_56, %c352] : memref<1x8x384xf32, #tpu.memory_space<vmem>>, vector<1x8x32xf32>
    %105 = vector.shape_cast %104 : vector<1x8x32xf32> to vector<8x32xf32>
    %106 = arith.truncf %101 : vector<8x32xf32> to vector<8x32xbf16>
    %107 = arith.truncf %103 : vector<8x32xf32> to vector<8x32xbf16>
    %cst_57 = arith.constant dense<0.000000e+00> : vector<8x8xf32>
    %108 = tpu.matmul %106, %107, %cst_57 {dimension_numbers = #tpu.dot_dimension_numbers<[1], [1], [0], [0], [0, 0, 1, 0], [], []>} : vector<8x32xbf16>, vector<8x32xbf16>, vector<8x8xf32> -> vector<8x8xf32>
    %cst_58 = arith.constant 5.000000e-01 : f32
    %109 = vector.broadcast %cst_58 : f32 to vector<1x8xf32>
    %110 = arith.cmpf ogt, %1, %109 : vector<1x8xf32>
    %cst_59 = arith.constant -9.99999984E+17 : f32
    %111 = vector.shape_cast %110 : vector<1x8xi1> to vector<1x8xi1>
    %112 = vector.broadcast %111 : vector<1x8xi1> to vector<8x8xi1>
    %113 = vector.broadcast %cst_59 : f32 to vector<8x8xf32>
    %114 = arith.select %112, %113, %108 : vector<8x8xi1>, vector<8x8xf32>
    %cst_60 = arith.constant dense<0xFF800000> : vector<8xf32>
    %115 = vector.multi_reduction <maximumf>, %114, %cst_60 [1] : vector<8x8xf32> to vector<8xf32>
    %116 = vector.shape_cast %115 : vector<8xf32> to vector<8x1xf32>
    %117 = vector.broadcast %116 : vector<8x1xf32> to vector<8x8xf32>
    %118 = arith.subf %114, %117 : vector<8x8xf32>
    %119 = math.exp %118 : vector<8x8xf32>
    %cst_61 = arith.constant dense<0.000000e+00> : vector<8xf32>
    %120 = vector.multi_reduction <add>, %119, %cst_61 [1] : vector<8x8xf32> to vector<8xf32>
    %121 = vector.shape_cast %120 : vector<8xf32> to vector<8x1xf32>
    %122 = vector.broadcast %121 : vector<8x1xf32> to vector<8x8xf32>
    %123 = arith.divf %119, %122 : vector<8x8xf32>
    %124 = arith.truncf %123 : vector<8x8xf32> to vector<8x8xbf16>
    %125 = arith.truncf %105 : vector<8x32xf32> to vector<8x32xbf16>
    %cst_62 = arith.constant dense<0.000000e+00> : vector<8x32xf32>
    %126 = tpu.matmul %124, %125, %cst_62 {dimension_numbers = #tpu.dot_dimension_numbers<[1], [0], [0], [1], [0, 0, 1, 1], [], []>} : vector<8x8xbf16>, vector<8x32xbf16>, vector<8x32xf32> -> vector<8x32xf32>
    %c0_63 = arith.constant 0 : index
    %c0_64 = arith.constant 0 : index
    %c96_65 = arith.constant 96 : index
    %127 = vector.load %arg3[%c0_63, %c0_64, %c96_65] : memref<1x8x128xf32, #tpu.memory_space<vmem>>, vector<1x8x32xf32>
    %128 = vector.shape_cast %127 : vector<1x8x32xf32> to vector<8x32xf32>
    %129 = vector.shape_cast %126 : vector<8x32xf32> to vector<1x8x32xf32>
    tpu.vector_store %arg3[%c0_63, %c0_64, %c96_65], %129 {strides = array<i32>} : memref<1x8x128xf32, #tpu.memory_space<vmem>>, vector<1x8x32xf32>,
    return
  }
  func.func @transform_0(%arg0: i32) -> (i32, i32, i32) {
    %c0_i32 = arith.constant 0 : i32
    %c0_i32_0 = arith.constant 0 : i32
    %c0_i32_1 = arith.constant 0 : i32
    return %arg0, %c0_i32, %c0_i32_0 : i32, i32, i32
  }
  func.func @transform_1(%arg0: i32) -> (i32, i32, i32) {
    %c0_i32 = arith.constant 0 : i32
    %c0_i32_0 = arith.constant 0 : i32
    %c0_i32_1 = arith.constant 0 : i32
    return %arg0, %c0_i32, %c0_i32_0 : i32, i32, i32
  }
  func.func @transform_2(%arg0: i32) -> (i32, i32, i32) {
    %c0_i32 = arith.constant 0 : i32
    %c0_i32_0 = arith.constant 0 : i32
    %c0_i32_1 = arith.constant 0 : i32
    return %arg0, %c0_i32, %c0_i32_0 : i32, i32, i32
  }
}

module attributes {stable_mosaic.version = 11 : i64} {
  func.func @_linear_residual_kernel(%arg0: i32, %arg1: i32, %arg2: memref<16x128xf32, #tpu.memory_space<vmem>>, %arg3: memref<1x128xf32, #tpu.memory_space<vmem>>, %arg4: memref<1x128xf32, #tpu.memory_space<vmem>>, %arg5: memref<128x128xbf16, #tpu.memory_space<vmem>>, %arg6: memref<1x128xf32, #tpu.memory_space<vmem>>, %arg7: memref<16x128xf32, #tpu.memory_space<vmem>>, %arg8: memref<16x128xf32, #tpu.memory_space<vmem>>) attributes {dimension_semantics = [#tpu.dimension_semantics<parallel>, #tpu.dimension_semantics<parallel>], iteration_bounds = array<i64: 1, 1>, scalar_prefetch = 0 : i64, scratch_operands = 0 : i64, tpu.core_type = #tpu.core_type<tc>, window_params = [{transform_indices = @transform_0, window_bounds = array<i64: 16, 128>}, {pipeline_mode = #tpu.pipeline_mode<synchronous>, transform_indices = @transform_1, window_bounds = array<i64: 1, 128>}, {pipeline_mode = #tpu.pipeline_mode<synchronous>, transform_indices = @transform_2, window_bounds = array<i64: 1, 128>}, {transform_indices = @transform_3, window_bounds = array<i64: 128, 128>}, {transform_indices = @transform_4, window_bounds = array<i64: 1, 128>}, {transform_indices = @transform_5, window_bounds = array<i64: 16, 128>}, {transform_indices = @transform_6, window_bounds = array<i64: 16, 128>}]} {
    %c0 = arith.constant 0 : index
    %c0_0 = arith.constant 0 : index
    %0 = vector.load %arg2[%c0, %c0_0] : memref<16x128xf32, #tpu.memory_space<vmem>>, vector<16x128xf32>
    %1 = arith.truncf %0 : vector<16x128xf32> to vector<16x128xbf16>
    %c0_1 = arith.constant 0 : index
    %c0_2 = arith.constant 0 : index
    %2 = vector.load %arg5[%c0_1, %c0_2] : memref<128x128xbf16, #tpu.memory_space<vmem>>, vector<128x128xbf16>
    %cst = arith.constant dense<0.000000e+00> : vector<16x128xf32>
    %3 = tpu.matmul %1, %2, %cst {dimension_numbers = #tpu.dot_dimension_numbers<[1], [0], [0], [1], [0, 0, 1, 1], [], []>} : vector<16x128xbf16>, vector<128x128xbf16>, vector<16x128xf32> -> vector<16x128xf32>
    %c0_3 = arith.constant 0 : index
    %c0_4 = arith.constant 0 : index
    %4 = vector.load %arg6[%c0_3, %c0_4] : memref<1x128xf32, #tpu.memory_space<vmem>>, vector<1x128xf32>
    %5 = vector.broadcast %4 : vector<1x128xf32> to vector<16x128xf32>
    %6 = arith.addf %3, %5 : vector<16x128xf32>
    %c0_5 = arith.constant 0 : index
    %c0_6 = arith.constant 0 : index
    %7 = vector.load %arg7[%c0_5, %c0_6] : memref<16x128xf32, #tpu.memory_space<vmem>>, vector<16x128xf32>
    %8 = arith.addf %6, %7 : vector<16x128xf32>
    %c0_7 = arith.constant 0 : index
    %c0_8 = arith.constant 0 : index
    %9 = vector.load %arg8[%c0_7, %c0_8] : memref<16x128xf32, #tpu.memory_space<vmem>>, vector<16x128xf32>
    tpu.vector_store %arg8[%c0_7, %c0_8], %8 {strides = array<i32>} : memref<16x128xf32, #tpu.memory_space<vmem>>, vector<16x128xf32>,
    return
  }
  func.func @transform_0(%arg0: i32, %arg1: i32) -> (i32, i32) {
    %c0_i32 = arith.constant 0 : i32
    %c0_i32_0 = arith.constant 0 : i32
    return %arg0, %c0_i32 : i32, i32
  }
  func.func @transform_1(%arg0: i32, %arg1: i32) -> (i32, i32) {
    %c0_i32 = arith.constant 0 : i32
    %c0_i32_0 = arith.constant 0 : i32
    %c0_i32_1 = arith.constant 0 : i32
    return %c0_i32, %c0_i32_0 : i32, i32
  }
  func.func @transform_2(%arg0: i32, %arg1: i32) -> (i32, i32) {
    %c0_i32 = arith.constant 0 : i32
    %c0_i32_0 = arith.constant 0 : i32
    %c0_i32_1 = arith.constant 0 : i32
    return %c0_i32, %c0_i32_0 : i32, i32
  }
  func.func @transform_3(%arg0: i32, %arg1: i32) -> (i32, i32) {
    %c0_i32 = arith.constant 0 : i32
    %c0_i32_0 = arith.constant 0 : i32
    return %c0_i32, %arg1 : i32, i32
  }
  func.func @transform_4(%arg0: i32, %arg1: i32) -> (i32, i32) {
    %c0_i32 = arith.constant 0 : i32
    %c0_i32_0 = arith.constant 0 : i32
    return %c0_i32, %arg1 : i32, i32
  }
  func.func @transform_5(%arg0: i32, %arg1: i32) -> (i32, i32) {
    %c0_i32 = arith.constant 0 : i32
    return %arg0, %arg1 : i32, i32
  }
  func.func @transform_6(%arg0: i32, %arg1: i32) -> (i32, i32) {
    %c0_i32 = arith.constant 0 : i32
    return %arg0, %arg1 : i32, i32
  }
}

module attributes {stable_mosaic.version = 11 : i64} {
  func.func @_ffn_kernel(%arg0: i32, %arg1: i32, %arg2: memref<16x128xf32, #tpu.memory_space<vmem>>, %arg3: memref<1x128xf32, #tpu.memory_space<vmem>>, %arg4: memref<1x128xf32, #tpu.memory_space<vmem>>, %arg5: memref<128x512xbf16, #tpu.memory_space<vmem>>, %arg6: memref<1x512xf32, #tpu.memory_space<vmem>>, %arg7: memref<512x128xbf16, #tpu.memory_space<vmem>>, %arg8: memref<1x128xf32, #tpu.memory_space<vmem>>, %arg9: memref<16x128xf32, #tpu.memory_space<vmem>>, %arg10: memref<16x128xbf16, #tpu.memory_space<vmem>>, %arg11: memref<16x128xf32, #tpu.memory_space<vmem>>) attributes {dimension_semantics = [#tpu.dimension_semantics<parallel>, #tpu.dimension_semantics<arbitrary>], iteration_bounds = array<i64: 1, 2>, scalar_prefetch = 0 : i64, scratch_operands = 2 : i64, tpu.core_type = #tpu.core_type<tc>, window_params = [{transform_indices = @transform_0, window_bounds = array<i64: 16, 128>}, {pipeline_mode = #tpu.pipeline_mode<synchronous>, transform_indices = @transform_1, window_bounds = array<i64: 1, 128>}, {pipeline_mode = #tpu.pipeline_mode<synchronous>, transform_indices = @transform_2, window_bounds = array<i64: 1, 128>}, {transform_indices = @transform_3, window_bounds = array<i64: 128, 512>}, {transform_indices = @transform_4, window_bounds = array<i64: 1, 512>}, {transform_indices = @transform_5, window_bounds = array<i64: 512, 128>}, {pipeline_mode = #tpu.pipeline_mode<synchronous>, transform_indices = @transform_6, window_bounds = array<i64: 1, 128>}, {transform_indices = @transform_7, window_bounds = array<i64: 16, 128>}]} {
    %c0_i32 = arith.constant 0 : i32
    %0 = arith.cmpi eq, %arg1, %c0_i32 : i32
    %1 = arith.extui %0 : i1 to i32
    %c0_i32_0 = arith.constant 0 : i32
    %2 = arith.cmpi ne, %1, %c0_i32_0 : i32
    scf.if %2 {
      %c0_18 = arith.constant 0 : index
      %c0_19 = arith.constant 0 : index
      %31 = vector.load %arg2[%c0_18, %c0_19] : memref<16x128xf32, #tpu.memory_space<vmem>>, vector<16x128xf32>
      %cst_20 = arith.constant dense<0.000000e+00> : vector<16xf32>
      %32 = vector.multi_reduction <add>, %31, %cst_20 [1] : vector<16x128xf32> to vector<16xf32>
      %33 = vector.shape_cast %32 : vector<16xf32> to vector<16x1xf32>
      %cst_21 = arith.constant 1.280000e+02 : f32
      %34 = vector.broadcast %cst_21 : f32 to vector<16x1xf32>
      %35 = arith.divf %33, %34 : vector<16x1xf32>
      %36 = vector.broadcast %35 : vector<16x1xf32> to vector<16x128xf32>
      %37 = arith.subf %31, %36 : vector<16x128xf32>
      %38 = arith.mulf %37, %37 : vector<16x128xf32>
      %cst_22 = arith.constant dense<0.000000e+00> : vector<16xf32>
      %39 = vector.multi_reduction <add>, %38, %cst_22 [1] : vector<16x128xf32> to vector<16xf32>
      %40 = vector.shape_cast %39 : vector<16xf32> to vector<16x1xf32>
      %cst_23 = arith.constant 1.280000e+02 : f32
      %41 = vector.broadcast %cst_23 : f32 to vector<16x1xf32>
      %42 = arith.divf %40, %41 : vector<16x1xf32>
      %cst_24 = arith.constant 9.99999997E-7 : f32
      %43 = vector.broadcast %cst_24 : f32 to vector<16x1xf32>
      %44 = arith.addf %42, %43 : vector<16x1xf32>
      %45 = math.rsqrt %44 : vector<16x1xf32>
      %46 = vector.broadcast %45 : vector<16x1xf32> to vector<16x128xf32>
      %47 = arith.mulf %37, %46 : vector<16x128xf32>
      %c0_25 = arith.constant 0 : index
      %c0_26 = arith.constant 0 : index
      %48 = vector.load %arg3[%c0_25, %c0_26] : memref<1x128xf32, #tpu.memory_space<vmem>>, vector<1x128xf32>
      %49 = vector.broadcast %48 : vector<1x128xf32> to vector<16x128xf32>
      %50 = arith.mulf %47, %49 : vector<16x128xf32>
      %c0_27 = arith.constant 0 : index
      %c0_28 = arith.constant 0 : index
      %51 = vector.load %arg4[%c0_27, %c0_28] : memref<1x128xf32, #tpu.memory_space<vmem>>, vector<1x128xf32>
      %52 = vector.broadcast %51 : vector<1x128xf32> to vector<16x128xf32>
      %53 = arith.addf %50, %52 : vector<16x128xf32>
      %54 = arith.truncf %53 : vector<16x128xf32> to vector<16x128xbf16>
      %c0_29 = arith.constant 0 : index
      %c0_30 = arith.constant 0 : index
      %55 = vector.load %arg10[%c0_29, %c0_30] : memref<16x128xbf16, #tpu.memory_space<vmem>>, vector<16x128xbf16>
      tpu.vector_store %arg10[%c0_29, %c0_30], %54 {strides = array<i32>} : memref<16x128xbf16, #tpu.memory_space<vmem>>, vector<16x128xbf16>,
      %cst_31 = arith.constant 0.000000e+00 : f32
      %56 = vector.broadcast %cst_31 : f32 to vector<16x128xf32>
      %c0_32 = arith.constant 0 : index
      %c0_33 = arith.constant 0 : index
      %57 = vector.load %arg11[%c0_32, %c0_33] : memref<16x128xf32, #tpu.memory_space<vmem>>, vector<16x128xf32>
      tpu.vector_store %arg11[%c0_32, %c0_33], %56 {strides = array<i32>} : memref<16x128xf32, #tpu.memory_space<vmem>>, vector<16x128xf32>,
    } else {
    }
    %c0 = arith.constant 0 : index
    %c0_1 = arith.constant 0 : index
    %3 = vector.load %arg10[%c0, %c0_1] : memref<16x128xbf16, #tpu.memory_space<vmem>>, vector<16x128xbf16>
    %c0_2 = arith.constant 0 : index
    %c0_3 = arith.constant 0 : index
    %4 = vector.load %arg5[%c0_2, %c0_3] : memref<128x512xbf16, #tpu.memory_space<vmem>>, vector<128x512xbf16>
    %cst = arith.constant dense<0.000000e+00> : vector<16x512xf32>
    %5 = tpu.matmul %3, %4, %cst {dimension_numbers = #tpu.dot_dimension_numbers<[1], [0], [0], [1], [0, 0, 1, 1], [], []>} : vector<16x128xbf16>, vector<128x512xbf16>, vector<16x512xf32> -> vector<16x512xf32>
    %c0_4 = arith.constant 0 : index
    %c0_5 = arith.constant 0 : index
    %6 = vector.load %arg6[%c0_4, %c0_5] : memref<1x512xf32, #tpu.memory_space<vmem>>, vector<1x512xf32>
    %7 = vector.broadcast %6 : vector<1x512xf32> to vector<16x512xf32>
    %8 = arith.addf %5, %7 : vector<16x512xf32>
    %cst_6 = arith.constant 5.000000e-01 : f32
    %9 = vector.broadcast %cst_6 : f32 to vector<16x512xf32>
    %10 = arith.mulf %9, %8 : vector<16x512xf32>
    %cst_7 = arith.constant 4.471500e-02 : f32
    %11 = vector.broadcast %cst_7 : f32 to vector<16x512xf32>
    %12 = arith.mulf %11, %8 : vector<16x512xf32>
    %13 = arith.mulf %12, %8 : vector<16x512xf32>
    %14 = arith.mulf %13, %8 : vector<16x512xf32>
    %15 = arith.addf %8, %14 : vector<16x512xf32>
    %cst_8 = arith.constant 0.797884583 : f32
    %16 = vector.broadcast %cst_8 : f32 to vector<16x512xf32>
    %17 = arith.mulf %16, %15 : vector<16x512xf32>
    %18 = math.tanh %17 : vector<16x512xf32>
    %cst_9 = arith.constant 1.000000e+00 : f32
    %19 = vector.broadcast %cst_9 : f32 to vector<16x512xf32>
    %20 = arith.addf %19, %18 : vector<16x512xf32>
    %21 = arith.mulf %10, %20 : vector<16x512xf32>
    %c0_10 = arith.constant 0 : index
    %c0_11 = arith.constant 0 : index
    %22 = vector.load %arg11[%c0_10, %c0_11] : memref<16x128xf32, #tpu.memory_space<vmem>>, vector<16x128xf32>
    %23 = arith.truncf %21 : vector<16x512xf32> to vector<16x512xbf16>
    %c0_12 = arith.constant 0 : index
    %c0_13 = arith.constant 0 : index
    %24 = vector.load %arg7[%c0_12, %c0_13] : memref<512x128xbf16, #tpu.memory_space<vmem>>, vector<512x128xbf16>
    %cst_14 = arith.constant dense<0.000000e+00> : vector<16x128xf32>
    %25 = tpu.matmul %23, %24, %cst_14 {dimension_numbers = #tpu.dot_dimension_numbers<[1], [0], [0], [1], [0, 0, 1, 1], [], []>} : vector<16x512xbf16>, vector<512x128xbf16>, vector<16x128xf32> -> vector<16x128xf32>
    %26 = arith.addf %22, %25 : vector<16x128xf32>
    %c0_15 = arith.constant 0 : index
    %c0_16 = arith.constant 0 : index
    %27 = vector.load %arg11[%c0_15, %c0_16] : memref<16x128xf32, #tpu.memory_space<vmem>>, vector<16x128xf32>
    tpu.vector_store %arg11[%c0_15, %c0_16], %26 {strides = array<i32>} : memref<16x128xf32, #tpu.memory_space<vmem>>, vector<16x128xf32>,
    %c1_i32 = arith.constant 1 : i32
    %28 = arith.cmpi eq, %arg1, %c1_i32 : i32
    %29 = arith.extui %28 : i1 to i32
    %c0_i32_17 = arith.constant 0 : i32
    %30 = arith.cmpi ne, %29, %c0_i32_17 : i32
    scf.if %30 {
      %c0_18 = arith.constant 0 : index
      %c0_19 = arith.constant 0 : index
      %31 = vector.load %arg11[%c0_18, %c0_19] : memref<16x128xf32, #tpu.memory_space<vmem>>, vector<16x128xf32>
      %c0_20 = arith.constant 0 : index
      %c0_21 = arith.constant 0 : index
      %32 = vector.load %arg8[%c0_20, %c0_21] : memref<1x128xf32, #tpu.memory_space<vmem>>, vector<1x128xf32>
      %33 = vector.broadcast %32 : vector<1x128xf32> to vector<16x128xf32>
      %34 = arith.addf %31, %33 : vector<16x128xf32>
      %c0_22 = arith.constant 0 : index
      %c0_23 = arith.constant 0 : index
      %35 = vector.load %arg2[%c0_22, %c0_23] : memref<16x128xf32, #tpu.memory_space<vmem>>, vector<16x128xf32>
      %36 = arith.addf %34, %35 : vector<16x128xf32>
      %c0_24 = arith.constant 0 : index
      %c0_25 = arith.constant 0 : index
      %37 = vector.load %arg9[%c0_24, %c0_25] : memref<16x128xf32, #tpu.memory_space<vmem>>, vector<16x128xf32>
      tpu.vector_store %arg9[%c0_24, %c0_25], %36 {strides = array<i32>} : memref<16x128xf32, #tpu.memory_space<vmem>>, vector<16x128xf32>,
    } else {
    }
    return
  }
  func.func @transform_0(%arg0: i32, %arg1: i32) -> (i32, i32) {
    %c0_i32 = arith.constant 0 : i32
    %c0_i32_0 = arith.constant 0 : i32
    return %arg0, %c0_i32 : i32, i32
  }
  func.func @transform_1(%arg0: i32, %arg1: i32) -> (i32, i32) {
    %c0_i32 = arith.constant 0 : i32
    %c0_i32_0 = arith.constant 0 : i32
    %c0_i32_1 = arith.constant 0 : i32
    return %c0_i32, %c0_i32_0 : i32, i32
  }
  func.func @transform_2(%arg0: i32, %arg1: i32) -> (i32, i32) {
    %c0_i32 = arith.constant 0 : i32
    %c0_i32_0 = arith.constant 0 : i32
    %c0_i32_1 = arith.constant 0 : i32
    return %c0_i32, %c0_i32_0 : i32, i32
  }
  func.func @transform_3(%arg0: i32, %arg1: i32) -> (i32, i32) {
    %c0_i32 = arith.constant 0 : i32
    %c0_i32_0 = arith.constant 0 : i32
    return %c0_i32, %arg1 : i32, i32
  }
  func.func @transform_4(%arg0: i32, %arg1: i32) -> (i32, i32) {
    %c0_i32 = arith.constant 0 : i32
    %c0_i32_0 = arith.constant 0 : i32
    return %c0_i32, %arg1 : i32, i32
  }
  func.func @transform_5(%arg0: i32, %arg1: i32) -> (i32, i32) {
    %c0_i32 = arith.constant 0 : i32
    %c0_i32_0 = arith.constant 0 : i32
    return %arg1, %c0_i32 : i32, i32
  }
  func.func @transform_6(%arg0: i32, %arg1: i32) -> (i32, i32) {
    %c0_i32 = arith.constant 0 : i32
    %c0_i32_0 = arith.constant 0 : i32
    %c0_i32_1 = arith.constant 0 : i32
    return %c0_i32, %c0_i32_0 : i32, i32
  }
  func.func @transform_7(%arg0: i32, %arg1: i32) -> (i32, i32) {
    %c0_i32 = arith.constant 0 : i32
    %c0_i32_0 = arith.constant 0 : i32
    return %arg0, %c0_i32 : i32, i32
  }
}

module attributes {stable_mosaic.version = 11 : i64} {
  func.func @_linear_kernel(%arg0: i32, %arg1: i32, %arg2: memref<16x128xf32, #tpu.memory_space<vmem>>, %arg3: memref<1x128xf32, #tpu.memory_space<vmem>>, %arg4: memref<1x128xf32, #tpu.memory_space<vmem>>, %arg5: memref<128x384xbf16, #tpu.memory_space<vmem>>, %arg6: memref<1x384xf32, #tpu.memory_space<vmem>>, %arg7: memref<16x384xf32, #tpu.memory_space<vmem>>) attributes {dimension_semantics = [#tpu.dimension_semantics<parallel>, #tpu.dimension_semantics<parallel>], iteration_bounds = array<i64: 1, 1>, scalar_prefetch = 0 : i64, scratch_operands = 0 : i64, tpu.core_type = #tpu.core_type<tc>, window_params = [{transform_indices = @transform_0, window_bounds = array<i64: 16, 128>}, {pipeline_mode = #tpu.pipeline_mode<synchronous>, transform_indices = @transform_1, window_bounds = array<i64: 1, 128>}, {pipeline_mode = #tpu.pipeline_mode<synchronous>, transform_indices = @transform_2, window_bounds = array<i64: 1, 128>}, {transform_indices = @transform_3, window_bounds = array<i64: 128, 384>}, {transform_indices = @transform_4, window_bounds = array<i64: 1, 384>}, {transform_indices = @transform_5, window_bounds = array<i64: 16, 384>}]} {
    %c0 = arith.constant 0 : index
    %c0_0 = arith.constant 0 : index
    %0 = vector.load %arg2[%c0, %c0_0] : memref<16x128xf32, #tpu.memory_space<vmem>>, vector<16x128xf32>
    %cst = arith.constant dense<0.000000e+00> : vector<16xf32>
    %1 = vector.multi_reduction <add>, %0, %cst [1] : vector<16x128xf32> to vector<16xf32>
    %2 = vector.shape_cast %1 : vector<16xf32> to vector<16x1xf32>
    %cst_1 = arith.constant 1.280000e+02 : f32
    %3 = vector.broadcast %cst_1 : f32 to vector<16x1xf32>
    %4 = arith.divf %2, %3 : vector<16x1xf32>
    %5 = vector.broadcast %4 : vector<16x1xf32> to vector<16x128xf32>
    %6 = arith.subf %0, %5 : vector<16x128xf32>
    %7 = arith.mulf %6, %6 : vector<16x128xf32>
    %cst_2 = arith.constant dense<0.000000e+00> : vector<16xf32>
    %8 = vector.multi_reduction <add>, %7, %cst_2 [1] : vector<16x128xf32> to vector<16xf32>
    %9 = vector.shape_cast %8 : vector<16xf32> to vector<16x1xf32>
    %cst_3 = arith.constant 1.280000e+02 : f32
    %10 = vector.broadcast %cst_3 : f32 to vector<16x1xf32>
    %11 = arith.divf %9, %10 : vector<16x1xf32>
    %cst_4 = arith.constant 9.99999997E-7 : f32
    %12 = vector.broadcast %cst_4 : f32 to vector<16x1xf32>
    %13 = arith.addf %11, %12 : vector<16x1xf32>
    %14 = math.rsqrt %13 : vector<16x1xf32>
    %15 = vector.broadcast %14 : vector<16x1xf32> to vector<16x128xf32>
    %16 = arith.mulf %6, %15 : vector<16x128xf32>
    %c0_5 = arith.constant 0 : index
    %c0_6 = arith.constant 0 : index
    %17 = vector.load %arg3[%c0_5, %c0_6] : memref<1x128xf32, #tpu.memory_space<vmem>>, vector<1x128xf32>
    %18 = vector.broadcast %17 : vector<1x128xf32> to vector<16x128xf32>
    %19 = arith.mulf %16, %18 : vector<16x128xf32>
    %c0_7 = arith.constant 0 : index
    %c0_8 = arith.constant 0 : index
    %20 = vector.load %arg4[%c0_7, %c0_8] : memref<1x128xf32, #tpu.memory_space<vmem>>, vector<1x128xf32>
    %21 = vector.broadcast %20 : vector<1x128xf32> to vector<16x128xf32>
    %22 = arith.addf %19, %21 : vector<16x128xf32>
    %23 = arith.truncf %22 : vector<16x128xf32> to vector<16x128xbf16>
    %c0_9 = arith.constant 0 : index
    %c0_10 = arith.constant 0 : index
    %24 = vector.load %arg5[%c0_9, %c0_10] : memref<128x384xbf16, #tpu.memory_space<vmem>>, vector<128x384xbf16>
    %cst_11 = arith.constant dense<0.000000e+00> : vector<16x384xf32>
    %25 = tpu.matmul %23, %24, %cst_11 {dimension_numbers = #tpu.dot_dimension_numbers<[1], [0], [0], [1], [0, 0, 1, 1], [], []>} : vector<16x128xbf16>, vector<128x384xbf16>, vector<16x384xf32> -> vector<16x384xf32>
    %c0_12 = arith.constant 0 : index
    %c0_13 = arith.constant 0 : index
    %26 = vector.load %arg6[%c0_12, %c0_13] : memref<1x384xf32, #tpu.memory_space<vmem>>, vector<1x384xf32>
    %27 = vector.broadcast %26 : vector<1x384xf32> to vector<16x384xf32>
    %28 = arith.addf %25, %27 : vector<16x384xf32>
    %c0_14 = arith.constant 0 : index
    %c0_15 = arith.constant 0 : index
    %29 = vector.load %arg7[%c0_14, %c0_15] : memref<16x384xf32, #tpu.memory_space<vmem>>, vector<16x384xf32>
    tpu.vector_store %arg7[%c0_14, %c0_15], %28 {strides = array<i32>} : memref<16x384xf32, #tpu.memory_space<vmem>>, vector<16x384xf32>,
    return
  }
  func.func @transform_0(%arg0: i32, %arg1: i32) -> (i32, i32) {
    %c0_i32 = arith.constant 0 : i32
    %c0_i32_0 = arith.constant 0 : i32
    return %arg0, %c0_i32 : i32, i32
  }
  func.func @transform_1(%arg0: i32, %arg1: i32) -> (i32, i32) {
    %c0_i32 = arith.constant 0 : i32
    %c0_i32_0 = arith.constant 0 : i32
    %c0_i32_1 = arith.constant 0 : i32
    return %c0_i32, %c0_i32_0 : i32, i32
  }
  func.func @transform_2(%arg0: i32, %arg1: i32) -> (i32, i32) {
    %c0_i32 = arith.constant 0 : i32
    %c0_i32_0 = arith.constant 0 : i32
    %c0_i32_1 = arith.constant 0 : i32
    return %c0_i32, %c0_i32_0 : i32, i32
  }
  func.func @transform_3(%arg0: i32, %arg1: i32) -> (i32, i32) {
    %c0_i32 = arith.constant 0 : i32
    %c0_i32_0 = arith.constant 0 : i32
    return %c0_i32, %arg1 : i32, i32
  }
  func.func @transform_4(%arg0: i32, %arg1: i32) -> (i32, i32) {
    %c0_i32 = arith.constant 0 : i32
    %c0_i32_0 = arith.constant 0 : i32
    return %c0_i32, %arg1 : i32, i32
  }
  func.func @transform_5(%arg0: i32, %arg1: i32) -> (i32, i32) {
    %c0_i32 = arith.constant 0 : i32
    return %arg0, %arg1 : i32, i32
  }
}

module attributes {stable_mosaic.version = 11 : i64} {
  func.func @_linear_residual_kernel(%arg0: i32, %arg1: i32, %arg2: memref<16x128xf32, #tpu.memory_space<vmem>>, %arg3: memref<1x128xf32, #tpu.memory_space<vmem>>, %arg4: memref<1x128xf32, #tpu.memory_space<vmem>>, %arg5: memref<128x128xbf16, #tpu.memory_space<vmem>>, %arg6: memref<1x128xf32, #tpu.memory_space<vmem>>, %arg7: memref<16x128xf32, #tpu.memory_space<vmem>>, %arg8: memref<16x128xf32, #tpu.memory_space<vmem>>) attributes {dimension_semantics = [#tpu.dimension_semantics<parallel>, #tpu.dimension_semantics<parallel>], iteration_bounds = array<i64: 1, 1>, scalar_prefetch = 0 : i64, scratch_operands = 0 : i64, tpu.core_type = #tpu.core_type<tc>, window_params = [{transform_indices = @transform_0, window_bounds = array<i64: 16, 128>}, {pipeline_mode = #tpu.pipeline_mode<synchronous>, transform_indices = @transform_1, window_bounds = array<i64: 1, 128>}, {pipeline_mode = #tpu.pipeline_mode<synchronous>, transform_indices = @transform_2, window_bounds = array<i64: 1, 128>}, {transform_indices = @transform_3, window_bounds = array<i64: 128, 128>}, {transform_indices = @transform_4, window_bounds = array<i64: 1, 128>}, {transform_indices = @transform_5, window_bounds = array<i64: 16, 128>}, {transform_indices = @transform_6, window_bounds = array<i64: 16, 128>}]} {
    %c0 = arith.constant 0 : index
    %c0_0 = arith.constant 0 : index
    %0 = vector.load %arg2[%c0, %c0_0] : memref<16x128xf32, #tpu.memory_space<vmem>>, vector<16x128xf32>
    %1 = arith.truncf %0 : vector<16x128xf32> to vector<16x128xbf16>
    %c0_1 = arith.constant 0 : index
    %c0_2 = arith.constant 0 : index
    %2 = vector.load %arg5[%c0_1, %c0_2] : memref<128x128xbf16, #tpu.memory_space<vmem>>, vector<128x128xbf16>
    %cst = arith.constant dense<0.000000e+00> : vector<16x128xf32>
    %3 = tpu.matmul %1, %2, %cst {dimension_numbers = #tpu.dot_dimension_numbers<[1], [0], [0], [1], [0, 0, 1, 1], [], []>} : vector<16x128xbf16>, vector<128x128xbf16>, vector<16x128xf32> -> vector<16x128xf32>
    %c0_3 = arith.constant 0 : index
    %c0_4 = arith.constant 0 : index
    %4 = vector.load %arg6[%c0_3, %c0_4] : memref<1x128xf32, #tpu.memory_space<vmem>>, vector<1x128xf32>
    %5 = vector.broadcast %4 : vector<1x128xf32> to vector<16x128xf32>
    %6 = arith.addf %3, %5 : vector<16x128xf32>
    %c0_5 = arith.constant 0 : index
    %c0_6 = arith.constant 0 : index
    %7 = vector.load %arg7[%c0_5, %c0_6] : memref<16x128xf32, #tpu.memory_space<vmem>>, vector<16x128xf32>
    %8 = arith.addf %6, %7 : vector<16x128xf32>
    %c0_7 = arith.constant 0 : index
    %c0_8 = arith.constant 0 : index
    %9 = vector.load %arg8[%c0_7, %c0_8] : memref<16x128xf32, #tpu.memory_space<vmem>>, vector<16x128xf32>
    tpu.vector_store %arg8[%c0_7, %c0_8], %8 {strides = array<i32>} : memref<16x128xf32, #tpu.memory_space<vmem>>, vector<16x128xf32>,
    return
  }
  func.func @transform_0(%arg0: i32, %arg1: i32) -> (i32, i32) {
    %c0_i32 = arith.constant 0 : i32
    %c0_i32_0 = arith.constant 0 : i32
    return %arg0, %c0_i32 : i32, i32
  }
  func.func @transform_1(%arg0: i32, %arg1: i32) -> (i32, i32) {
    %c0_i32 = arith.constant 0 : i32
    %c0_i32_0 = arith.constant 0 : i32
    %c0_i32_1 = arith.constant 0 : i32
    return %c0_i32, %c0_i32_0 : i32, i32
  }
  func.func @transform_2(%arg0: i32, %arg1: i32) -> (i32, i32) {
    %c0_i32 = arith.constant 0 : i32
    %c0_i32_0 = arith.constant 0 : i32
    %c0_i32_1 = arith.constant 0 : i32
    return %c0_i32, %c0_i32_0 : i32, i32
  }
  func.func @transform_3(%arg0: i32, %arg1: i32) -> (i32, i32) {
    %c0_i32 = arith.constant 0 : i32
    %c0_i32_0 = arith.constant 0 : i32
    return %c0_i32, %arg1 : i32, i32
  }
  func.func @transform_4(%arg0: i32, %arg1: i32) -> (i32, i32) {
    %c0_i32 = arith.constant 0 : i32
    %c0_i32_0 = arith.constant 0 : i32
    return %c0_i32, %arg1 : i32, i32
  }
  func.func @transform_5(%arg0: i32, %arg1: i32) -> (i32, i32) {
    %c0_i32 = arith.constant 0 : i32
    return %arg0, %arg1 : i32, i32
  }
  func.func @transform_6(%arg0: i32, %arg1: i32) -> (i32, i32) {
    %c0_i32 = arith.constant 0 : i32
    return %arg0, %arg1 : i32, i32
  }
}

module attributes {stable_mosaic.version = 11 : i64} {
  func.func @_ffn_kernel(%arg0: i32, %arg1: i32, %arg2: memref<16x128xf32, #tpu.memory_space<vmem>>, %arg3: memref<1x128xf32, #tpu.memory_space<vmem>>, %arg4: memref<1x128xf32, #tpu.memory_space<vmem>>, %arg5: memref<128x512xbf16, #tpu.memory_space<vmem>>, %arg6: memref<1x512xf32, #tpu.memory_space<vmem>>, %arg7: memref<512x128xbf16, #tpu.memory_space<vmem>>, %arg8: memref<1x128xf32, #tpu.memory_space<vmem>>, %arg9: memref<16x128xf32, #tpu.memory_space<vmem>>, %arg10: memref<16x128xbf16, #tpu.memory_space<vmem>>, %arg11: memref<16x128xf32, #tpu.memory_space<vmem>>) attributes {dimension_semantics = [#tpu.dimension_semantics<parallel>, #tpu.dimension_semantics<arbitrary>], iteration_bounds = array<i64: 1, 2>, scalar_prefetch = 0 : i64, scratch_operands = 2 : i64, tpu.core_type = #tpu.core_type<tc>, window_params = [{transform_indices = @transform_0, window_bounds = array<i64: 16, 128>}, {pipeline_mode = #tpu.pipeline_mode<synchronous>, transform_indices = @transform_1, window_bounds = array<i64: 1, 128>}, {pipeline_mode = #tpu.pipeline_mode<synchronous>, transform_indices = @transform_2, window_bounds = array<i64: 1, 128>}, {transform_indices = @transform_3, window_bounds = array<i64: 128, 512>}, {transform_indices = @transform_4, window_bounds = array<i64: 1, 512>}, {transform_indices = @transform_5, window_bounds = array<i64: 512, 128>}, {pipeline_mode = #tpu.pipeline_mode<synchronous>, transform_indices = @transform_6, window_bounds = array<i64: 1, 128>}, {transform_indices = @transform_7, window_bounds = array<i64: 16, 128>}]} {
    %c0_i32 = arith.constant 0 : i32
    %0 = arith.cmpi eq, %arg1, %c0_i32 : i32
    %1 = arith.extui %0 : i1 to i32
    %c0_i32_0 = arith.constant 0 : i32
    %2 = arith.cmpi ne, %1, %c0_i32_0 : i32
    scf.if %2 {
      %c0_18 = arith.constant 0 : index
      %c0_19 = arith.constant 0 : index
      %31 = vector.load %arg2[%c0_18, %c0_19] : memref<16x128xf32, #tpu.memory_space<vmem>>, vector<16x128xf32>
      %cst_20 = arith.constant dense<0.000000e+00> : vector<16xf32>
      %32 = vector.multi_reduction <add>, %31, %cst_20 [1] : vector<16x128xf32> to vector<16xf32>
      %33 = vector.shape_cast %32 : vector<16xf32> to vector<16x1xf32>
      %cst_21 = arith.constant 1.280000e+02 : f32
      %34 = vector.broadcast %cst_21 : f32 to vector<16x1xf32>
      %35 = arith.divf %33, %34 : vector<16x1xf32>
      %36 = vector.broadcast %35 : vector<16x1xf32> to vector<16x128xf32>
      %37 = arith.subf %31, %36 : vector<16x128xf32>
      %38 = arith.mulf %37, %37 : vector<16x128xf32>
      %cst_22 = arith.constant dense<0.000000e+00> : vector<16xf32>
      %39 = vector.multi_reduction <add>, %38, %cst_22 [1] : vector<16x128xf32> to vector<16xf32>
      %40 = vector.shape_cast %39 : vector<16xf32> to vector<16x1xf32>
      %cst_23 = arith.constant 1.280000e+02 : f32
      %41 = vector.broadcast %cst_23 : f32 to vector<16x1xf32>
      %42 = arith.divf %40, %41 : vector<16x1xf32>
      %cst_24 = arith.constant 9.99999997E-7 : f32
      %43 = vector.broadcast %cst_24 : f32 to vector<16x1xf32>
      %44 = arith.addf %42, %43 : vector<16x1xf32>
      %45 = math.rsqrt %44 : vector<16x1xf32>
      %46 = vector.broadcast %45 : vector<16x1xf32> to vector<16x128xf32>
      %47 = arith.mulf %37, %46 : vector<16x128xf32>
      %c0_25 = arith.constant 0 : index
      %c0_26 = arith.constant 0 : index
      %48 = vector.load %arg3[%c0_25, %c0_26] : memref<1x128xf32, #tpu.memory_space<vmem>>, vector<1x128xf32>
      %49 = vector.broadcast %48 : vector<1x128xf32> to vector<16x128xf32>
      %50 = arith.mulf %47, %49 : vector<16x128xf32>
      %c0_27 = arith.constant 0 : index
      %c0_28 = arith.constant 0 : index
      %51 = vector.load %arg4[%c0_27, %c0_28] : memref<1x128xf32, #tpu.memory_space<vmem>>, vector<1x128xf32>
      %52 = vector.broadcast %51 : vector<1x128xf32> to vector<16x128xf32>
      %53 = arith.addf %50, %52 : vector<16x128xf32>
      %54 = arith.truncf %53 : vector<16x128xf32> to vector<16x128xbf16>
      %c0_29 = arith.constant 0 : index
      %c0_30 = arith.constant 0 : index
      %55 = vector.load %arg10[%c0_29, %c0_30] : memref<16x128xbf16, #tpu.memory_space<vmem>>, vector<16x128xbf16>
      tpu.vector_store %arg10[%c0_29, %c0_30], %54 {strides = array<i32>} : memref<16x128xbf16, #tpu.memory_space<vmem>>, vector<16x128xbf16>,
      %cst_31 = arith.constant 0.000000e+00 : f32
      %56 = vector.broadcast %cst_31 : f32 to vector<16x128xf32>
      %c0_32 = arith.constant 0 : index
      %c0_33 = arith.constant 0 : index
      %57 = vector.load %arg11[%c0_32, %c0_33] : memref<16x128xf32, #tpu.memory_space<vmem>>, vector<16x128xf32>
      tpu.vector_store %arg11[%c0_32, %c0_33], %56 {strides = array<i32>} : memref<16x128xf32, #tpu.memory_space<vmem>>, vector<16x128xf32>,
    } else {
    }
    %c0 = arith.constant 0 : index
    %c0_1 = arith.constant 0 : index
    %3 = vector.load %arg10[%c0, %c0_1] : memref<16x128xbf16, #tpu.memory_space<vmem>>, vector<16x128xbf16>
    %c0_2 = arith.constant 0 : index
    %c0_3 = arith.constant 0 : index
    %4 = vector.load %arg5[%c0_2, %c0_3] : memref<128x512xbf16, #tpu.memory_space<vmem>>, vector<128x512xbf16>
    %cst = arith.constant dense<0.000000e+00> : vector<16x512xf32>
    %5 = tpu.matmul %3, %4, %cst {dimension_numbers = #tpu.dot_dimension_numbers<[1], [0], [0], [1], [0, 0, 1, 1], [], []>} : vector<16x128xbf16>, vector<128x512xbf16>, vector<16x512xf32> -> vector<16x512xf32>
    %c0_4 = arith.constant 0 : index
    %c0_5 = arith.constant 0 : index
    %6 = vector.load %arg6[%c0_4, %c0_5] : memref<1x512xf32, #tpu.memory_space<vmem>>, vector<1x512xf32>
    %7 = vector.broadcast %6 : vector<1x512xf32> to vector<16x512xf32>
    %8 = arith.addf %5, %7 : vector<16x512xf32>
    %cst_6 = arith.constant 5.000000e-01 : f32
    %9 = vector.broadcast %cst_6 : f32 to vector<16x512xf32>
    %10 = arith.mulf %9, %8 : vector<16x512xf32>
    %cst_7 = arith.constant 4.471500e-02 : f32
    %11 = vector.broadcast %cst_7 : f32 to vector<16x512xf32>
    %12 = arith.mulf %11, %8 : vector<16x512xf32>
    %13 = arith.mulf %12, %8 : vector<16x512xf32>
    %14 = arith.mulf %13, %8 : vector<16x512xf32>
    %15 = arith.addf %8, %14 : vector<16x512xf32>
    %cst_8 = arith.constant 0.797884583 : f32
    %16 = vector.broadcast %cst_8 : f32 to vector<16x512xf32>
    %17 = arith.mulf %16, %15 : vector<16x512xf32>
    %18 = math.tanh %17 : vector<16x512xf32>
    %cst_9 = arith.constant 1.000000e+00 : f32
    %19 = vector.broadcast %cst_9 : f32 to vector<16x512xf32>
    %20 = arith.addf %19, %18 : vector<16x512xf32>
    %21 = arith.mulf %10, %20 : vector<16x512xf32>
    %c0_10 = arith.constant 0 : index
    %c0_11 = arith.constant 0 : index
    %22 = vector.load %arg11[%c0_10, %c0_11] : memref<16x128xf32, #tpu.memory_space<vmem>>, vector<16x128xf32>
    %23 = arith.truncf %21 : vector<16x512xf32> to vector<16x512xbf16>
    %c0_12 = arith.constant 0 : index
    %c0_13 = arith.constant 0 : index
    %24 = vector.load %arg7[%c0_12, %c0_13] : memref<512x128xbf16, #tpu.memory_space<vmem>>, vector<512x128xbf16>
    %cst_14 = arith.constant dense<0.000000e+00> : vector<16x128xf32>
    %25 = tpu.matmul %23, %24, %cst_14 {dimension_numbers = #tpu.dot_dimension_numbers<[1], [0], [0], [1], [0, 0, 1, 1], [], []>} : vector<16x512xbf16>, vector<512x128xbf16>, vector<16x128xf32> -> vector<16x128xf32>
    %26 = arith.addf %22, %25 : vector<16x128xf32>
    %c0_15 = arith.constant 0 : index
    %c0_16 = arith.constant 0 : index
    %27 = vector.load %arg11[%c0_15, %c0_16] : memref<16x128xf32, #tpu.memory_space<vmem>>, vector<16x128xf32>
    tpu.vector_store %arg11[%c0_15, %c0_16], %26 {strides = array<i32>} : memref<16x128xf32, #tpu.memory_space<vmem>>, vector<16x128xf32>,
    %c1_i32 = arith.constant 1 : i32
    %28 = arith.cmpi eq, %arg1, %c1_i32 : i32
    %29 = arith.extui %28 : i1 to i32
    %c0_i32_17 = arith.constant 0 : i32
    %30 = arith.cmpi ne, %29, %c0_i32_17 : i32
    scf.if %30 {
      %c0_18 = arith.constant 0 : index
      %c0_19 = arith.constant 0 : index
      %31 = vector.load %arg11[%c0_18, %c0_19] : memref<16x128xf32, #tpu.memory_space<vmem>>, vector<16x128xf32>
      %c0_20 = arith.constant 0 : index
      %c0_21 = arith.constant 0 : index
      %32 = vector.load %arg8[%c0_20, %c0_21] : memref<1x128xf32, #tpu.memory_space<vmem>>, vector<1x128xf32>
      %33 = vector.broadcast %32 : vector<1x128xf32> to vector<16x128xf32>
      %34 = arith.addf %31, %33 : vector<16x128xf32>
      %c0_22 = arith.constant 0 : index
      %c0_23 = arith.constant 0 : index
      %35 = vector.load %arg2[%c0_22, %c0_23] : memref<16x128xf32, #tpu.memory_space<vmem>>, vector<16x128xf32>
      %36 = arith.addf %34, %35 : vector<16x128xf32>
      %c0_24 = arith.constant 0 : index
      %c0_25 = arith.constant 0 : index
      %37 = vector.load %arg9[%c0_24, %c0_25] : memref<16x128xf32, #tpu.memory_space<vmem>>, vector<16x128xf32>
      tpu.vector_store %arg9[%c0_24, %c0_25], %36 {strides = array<i32>} : memref<16x128xf32, #tpu.memory_space<vmem>>, vector<16x128xf32>,
    } else {
    }
    return
  }
  func.func @transform_0(%arg0: i32, %arg1: i32) -> (i32, i32) {
    %c0_i32 = arith.constant 0 : i32
    %c0_i32_0 = arith.constant 0 : i32
    return %arg0, %c0_i32 : i32, i32
  }
  func.func @transform_1(%arg0: i32, %arg1: i32) -> (i32, i32) {
    %c0_i32 = arith.constant 0 : i32
    %c0_i32_0 = arith.constant 0 : i32
    %c0_i32_1 = arith.constant 0 : i32
    return %c0_i32, %c0_i32_0 : i32, i32
  }
  func.func @transform_2(%arg0: i32, %arg1: i32) -> (i32, i32) {
    %c0_i32 = arith.constant 0 : i32
    %c0_i32_0 = arith.constant 0 : i32
    %c0_i32_1 = arith.constant 0 : i32
    return %c0_i32, %c0_i32_0 : i32, i32
  }
  func.func @transform_3(%arg0: i32, %arg1: i32) -> (i32, i32) {
    %c0_i32 = arith.constant 0 : i32
    %c0_i32_0 = arith.constant 0 : i32
    return %c0_i32, %arg1 : i32, i32
  }
  func.func @transform_4(%arg0: i32, %arg1: i32) -> (i32, i32) {
    %c0_i32 = arith.constant 0 : i32
    %c0_i32_0 = arith.constant 0 : i32
    return %c0_i32, %arg1 : i32, i32
  }
  func.func @transform_5(%arg0: i32, %arg1: i32) -> (i32, i32) {
    %c0_i32 = arith.constant 0 : i32
    %c0_i32_0 = arith.constant 0 : i32
    return %arg1, %c0_i32 : i32, i32
  }
  func.func @transform_6(%arg0: i32, %arg1: i32) -> (i32, i32) {
    %c0_i32 = arith.constant 0 : i32
    %c0_i32_0 = arith.constant 0 : i32
    %c0_i32_1 = arith.constant 0 : i32
    return %c0_i32, %c0_i32_0 : i32, i32
  }
  func.func @transform_7(%arg0: i32, %arg1: i32) -> (i32, i32) {
    %c0_i32 = arith.constant 0 : i32
    %c0_i32_0 = arith.constant 0 : i32
    return %arg0, %c0_i32 : i32, i32
  }
}

module attributes {stable_mosaic.version = 11 : i64} {
  func.func @_score_kernel(%arg0: i32, %arg1: memref<16x128xf32, #tpu.memory_space<vmem>>, %arg2: memref<1x128xf32, #tpu.memory_space<vmem>>, %arg3: memref<1x128xf32, #tpu.memory_space<vmem>>, %arg4: memref<1x128xf32, #tpu.memory_space<vmem>>, %arg5: memref<1x1xf32, #tpu.memory_space<vmem>>, %arg6: memref<16x1xf32, #tpu.memory_space<vmem>>, %arg7: memref<16x1xf32, #tpu.memory_space<vmem>>) attributes {dimension_semantics = [#tpu.dimension_semantics<parallel>], iteration_bounds = array<i64: 1>, scalar_prefetch = 0 : i64, scratch_operands = 0 : i64, tpu.core_type = #tpu.core_type<tc>, window_params = [{transform_indices = @transform_0, window_bounds = array<i64: 16, 128>}, {pipeline_mode = #tpu.pipeline_mode<synchronous>, transform_indices = @transform_1, window_bounds = array<i64: 1, 128>}, {pipeline_mode = #tpu.pipeline_mode<synchronous>, transform_indices = @transform_2, window_bounds = array<i64: 1, 128>}, {pipeline_mode = #tpu.pipeline_mode<synchronous>, transform_indices = @transform_3, window_bounds = array<i64: 1, 128>}, {pipeline_mode = #tpu.pipeline_mode<synchronous>, transform_indices = @transform_4, window_bounds = array<i64: 1, 1>}, {transform_indices = @transform_5, window_bounds = array<i64: 16, 1>}, {transform_indices = @transform_6, window_bounds = array<i64: 16, 1>}]} {
    %c0 = arith.constant 0 : index
    %c0_0 = arith.constant 0 : index
    %0 = vector.load %arg1[%c0, %c0_0] : memref<16x128xf32, #tpu.memory_space<vmem>>, vector<16x128xf32>
    %cst = arith.constant dense<0.000000e+00> : vector<16xf32>
    %1 = vector.multi_reduction <add>, %0, %cst [1] : vector<16x128xf32> to vector<16xf32>
    %2 = vector.shape_cast %1 : vector<16xf32> to vector<16x1xf32>
    %cst_1 = arith.constant 1.280000e+02 : f32
    %3 = vector.broadcast %cst_1 : f32 to vector<16x1xf32>
    %4 = arith.divf %2, %3 : vector<16x1xf32>
    %5 = vector.broadcast %4 : vector<16x1xf32> to vector<16x128xf32>
    %6 = arith.subf %0, %5 : vector<16x128xf32>
    %7 = arith.mulf %6, %6 : vector<16x128xf32>
    %cst_2 = arith.constant dense<0.000000e+00> : vector<16xf32>
    %8 = vector.multi_reduction <add>, %7, %cst_2 [1] : vector<16x128xf32> to vector<16xf32>
    %9 = vector.shape_cast %8 : vector<16xf32> to vector<16x1xf32>
    %cst_3 = arith.constant 1.280000e+02 : f32
    %10 = vector.broadcast %cst_3 : f32 to vector<16x1xf32>
    %11 = arith.divf %9, %10 : vector<16x1xf32>
    %cst_4 = arith.constant 9.99999997E-7 : f32
    %12 = vector.broadcast %cst_4 : f32 to vector<16x1xf32>
    %13 = arith.addf %11, %12 : vector<16x1xf32>
    %14 = math.rsqrt %13 : vector<16x1xf32>
    %15 = vector.broadcast %14 : vector<16x1xf32> to vector<16x128xf32>
    %16 = arith.mulf %6, %15 : vector<16x128xf32>
    %c0_5 = arith.constant 0 : index
    %c0_6 = arith.constant 0 : index
    %17 = vector.load %arg2[%c0_5, %c0_6] : memref<1x128xf32, #tpu.memory_space<vmem>>, vector<1x128xf32>
    %18 = vector.broadcast %17 : vector<1x128xf32> to vector<16x128xf32>
    %19 = arith.mulf %16, %18 : vector<16x128xf32>
    %c0_7 = arith.constant 0 : index
    %c0_8 = arith.constant 0 : index
    %20 = vector.load %arg3[%c0_7, %c0_8] : memref<1x128xf32, #tpu.memory_space<vmem>>, vector<1x128xf32>
    %21 = vector.broadcast %20 : vector<1x128xf32> to vector<16x128xf32>
    %22 = arith.addf %19, %21 : vector<16x128xf32>
    %c0_9 = arith.constant 0 : index
    %c0_10 = arith.constant 0 : index
    %23 = vector.load %arg4[%c0_9, %c0_10] : memref<1x128xf32, #tpu.memory_space<vmem>>, vector<1x128xf32>
    %24 = vector.broadcast %23 : vector<1x128xf32> to vector<16x128xf32>
    %25 = arith.mulf %22, %24 : vector<16x128xf32>
    %cst_11 = arith.constant dense<0.000000e+00> : vector<16xf32>
    %26 = vector.multi_reduction <add>, %25, %cst_11 [1] : vector<16x128xf32> to vector<16xf32>
    %27 = vector.shape_cast %26 : vector<16xf32> to vector<16x1xf32>
    %c0_12 = arith.constant 0 : index
    %c0_13 = arith.constant 0 : index
    %28 = vector.load %arg5[%c0_12, %c0_13] : memref<1x1xf32, #tpu.memory_space<vmem>>, vector<1x1xf32>
    %29 = vector.broadcast %28 : vector<1x1xf32> to vector<16x1xf32>
    %30 = arith.addf %27, %29 : vector<16x1xf32>
    %cst_14 = arith.constant 0.000000e+00 : f32
    %31 = vector.broadcast %cst_14 : f32 to vector<16x1xf32>
    %32 = arith.subf %31, %30 : vector<16x1xf32>
    %33 = math.exp %32 : vector<16x1xf32>
    %cst_15 = arith.constant 1.000000e+00 : f32
    %34 = vector.broadcast %cst_15 : f32 to vector<16x1xf32>
    %35 = arith.addf %34, %33 : vector<16x1xf32>
    %cst_16 = arith.constant 1.000000e+00 : f32
    %36 = vector.broadcast %cst_16 : f32 to vector<16x1xf32>
    %37 = arith.divf %36, %35 : vector<16x1xf32>
    %c0_17 = arith.constant 0 : index
    %c0_18 = arith.constant 0 : index
    %38 = vector.load %arg6[%c0_17, %c0_18] : memref<16x1xf32, #tpu.memory_space<vmem>>, vector<16x1xf32>
    %39 = arith.mulf %37, %38 : vector<16x1xf32>
    %c0_19 = arith.constant 0 : index
    %c0_20 = arith.constant 0 : index
    %40 = vector.load %arg7[%c0_19, %c0_20] : memref<16x1xf32, #tpu.memory_space<vmem>>, vector<16x1xf32>
    tpu.vector_store %arg7[%c0_19, %c0_20], %39 {strides = array<i32>} : memref<16x1xf32, #tpu.memory_space<vmem>>, vector<16x1xf32>,
    return
  }
  func.func @transform_0(%arg0: i32) -> (i32, i32) {
    %c0_i32 = arith.constant 0 : i32
    %c0_i32_0 = arith.constant 0 : i32
    return %arg0, %c0_i32 : i32, i32
  }
  func.func @transform_1(%arg0: i32) -> (i32, i32) {
    %c0_i32 = arith.constant 0 : i32
    %c0_i32_0 = arith.constant 0 : i32
    %c0_i32_1 = arith.constant 0 : i32
    return %c0_i32, %c0_i32_0 : i32, i32
  }
  func.func @transform_2(%arg0: i32) -> (i32, i32) {
    %c0_i32 = arith.constant 0 : i32
    %c0_i32_0 = arith.constant 0 : i32
    %c0_i32_1 = arith.constant 0 : i32
    return %c0_i32, %c0_i32_0 : i32, i32
  }
  func.func @transform_3(%arg0: i32) -> (i32, i32) {
    %c0_i32 = arith.constant 0 : i32
    %c0_i32_0 = arith.constant 0 : i32
    %c0_i32_1 = arith.constant 0 : i32
    return %c0_i32, %c0_i32_0 : i32, i32
  }
  func.func @transform_4(%arg0: i32) -> (i32, i32) {
    %c0_i32 = arith.constant 0 : i32
    %c0_i32_0 = arith.constant 0 : i32
    %c0_i32_1 = arith.constant 0 : i32
    return %c0_i32, %c0_i32_0 : i32, i32
  }
  func.func @transform_5(%arg0: i32) -> (i32, i32) {
    %c0_i32 = arith.constant 0 : i32
    %c0_i32_0 = arith.constant 0 : i32
    return %arg0, %c0_i32 : i32, i32
  }
  func.func @transform_6(%arg0: i32) -> (i32, i32) {
    %c0_i32 = arith.constant 0 : i32
    %c0_i32_0 = arith.constant 0 : i32
    return %arg0, %c0_i32 : i32, i32
  }
}

</mosaic_0001>

<bundles_post_ra>
// kernel: ext_transformer_encoder_forward.10
= control target key start
LH: loop header
LB: loop body
LE: loop exit
PB: predicated region body
PF: predicated region fallthrough
CT: control target
= control target key end

     0   :  { %s440_s12 = smov 0   ;;  %s442_s13 = smov 0   ;;  %s472_s0 = inlined_call_operand.vmem [shape: f32[2,8,128], index: 0, kind: input, shape index: {}, may-alias: {0,3}]   ;;  %s473_s1 = inlined_call_operand.vmem [shape: f32[2,8,1], index: 1, kind: input, shape index: {}]   ;;  %s474_s2 = inlined_call_operand.vmem [shape: f32[8,128], index: 2, kind: input, shape index: {}]   ;;  %s475_s3 = inlined_call_operand.vmem [shape: f32[2,8,128], index: 3, kind: output, shape index: {}, may-alias: {0,3}]  }
   0x1   :  { %s444_s14 = smov 0  }
   0x2 LB: > { %s22_s15 = sadd.s32 1, %s413_s13  ;;  %p363_p0 = scmp.ge.s32.totalorder %s417_s14, 1  ;;  %s417_s14 = sphi %s444_s14, %s13_s14   ;;  %s413_s13 = sphi %s442_s13, %s477_s13   ;;  %s409_s12 = sphi %s440_s12, %s476_s12  }
   0x3   : > { %p23_p1 = scmp.ge.s32.totalorder %s22_s15, 2  ;;  %p178_p2 = scmp.lt.s32.totalorder %s417_s14, 3 }
   0x5   : > { %s479_s15 = smov (%p23_p1, %s22_s15), 0  ;;  %p179_p3 = pnand %p363_p0, %p178_p2 }
   0x6   : > { %p217_p4 = scmp.lt.s32.totalorder (!%p179_p3), %s409_s12, 1 }
   0x7   : > { %182 = sbr.rel (%p179_p3) target bundleno = 136 (0x88), region = 32 }
   0xc   : > { %v419_v0 = vmov 0   ;;  %s481_s12 = smov (!%p217_p4, %s409_s12), 1  ;;  %v250_v3 = vld [vmem:[%s474_s2] sm:$0xff] }
   0xd   : > { %394 = vset.pattern.permute.xlu0 %v419_v0  ;;  %s364_s16 = sshll.u32 %s481_s12, 3 }
   0xe   : > { %s230_s19 = scalar_lea.vmem %s473_s1, %s364_s16  ;;  %s223_s22 = scalar_lea.vmem %s472_s0, %s364_s16 }
   0xf   : > { %v243_v1 = vld [vmem:[%s230_s19] sm:$0xff]  ;;  %s241_s27 = scalar_lea.vmem %s475_s3, %s364_s16 }
  0x10   : > { %246 = vperm.xlu0 %394, %v243_v1   ;;  %v242_v2 = vld [vmem:[%s223_s22] sm:$0xff] }
  0x82   : > { %v247_v4 = vpop.permute.xlu0 %246 }
  0x83   : > { %v249_v5 = vmul.f32 %v247_v4, %v242_v2 }
  0x85   : > { %v251_v6 = vadd.f32 %v250_v3, %v249_v5 }
  0x87   : > { %252 = vst [vmem:[%s241_s27] sm:$0xff] %v251_v6 }
  0x88 PF: > { %s13_s14 = sadd.s32 1, %s417_s14   ;;  %s476_s12 = smov %s413_s13 }
  0x89   : > { %p10_p5 = scmp.ge.s32.totalorder %s13_s14, 4   ;;  %s477_s13 = smov %s479_s15 }
  0x8b   :  { %12 = sbr.rel (!%p10_p5) target bundleno = 2 (0x2), region = 68 }

// kernel: ext_transformer_encoder_forward.11
= control target key start
LH: loop header
LB: loop body
LE: loop exit
PB: predicated region body
PF: predicated region fallthrough
CT: control target
= control target key end

     0   :  { %10 = vsyncpa [#allocation3], 0  ;;  %s409_s21 = smov [#allocation2]   ;;  %s410_s22 = smov 192   ;;  %s472_s0 = inlined_call_operand.vmem [shape: f32[16,128], index: 0, kind: input, shape index: {}]   ;;  %s473_s1 = inlined_call_operand.vmem [shape: f32[1,128], index: 1, kind: input, shape index: {}]   ;;  %s474_s2 = inlined_call_operand.vmem [shape: f32[1,128], index: 2, kind: input, shape index: {}]   ;;  %s475_s3 = inlined_call_operand.hbm [shape: bf16[128,384], index: 3, kind: input, shape index: {}]   ;;  %s476_s4 = inlined_call_operand.vmem [shape: f32[1,384], index: 4, kind: input, shape index: {}]   ;;  %s477_s5 = inlined_call_operand.vmem [shape: f32[16,384], index: 5, kind: output, shape index: {}]  }
   0x1   :  { %s21_s20 = sshll.u32 %s475_s3, 4  ;;  %s23_s1 = sshll.u32 %s409_s21, 4  ;;  %s22_s20 = int_to_ptr.hbm [resolvable:$true] %s21_s20  ;;  %s24_s1 = int_to_ptr.vmem [resolvable:$true] %s23_s1 }
   0x2   :  { %s411_s2 = smov 12  }
   0x3   :  { %29 = dma.hbm_to_vmem [thread:$0]  %s22_s20, 3072, %s24_s1, [#allocation3], %s410_s22, %s410_s22, %s411_s2  }
   0x4   :  { %407 = dma.done.wait [#allocation3], 3072  }
   0x5   :  { %408 = vsyncadd [#allocation3], 4294964224  ;;  %v346_v0 = vld [vmem:[#allocation2 + $0xa8] sm:$0xf]  ;;  %v378_v1 = vld [vmem:[#allocation2 + $0xb0] sm:$0xf0] }
   0x6   :  { %v377_v2 = vld [vmem:[#allocation2 + $0xac] sm:$0xf]  ;;  %v347_v3 = vor.u32 %v378_v1, %v346_v0  ;;  %v348_v4 = vld [vmem:[#allocation2 + $0xb4] sm:$0xf0]  ;;  %v354_v5 = vld [vmem:[#allocation2 + $0xb0] sm:$0xf] }
   0x7   :  { %v379_v6 = vld [vmem:[#allocation2 + $0xb8] sm:$0xf0]  ;;  %v351_v7 = vor.u32 %v377_v2, %v348_v4  ;;  %v334_v9 = vld [vmem:[#allocation2 + $0x90] sm:$0xf]  ;;  %v374_v11 = vld [vmem:[#allocation2 + $0x94] sm:$0xf] }
   0x8   :  { %v355_v8 = vor.u32 %v379_v6, %v354_v5  ;;  %v375_v10 = vld [vmem:[#allocation2 + $0x98] sm:$0xf0]  ;;  %207 = vmatpush.bf16.msra.mxu0 %v347_v3  ;;  %v336_v13 = vld [vmem:[#allocation2 + $0x9c] sm:$0xf0]  ;;  %v342_v14 = vld [vmem:[#allocation2 + $0x98] sm:$0xf] }
   0x9   :  { %v335_v12 = vor.u32 %v375_v10, %v334_v9  ;;  %v376_v15 = vld [vmem:[#allocation2 + $0xa0] sm:$0xf0]  ;;  %221 = vmatpush.bf16.msra.mxu1 %v351_v7  ;;  %v339_v16 = vor.u32 %v374_v11, %v336_v13  ;;  %v322_v18 = vld [vmem:[#allocation2 + $0x78] sm:$0xf]  ;;  %v371_v20 = vld [vmem:[#allocation2 + $0x7c] sm:$0xf] }
   0xa   :  { %235 = vmatpush.bf16.msra.mxu2 %v355_v8  ;;  %v343_v17 = vor.u32 %v376_v15, %v342_v14  ;;  %v372_v19 = vld [vmem:[#allocation2 + $0x80] sm:$0xf0]  ;;  %v324_v21 = vld [vmem:[#allocation2 + $0x84] sm:$0xf0]  ;;  %v330_v22 = vld [vmem:[#allocation2 + $0x80] sm:$0xf] }
   0xb   :  { %v373_v23 = vld [vmem:[#allocation2 + $0x88] sm:$0xf0]  ;;  %v323_v24 = vor.u32 %v372_v19, %v322_v18  ;;  %v327_v25 = vor.u32 %v371_v20, %v324_v21  ;;  %v310_v27 = vld [vmem:[#allocation2 + $0x60] sm:$0xf]  ;;  %v368_v29 = vld [vmem:[#allocation2 + $0x64] sm:$0xf] }
   0xc   :  { %208 = vmatpush.bf16.msra.mxu0 %v335_v12  ;;  %v331_v26 = vor.u32 %v373_v23, %v330_v22  ;;  %v369_v28 = vld [vmem:[#allocation2 + $0x68] sm:$0xf0]  ;;  %v312_v30 = vld [vmem:[#allocation2 + $0x6c] sm:$0xf0]  ;;  %v318_v31 = vld [vmem:[#allocation2 + $0x68] sm:$0xf] }
   0xd   :  { %222 = vmatpush.bf16.msra.mxu1 %v339_v16  ;;  %v370_v32 = vld [vmem:[#allocation2 + $0x70] sm:$0xf0]  ;;  %v311_v33 = vor.u32 %v369_v28, %v310_v27  ;;  %v315_v34 = vor.u32 %v368_v29, %v312_v30  ;;  %v298_v36 = vld [vmem:[#allocation2 + $0x48] sm:$0xf]  ;;  %v365_v38 = vld [vmem:[#allocation2 + $0x4c] sm:$0xf] }
   0xe   :  { %236 = vmatpush.bf16.msra.mxu2 %v343_v17  ;;  %v319_v35 = vor.u32 %v370_v32, %v318_v31  ;;  %v366_v37 = vld [vmem:[#allocation2 + $0x50] sm:$0xf0]  ;;  %v300_v39 = vld [vmem:[#allocation2 + $0x54] sm:$0xf0]  ;;  %v306_v40 = vld [vmem:[#allocation2 + $0x50] sm:$0xf] }
   0xf   :  { %v367_v41 = vld [vmem:[#allocation2 + $0x58] sm:$0xf0]  ;;  %v299_v42 = vor.u32 %v366_v37, %v298_v36  ;;  %v303_v43 = vor.u32 %v365_v38, %v300_v39  ;;  %v286_v45 = vld [vmem:[#allocation2 + $0x30] sm:$0xf]  ;;  %v362_v47 = vld [vmem:[#allocation2 + $0x34] sm:$0xf] }
  0x10   :  { %209 = vmatpush.bf16.msra.mxu0 %v323_v24  ;;  %v307_v44 = vor.u32 %v367_v41, %v306_v40  ;;  %v363_v46 = vld [vmem:[#allocation2 + $0x38] sm:$0xf0]  ;;  %v288_v48 = vld [vmem:[#allocation2 + $0x3c] sm:$0xf0]  ;;  %v294_v49 = vld [vmem:[#allocation2 + $0x38] sm:$0xf] }
  0x11   :  { %223 = vmatpush.bf16.msra.mxu1 %v327_v25  ;;  %v364_v50 = vld [vmem:[#allocation2 + $0x40] sm:$0xf0]  ;;  %v287_v51 = vor.u32 %v363_v46, %v286_v45  ;;  %v291_v52 = vor.u32 %v362_v47, %v288_v48  ;;  %v274_v54 = vld [vmem:[#allocation2 + $0x18] sm:$0xf]  ;;  %v359_v56 = vld [vmem:[#allocation2 + $0x1c] sm:$0xf] }
  0x12   :  { %237 = vmatpush.bf16.msra.mxu2 %v331_v26  ;;  %v295_v53 = vor.u32 %v364_v50, %v294_v49  ;;  %v360_v55 = vld [vmem:[#allocation2 + $0x20] sm:$0xf0]  ;;  %v276_v57 = vld [vmem:[#allocation2 + $0x24] sm:$0xf0]  ;;  %v282_v58 = vld [vmem:[#allocation2 + $0x20] sm:$0xf] }
  0x13   :  { %v361_v59 = vld [vmem:[#allocation2 + $0x28] sm:$0xf0]  ;;  %v275_v60 = vor.u32 %v360_v55, %v274_v54  ;;  %v279_v61 = vor.u32 %v359_v56, %v276_v57  ;;  %v262_v63 = vld [vmem:[#allocation2] sm:$0xf]  ;;  %v356_v1 = vld [vmem:[#allocation2 + $0x4] sm:$0xf] }
  0x14   :  { %210 = vmatpush.bf16.msra.mxu0 %v311_v33  ;;  %v283_v62 = vor.u32 %v361_v59, %v282_v58  ;;  %v357_v0 = vld [vmem:[#allocation2 + $0x8] sm:$0xf0]  ;;  %v264_v2 = vld [vmem:[#allocation2 + $0xc] sm:$0xf0]  ;;  %v270_v3 = vld [vmem:[#allocation2 + $0x8] sm:$0xf] }
  0x15   :  { %224 = vmatpush.bf16.msra.mxu1 %v315_v34  ;;  %v358_v4 = vld [vmem:[#allocation2 + $0x10] sm:$0xf0]  ;;  %v263_v5 = vor.u32 %v357_v0, %v262_v63  ;;  %v36_v6 = vld [vmem:[%s472_s0] sm:$0xff]  ;;  %v37_v7 = vld [vmem:[%s472_s0 + $0x8] sm:$0xff]  ;;  %v267_v8 = vor.u32 %v356_v1, %v264_v2 }
  0x16   :  { %238 = vmatpush.bf16.msra.mxu2 %v319_v35  ;;  %v271_v9 = vor.u32 %v358_v4, %v270_v3  ;;  %v38_v10 = vpack.c.bf16 %v37_v7, %v36_v6  ;;  %v71_v11 = vld [vmem:[%s476_s4] sm:$0x7] }
  0x17   :  { %v73_v12 = vperm.slane %v71_v11, 0  ;;  %v74_v13 = vperm.slane %v71_v11, 1  ;;  %v75_v18 = vperm.slane %v71_v11, 2 }
  0x18   :  { %211 = vmatpush.bf16.msra.mxu0 %v299_v42 }
  0x19   :  { %225 = vmatpush.bf16.msra.mxu1 %v303_v43 }
  0x1a   :  { %239 = vmatpush.bf16.msra.mxu2 %v307_v44 }
  0x1c   :  { %212 = vmatpush.bf16.msra.mxu0 %v287_v51 }
  0x1d   :  { %226 = vmatpush.bf16.msra.mxu1 %v291_v52 }
  0x1e   :  { %240 = vmatpush.bf16.msra.mxu2 %v295_v53 }
  0x20   :  { %213 = vmatpush.bf16.msra.mxu0 %v275_v60 }
  0x21   :  { %227 = vmatpush.bf16.msra.mxu1 %v279_v61 }
  0x22   :  { %241 = vmatpush.bf16.msra.mxu2 %v283_v62 }
  0x24   :  { %214 = vmatpush.bf16.msra.mxu0 %v263_v5 }
  0x25   :  { %228 = vmatpush.bf16.msra.mxu1 %v267_v8 }
  0x26   :  { %242 = vmatpush.bf16.msra.mxu2 %v271_v9 }
  0x27   :  { %215 = vmatmul.bf16.vlgmr.msra.gmra.mxu0 %v38_v10 }
  0x28   :  { %229 = vmatmul.bf16.vlgmr.msra.gmra.mxu1 %v38_v10 }
  0x29   :  { %243 = vmatmul.bf16.vlgmr.msra.gmra.mxu2 %v38_v10 }
  0xa4   :  { %v216_v14 = vpop.f32.mrf.mxu0 }
  0xa5   :  { %v217_v15 = vadd.f32 %v216_v14, %v73_v12  ;;  %v230_v16 = vpop.f32.mrf.mxu1 }
  0xa6   :  { %v231_v17 = vadd.f32 %v230_v16, %v74_v13 }
  0xa7   :  { %249 = vst [vmem:[%s477_s5] sm:$0xff] %v217_v15 }
  0xa8   :  { %250 = vst [vmem:[%s477_s5 + $0x8] sm:$0xff] %v231_v17 }
  0xac   :  { %v244_v19 = vpop.f32.mrf.mxu2  ;;  %v218_v21 = vpop.f32.mrf.mxu0 }
  0xad   :  { %v245_v20 = vadd.f32 %v244_v19, %v75_v18  ;;  %v219_v22 = vadd.f32 %v218_v21, %v73_v12  ;;  %v232_v23 = vpop.f32.mrf.mxu1 }
  0xae   :  { %v233_v24 = vadd.f32 %v232_v23, %v74_v13 }
  0xaf   :  { %251 = vst [vmem:[%s477_s5 + $0x10] sm:$0xff] %v245_v20 }
  0xb0   :  { %252 = vst [vmem:[%s477_s5 + $0x18] sm:$0xff] %v219_v22 }
  0xb1   :  { %253 = vst [vmem:[%s477_s5 + $0x20] sm:$0xff] %v233_v24 }
  0xb4   :  { %v246_v25 = vpop.f32.mrf.mxu2 }
  0xb5   :  { %v247_v26 = vadd.f32 %v246_v25, %v75_v18 }
  0xb7   :  { %254 = vst [vmem:[%s477_s5 + $0x28] sm:$0xff] %v247_v26 }
  0xb8   :  { %259 = vsyncpa [#allocation3], 1 }

// kernel: ext_transformer_encoder_forward.12
= control target key start
LH: loop header
LB: loop body
LE: loop exit
PB: predicated region body
PF: predicated region fallthrough
CT: control target
= control target key end

     0   :  { %s630_s9 = smov 0   ;;  %s729_s0 = inlined_call_operand.vmem [shape: f32[2,8,384], index: 0, kind: input, shape index: {}]   ;;  %s730_s1 = inlined_call_operand.vmem [shape: f32[2,1,8], index: 1, kind: input, shape index: {}]   ;;  %s731_s2 = inlined_call_operand.vmem [shape: f32[2,8,128], index: 2, kind: output, shape index: {}]  }
   0x1 LB: > { %s557_s10 = sadd.s32 4294967295, %s609_s9   ;;  %p561_p0 = scmp.ge.s32.totalorder %s609_s9, 1  ;;  %s609_s9 = sphi %s630_s9, %s12_s9  }
   0x2   : > { %p120_p1 = scmp.lt.s32.totalorder %s609_s9, 3 }
   0x4   : > { %p121_p2 = pnand %p561_p0, %p120_p1 }
   0x5   : > { %p144_p3 = scmp.lt.s32.totalorder (!%p121_p2), %s557_s10, 1  ;;  %s611_s15 = smov (!%p121_p2), 96  }
   0x6   : > { %124 = sbr.rel (%p121_p2) target bundleno = 1084 (0x43c), region = 28  ;;  %s612_s16 = smov (!%p121_p2), 64  }
   0x7   : > { %s613_s17 = smov (!%p121_p2), 32  }
   0xb   : > { %s735_s10 = smov (!%p144_p3, %s557_s10), 1  ;;  %vm164_vm0 = vcmask 261120   ;;  %v614_v10 = vmov 0   ;;  %vm189_vm3 = vcmask 64512   ;;  %vm219_vm4 = vcmask 1043456  }
   0xc   : > { %s574_s11 = smul.u32 24, %s735_s10  ;;  %s151_s20 = scalar_lea.vmem %s730_s1, %s735_s10 }
   0xd   : > { %v157_v8 = vld [vmem:[%s151_s20] sm:$0x1]  ;;  %s563_s21 = sshll.u32 %s735_s10, 3 }
   0xe   : > { %s644_s14 = scalar_lea.vmem %s729_s0, %s574_s11  ;;  %vm184_vm1 = vcmp.gt.f32.partialorder %v157_v8, 0.5  ;;  %s696_s24 = scalar_lea.vmem %s731_s2, %s563_s21 }
   0xf   : > { %v160_v0 = vld [vmem:[%s644_s14 + $0x8] sm:$0xff]  ;;  %v158_v1 = vld [vmem:[%s644_s14] sm:$0xff]  ;;  %v185_v11 = vsel %vm184_vm1, 1, %v614_v10  ;;  %v161_v31 = vld [vmem:[%s644_s14 + $0x10] sm:$0xff] }
  0x10   : > { %v163_v2 = vpack.c.bf16 %v160_v0, %v160_v0  ;;  %v159_v4 = vmul.f32 0.17677669, %v158_v1  ;;  %v186_v12 = vperm.slane %v185_v11, 0  ;;  %v676_v32 = vpack.c.bf16 %v161_v31, %v161_v31 }
  0x12   : > { %v169_v3 = vsel %vm164_vm0, %v163_v2, 0  ;;  %247 = vrot.lane.b32.xlu1 %v163_v2, %s611_s15  ;;  %v162_v5 = vpack.c.bf16 %v159_v4, %v159_v4  ;;  %333 = vrot.lane.b32.xlu2 %v163_v2, %s612_s16  ;;  %vm661_vm2 = vcmp.eq.s32.totalorder %v186_v12, 1  ;;  %v221_v34 = vsel %vm219_vm4, %v676_v32, 0 }
  0x13   : > { %178 = vmatpush.bf16.xpose.msra.mxu0 %v169_v3  ;;  %230 = vmatpush.bf16.msra.mxu1 %v221_v34 }
  0x1a   : > { %564 = vmatmul.msk.bf16.vlgmr.msra.gmra.mxu0 %vm164_vm0, %v162_v5  ;;  %244 = vrot.lane.b32.xlu1 %v162_v5, %s611_s15 }
  0x1b   : > { %419 = vrot.lane.b32.xlu2 %v163_v2, %s613_s17 }
  0x22   : > { %416 = vrot.lane.b32.xlu1 %v162_v5, %s613_s17 }
  0x6c   : > { %v334_v18 = vpop.permute.xlu2 %333 }
  0x6d   : > { %v339_v33 = vsel %vm164_vm0, %v334_v18, 0 }
  0x6e   : > { %348 = vmatpush.bf16.xpose.msrb.mxu1 %v339_v33 }
  0x75   : > { %v420_v19 = vpop.permute.xlu2 %419 }
  0x76   : > { %v425_v20 = vsel %vm164_vm0, %v420_v19, 0 }
  0x77   : > { %434 = vmatpush.bf16.xpose.msrb.mxu0 %v425_v20 }
  0x84   : > { %v248_v6 = vpop.permute.xlu1 %247 }
  0x85   : > { %v253_v7 = vsel %vm164_vm0, %v248_v6, 0 }
  0x86   : > { %262 = vmatpush.bf16.xpose.msra.mxu2 %v253_v7 }
  0x8c   : > { %v245_v9 = vpop.permute.xlu1 %244 }
  0x8d   : > { %566 = vmatmul.msk.bf16.vlgmr.msra.gmra.mxu2 %vm164_vm0, %v245_v9 }
  0x94   : > { %v417_v21 = vpop.permute.xlu1 %416 }
  0x95   : > { %570 = vmatmul.msk.bf16.vlgmr.msrb.gmra.mxu0 %vm164_vm0, %v417_v21 }
  0x97   : > { %v180_v14 = vpop.f32.mrf.mxu0 }
  0x98   : > { %v188_v15 = vsel %vm661_vm2, -1e+18, %v180_v14 }
  0x99   : > { %v190_v16 = vsel %vm189_vm3, %v188_v15, -inf }
  0x9a   : > { %191 = vmax.xlane.f32.xlu0 %v190_v16 }
  0x9f   : > { %v182_v17 = vpop.f32.mrf.mxu0 }
 0x10d   : > { %v192_v22 = vpop.xlane.xlu0 %191 }
 0x10e   : > { %v193_v23 = vsub.f32 %v188_v15, %v192_v22 }
 0x110   : > { %v194_v24 = vmul.f32 1.442695, %v193_v23  ;;  %v264_v25 = vpop.f32.mrf.mxu2 }
 0x111   : > { %v268_v26 = vsel %vm661_vm2, -1e+18, %v264_v25 }
 0x112   : > { %587 = vpow2.f32 %v194_v24  ;;  %v269_v27 = vsel %vm189_vm3, %v268_v26, -inf  ;;  %v436_v37 = vpop.f32.mrf.mxu0 }
 0x113   : > { %270 = vmax.xlane.f32.xlu2 %v269_v27  ;;  %v440_v39 = vsel %vm661_vm2, -1e+18, %v436_v37 }
 0x114   : > { %v441_v40 = vsel %vm189_vm3, %v440_v39, -inf }
 0x118   : > { %v588_v28 = vpop.eup %587  ;;  %v266_v29 = vpop.f32.mrf.mxu2 }
 0x119   : > { %v196_v30 = vsel %vm189_vm3, %v588_v28, 0.0 }
 0x11a   : > { %197 = vadd.xlane.f32.xlu0 %v196_v30  ;;  %v438_v42 = vpop.f32.mrf.mxu0 }
 0x12e   : > { %330 = vrot.lane.b32.xlu0 %v162_v5, %s612_s16 }
 0x158   : > { %442 = vmax.xlane.f32.xlu0 %v441_v40 }
 0x16c   : > { %468 = vrot.lane.b32.xlu0 %v676_v32, %s613_s17 }
 0x186   : > { %v271_v35 = vpop.xlane.xlu2 %270 }
 0x187   : > { %v272_v36 = vsub.f32 %v268_v26, %v271_v35 }
 0x189   : > { %v273_v38 = vmul.f32 1.442695, %v272_v36 }
 0x18b   : > { %589 = vpow2.f32 %v273_v38 }
 0x18d   : > { %v198_v41 = vpop.xlane.xlu0 %197 }
 0x18e   : > { %591 = vrcp.f32 %v198_v41  ;;  %v210_v48 = vand.u32 2147483648, %v198_v41  ;;  %v208_v50 = vand.u32 2147483647, %v198_v41  ;;  %vm204_vm6 = vweird.f32 %v198_v41 }
 0x190   : > { %v211_v52 = vor.u32 1.1754944e-38, %v210_v48  ;;  %vm209_vm8 = vcmp.eq.f32.partialorder %v208_v50, 8.507059e+37 }
 0x191   : > { %v684_v43 = vpop.eup %589 }
 0x192   : > { %v275_v44 = vsel %vm189_vm3, %v684_v43, 0.0 }
 0x193   : > { %276 = vadd.xlane.f32.xlu2 %v275_v44 }
 0x194   : > { %v592_v45 = vpop.eup %591 }
 0x195   : > { %v200_v46 = vmul.f32 %v592_v45, %v198_v41  ;;  %vm205_vm5 = vweird.f32 %v592_v45 }
 0x196   : > { %vm206_vm7 = vmor %vm204_vm6, %vm205_vm5 }
 0x197   : > { %v201_v47 = vsub.f32 1.0, %v200_v46 }
 0x199   : > { %v202_v49 = vmul.f32 %v592_v45, %v201_v47 }
 0x19b   : > { %v203_v51 = vadd.f32 %v592_v45, %v202_v49 }
 0x19d   : > { %v207_v53 = vsel %vm206_vm7, %v592_v45, %v203_v51  ;;  %vm407_vm7 = vcmask 785920  }
 0x19e   : > { %v212_v54 = vsel %vm209_vm8, %v211_v52, %v207_v53  ;;  %vm493_vm8 = vcmask 1048320  }
 0x19f   : > { %v213_v55 = vmul.f32 %v588_v28, %v212_v54 }
 0x1a0   : > { %v331_v57 = vpop.permute.xlu0 %330 }
 0x1a1   : > { %v214_v56 = vpack.c.bf16 %v213_v55, %v213_v55 }
 0x1a3   : > { %565 = vmatmul.msk.bf16.vlgmr.msra.gmra.mxu1 %vm189_vm3, %v214_v56 }
 0x1b3   : > { %568 = vmatmul.msk.bf16.vlgmr.msrb.gmra.mxu1 %vm164_vm0, %v331_v57 }
 0x1cb   : > { %v443_v59 = vpop.xlane.xlu0 %442 }
 0x1cc   : > { %v444_v60 = vsub.f32 %v440_v39, %v443_v59 }
 0x1ce   : > { %v445_v62 = vmul.f32 1.442695, %v444_v60 }
 0x1d0   : > { %593 = vpow2.f32 %v445_v62 }
 0x1d6   : > { %v594_v2 = vpop.eup %593 }
 0x1d7   : > { %v447_v4 = vsel %vm189_vm3, %v594_v2, 0.0 }
 0x1de   : > { %v469_v5 = vpop.permute.xlu0 %468 }
 0x1df   : > { %v474_v6 = vsel %vm219_vm4, %v469_v5, 0 }
 0x1e0   : > { %483 = vmatpush.bf16.msrb.mxu2 %v474_v6 }
 0x206   : > { %v277_v25 = vpop.xlane.xlu2 %276 }
 0x207   : > { %vm283_vm13 = vweird.f32 %v277_v25  ;;  %v289_v30 = vand.u32 2147483648, %v277_v25  ;;  %v287_v33 = vand.u32 2147483647, %v277_v25 }
 0x209   : > { %v290_v34 = vor.u32 1.1754944e-38, %v289_v30 }
 0x220   : > { %v232_v58 = vpop.f32.mrf.mxu1 }
 0x221   : > { %236 = vst.msk [vmem:[%s696_s24] sm:$0xff] %vm164_vm0, %v232_v58  ;;  %vm288_vm0 = vcmp.eq.f32.partialorder %v287_v33, 8.507059e+37 }
 0x228   : > { %v234_v61 = vpop.f32.mrf.mxu1 }
 0x230   : > { %v350_v63 = vpop.f32.mrf.mxu1 }
 0x231   : > { %v354_v0 = vsel %vm661_vm2, -1e+18, %v350_v63 }
 0x232   : > { %v355_v1 = vsel %vm189_vm3, %v354_v0, -inf }
 0x233   : > { %356 = vmax.xlane.f32.xlu1 %v355_v1 }
 0x238   : > { %v352_v3 = vpop.f32.mrf.mxu1 }
 0x23b   : > { %448 = vadd.xlane.f32.xlu1 %v447_v4 }
 0x254   : > { %382 = vrot.lane.b32.xlu1 %v676_v32, %s612_s16 }
 0x2a6   : > { %v357_v7 = vpop.xlane.xlu1 %356 }
 0x2a7   : > { %v358_v8 = vsub.f32 %v354_v0, %v357_v7 }
 0x2a9   : > { %v359_v9 = vmul.f32 1.442695, %v358_v8 }
 0x2ab   : > { %595 = vpow2.f32 %v359_v9 }
 0x2ae   : > { %v449_v10 = vpop.xlane.xlu1 %448 }
 0x2af   : > { %597 = vrcp.f32 %v449_v10  ;;  %v461_v16 = vand.u32 2147483648, %v449_v10  ;;  %v459_v18 = vand.u32 2147483647, %v449_v10  ;;  %vm455_vm10 = vweird.f32 %v449_v10 }
 0x2b0   : > { %599 = vrcp.f32 %v277_v25 }
 0x2b1   : > { %v707_v11 = vpop.eup %595  ;;  %v462_v20 = vor.u32 1.1754944e-38, %v461_v16  ;;  %vm460_vm12 = vcmp.eq.f32.partialorder %v459_v18, 8.507059e+37 }
 0x2b2   : > { %v361_v12 = vsel %vm189_vm3, %v707_v11, 0.0 }
 0x2b3   : > { %362 = vadd.xlane.f32.xlu2 %v361_v12 }
 0x2b5   : > { %v598_v13 = vpop.eup %597 }
 0x2b6   : > { %v451_v14 = vmul.f32 %v598_v13, %v449_v10  ;;  %vm456_vm9 = vweird.f32 %v598_v13  ;;  %v600_v26 = vpop.eup %599 }
 0x2b7   : > { %vm457_vm11 = vmor %vm455_vm10, %vm456_vm9  ;;  %v279_v27 = vmul.f32 %v600_v26, %v277_v25  ;;  %vm284_vm14 = vweird.f32 %v600_v26 }
 0x2b8   : > { %v452_v15 = vsub.f32 1.0, %v451_v14  ;;  %vm285_vm15 = vmor %vm283_vm13, %vm284_vm14 }
 0x2b9   : > { %v280_v28 = vsub.f32 1.0, %v279_v27 }
 0x2ba   : > { %v453_v17 = vmul.f32 %v598_v13, %v452_v15 }
 0x2bb   : > { %v281_v29 = vmul.f32 %v600_v26, %v280_v28 }
 0x2bc   : > { %v454_v19 = vadd.f32 %v598_v13, %v453_v17 }
 0x2bd   : > { %v282_v31 = vadd.f32 %v600_v26, %v281_v29 }
 0x2be   : > { %v458_v21 = vsel %vm457_vm11, %v598_v13, %v454_v19 }
 0x2bf   : > { %v463_v22 = vsel %vm460_vm12, %v462_v20, %v458_v21  ;;  %v286_v36 = vsel %vm285_vm15, %v600_v26, %v282_v31 }
 0x2c0   : > { %v464_v23 = vmul.f32 %v594_v2, %v463_v22  ;;  %v291_v37 = vsel %vm288_vm0, %v290_v34, %v286_v36 }
 0x2c1   : > { %v292_v39 = vmul.f32 %v684_v43, %v291_v37 }
 0x2c2   : > { %v465_v24 = vpack.c.bf16 %v464_v23, %v464_v23 }
 0x2c3   : > { %v293_v46 = vpack.c.bf16 %v292_v39, %v292_v39 }
 0x2c4   : > { %571 = vmatmul.msk.bf16.vlgmr.msrb.gmra.mxu2 %vm189_vm3, %v465_v24 }
 0x2c6   : > { %v383_v38 = vpop.permute.xlu1 %382 }
 0x2c7   : > { %v388_v42 = vsel %vm219_vm4, %v383_v38, 0 }
 0x2cb   : > { %296 = vrot.lane.b32.xlu2 %v676_v32, %s611_s15 }
 0x326   : > { %v363_v35 = vpop.xlane.xlu2 %362 }
 0x327   : > { %601 = vrcp.f32 %v363_v35  ;;  %v375_v49 = vand.u32 2147483648, %v363_v35  ;;  %vm369_vm2 = vweird.f32 %v363_v35  ;;  %v373_v50 = vand.u32 2147483647, %v363_v35 }
 0x329   : > { %v376_v51 = vor.u32 1.1754944e-38, %v375_v49  ;;  %vm374_vm6 = vcmp.eq.f32.partialorder %v373_v50, 8.507059e+37 }
 0x32d   : > { %v602_v32 = vpop.eup %601 }
 0x32e   : > { %v365_v40 = vmul.f32 %v602_v32, %v363_v35  ;;  %v297_v41 = vpop.permute.xlu2 %296  ;;  %vm370_vm1 = vweird.f32 %v602_v32 }
 0x32f   : > { %v302_v44 = vsel %vm219_vm4, %v297_v41, 0  ;;  %vm371_vm5 = vmor %vm369_vm2, %vm370_vm1  ;;  %vm321_vm4 = vcmask 523520  }
 0x330   : > { %v366_v45 = vsub.f32 1.0, %v365_v40  ;;  %311 = vmatpush.bf16.msra.mxu3 %v302_v44 }
 0x332   : > { %v367_v47 = vmul.f32 %v602_v32, %v366_v45 }
 0x333   : > { %567 = vmatmul.msk.bf16.vlgmr.msra.gmra.mxu3 %vm189_vm3, %v293_v46 }
 0x334   : > { %397 = vmatpush.bf16.msrb.mxu3 %v388_v42  ;;  %v368_v48 = vadd.f32 %v602_v32, %v367_v47 }
 0x336   : > { %v372_v43 = vsel %vm371_vm5, %v602_v32, %v368_v48 }
 0x337   : > { %v377_v52 = vsel %vm374_vm6, %v376_v51, %v372_v43 }
 0x338   : > { %v378_v53 = vmul.f32 %v707_v11, %v377_v52 }
 0x33a   : > { %v379_v54 = vpack.c.bf16 %v378_v53, %v378_v53 }
 0x343   : > { %569 = vmatmul.msk.bf16.vlgmr.msrb.gmra.mxu3 %vm189_vm3, %v379_v54 }
 0x347   : > { %v485_v55 = vpop.f32.mrf.mxu2 }
 0x348   : > { %490 = vrot.lane.b32.xlu1 %v485_v55, %s611_s15 }
 0x34f   : > { %v487_v56 = vpop.f32.mrf.mxu2 }
 0x3b6   : > { %v313_v57 = vpop.f32.mrf.mxu3 }
 0x3b7   : > { %318 = vrot.lane.b32.xlu2 %v313_v57, %s613_s17 }
 0x3ba   : > { %v491_v63 = vpop.permute.xlu1 %490 }
 0x3be   : > { %v315_v58 = vpop.f32.mrf.mxu3 }
 0x3c6   : > { %v399_v59 = vpop.f32.mrf.mxu3 }
 0x3c7   : > { %404 = vrot.lane.b32.xlu0 %v399_v59, %s612_s16 }
 0x3ce   : > { %v401_v60 = vpop.f32.mrf.mxu3 }
 0x411   : > { %v319_v61 = vpop.permute.xlu2 %318 }
 0x412   : > { %322 = vst.msk [vmem:[%s696_s24] sm:$0xff] %vm321_vm4, %v319_v61 }
 0x439   : > { %v405_v62 = vpop.permute.xlu0 %404 }
 0x43a   : > { %408 = vst.msk [vmem:[%s696_s24] sm:$0xff] %vm407_vm7, %v405_v62 }
 0x43b   : > { %494 = vst.msk [vmem:[%s696_s24] sm:$0xff] %vm493_vm8, %v491_v63 }
 0x43c PF: > { %s12_s9 = sadd.s32 1, %s609_s9  }
 0x43d   : > { %p9_p4 = scmp.ge.s32.totalorder %s12_s9, 4  }
 0x43f   :  { %11 = sbr.rel (!%p9_p4) target bundleno = 1 (0x1), region = 61 }

// kernel: ext_transformer_encoder_forward.13
= control target key start
LH: loop header
LB: loop body
LE: loop exit
PB: predicated region body
PF: predicated region fallthrough
CT: control target
= control target key end

     0   :  { %11 = vsyncpa [#allocation3], 0  ;;  %s205_s23 = smov [#allocation2]   ;;  %s206_s24 = smov 64   ;;  %s267_s0 = inlined_call_operand.vmem [shape: f32[16,128], index: 0, kind: input, shape index: {}]   ;;  %s268_s1 = inlined_call_operand.vmem [shape: f32[1,128], index: 1, kind: input, shape index: {}]   ;;  %s269_s2 = inlined_call_operand.vmem [shape: f32[1,128], index: 2, kind: input, shape index: {}]   ;;  %s270_s3 = inlined_call_operand.hbm [shape: bf16[128,128], index: 3, kind: input, shape index: {}]   ;;  %s271_s4 = inlined_call_operand.vmem [shape: f32[1,128], index: 4, kind: input, shape index: {}]   ;;  %s272_s5 = inlined_call_operand.vmem [shape: f32[16,128], index: 5, kind: input, shape index: {}]   ;;  %s273_s6 = inlined_call_operand.vmem [shape: f32[16,128], index: 6, kind: output, shape index: {}]  }
   0x1   :  { %s22_s1 = sshll.u32 %s270_s3, 4  ;;  %s24_s2 = sshll.u32 %s205_s23, 4  ;;  %s23_s1 = int_to_ptr.hbm [resolvable:$true] %s22_s1  ;;  %s25_s2 = int_to_ptr.vmem [resolvable:$true] %s24_s2 }
   0x2   :  { %s207_s25 = smov 4  }
   0x3   :  { %30 = dma.hbm_to_vmem [thread:$0]  %s23_s1, 1024, %s25_s2, [#allocation3], %s206_s24, %s206_s24, %s207_s25  }
   0x4   :  { %203 = dma.done.wait [#allocation3], 1024  }
   0x5   :  { %204 = vsyncadd [#allocation3], 4294966272  ;;  %v174_v0 = vld [vmem:[#allocation2 + $0x38] sm:$0xff]  ;;  %v173_v1 = vld [vmem:[#allocation2 + $0x30] sm:$0xff] }
   0x6   :  { %110 = vmatpush.bf16.msra.mxu0 %v174_v0  ;;  %v172_v2 = vld [vmem:[#allocation2 + $0x28] sm:$0xff]  ;;  %v171_v3 = vld [vmem:[#allocation2 + $0x20] sm:$0xff]  ;;  %v170_v4 = vld [vmem:[#allocation2 + $0x18] sm:$0xff] }
   0x7   :  { %v169_v5 = vld [vmem:[#allocation2 + $0x10] sm:$0xff]  ;;  %v168_v6 = vld [vmem:[#allocation2 + $0x8] sm:$0xff]  ;;  %v167_v7 = vld [vmem:[#allocation2] sm:$0xff] }
   0x8   :  { %v39_v8 = vld [vmem:[%s267_s0] sm:$0xff]  ;;  %v40_v9 = vld [vmem:[%s267_s0 + $0x8] sm:$0xff] }
   0x9   :  { %v41_v10 = vpack.c.bf16 %v40_v9, %v39_v8  ;;  %v178_v11 = vld [vmem:[%s271_s4] ss:$0 sm:$0xff]  ;;  %v125_v17 = vld [vmem:[%s272_s5 + $0x8] sm:$0xff] }
   0xa   :  { %111 = vmatpush.bf16.msra.mxu0 %v173_v1  ;;  %v124_v13 = vld [vmem:[%s272_s5] sm:$0xff] }
   0xe   :  { %112 = vmatpush.bf16.msra.mxu0 %v172_v2 }
  0x12   :  { %113 = vmatpush.bf16.msra.mxu0 %v171_v3 }
  0x16   :  { %114 = vmatpush.bf16.msra.mxu0 %v170_v4 }
  0x1a   :  { %115 = vmatpush.bf16.msra.mxu0 %v169_v5 }
  0x1e   :  { %116 = vmatpush.bf16.msra.mxu0 %v168_v6 }
  0x22   :  { %117 = vmatpush.bf16.msra.mxu0 %v167_v7 }
  0x25   :  { %118 = vmatmul.bf16.vlgmr.msra.gmra.mxu0 %v41_v10 }
  0xa2   :  { %v119_v12 = vpop.f32.mrf.mxu0 }
  0xa3   :  { %v120_v14 = vadd.f32 %v178_v11, %v119_v12 }
  0xa5   :  { %v126_v15 = vadd.f32 %v124_v13, %v120_v14 }
  0xa7   :  { %128 = vst [vmem:[%s273_s6] sm:$0xff] %v126_v15 }
  0xaa   :  { %v121_v16 = vpop.f32.mrf.mxu0 }
  0xab   :  { %v122_v18 = vadd.f32 %v178_v11, %v121_v16 }
  0xad   :  { %v127_v19 = vadd.f32 %v125_v17, %v122_v18 }
  0xaf   :  { %129 = vst [vmem:[%s273_s6 + $0x8] sm:$0xff] %v127_v19 }
  0xb0   :  { %134 = vsyncpa [#allocation3], 1 }

// kernel: ext_transformer_encoder_forward.15
= control target key start
LH: loop header
LB: loop body
LE: loop exit
PB: predicated region body
PF: predicated region fallthrough
CT: control target
= control target key end

     0   :  { %v431_v2 = vmov 128.0   ;;  %s655_s0 = inlined_call_operand.vmem [shape: f32[16,128], index: 0, kind: input, shape index: {}]   ;;  %s656_s1 = inlined_call_operand.vmem [shape: f32[1,128], index: 1, kind: input, shape index: {}]   ;;  %s657_s2 = inlined_call_operand.vmem [shape: f32[1,128], index: 2, kind: input, shape index: {}]   ;;  %s658_s3 = inlined_call_operand.vmem [shape: bf16[128,384], index: 3, kind: input, shape index: {}]   ;;  %s659_s4 = inlined_call_operand.vmem [shape: f32[1,384], index: 4, kind: input, shape index: {}]   ;;  %s660_s5 = inlined_call_operand.vmem [shape: f32[16,384], index: 5, kind: output, shape index: {}]  }
   0x1   :  { %v20_v0 = vld [vmem:[%s655_s0] sm:$0xff]  ;;  %v21_v1 = vld [vmem:[%s655_s0 + $0x8] sm:$0xff]  ;;  %425 = vrcp.f32 %v431_v2  ;;  %v420_v18 = vld [vmem:[%s658_s3 + $0xb0] sm:$0xf0] }
   0x2   :  { %22 = vadd.xlane.f32.xlu0 %v20_v0  ;;  %v388_v17 = vld [vmem:[%s658_s3 + $0xa8] sm:$0xf]  ;;  %v419_v19 = vld [vmem:[%s658_s3 + $0xac] sm:$0xf]  ;;  %v390_v21 = vld [vmem:[%s658_s3 + $0xb4] sm:$0xf0] }
   0x3   :  { %v389_v20 = vor.u32 %v420_v18, %v388_v17  ;;  %v396_v22 = vld [vmem:[%s658_s3 + $0xb0] sm:$0xf]  ;;  %v421_v23 = vld [vmem:[%s658_s3 + $0xb8] sm:$0xf0]  ;;  %v393_v24 = vor.u32 %v419_v19, %v390_v21  ;;  %v416_v28 = vld [vmem:[%s658_s3 + $0x94] sm:$0xf] }
   0x4   :  { %v397_v25 = vor.u32 %v421_v23, %v396_v22  ;;  %v376_v26 = vld [vmem:[%s658_s3 + $0x90] sm:$0xf]  ;;  %v417_v27 = vld [vmem:[%s658_s3 + $0x98] sm:$0xf0]  ;;  %v378_v30 = vld [vmem:[%s658_s3 + $0x9c] sm:$0xf0] }
   0x5   :  { %250 = vmatpush.bf16.msra.mxu0 %v389_v20  ;;  %264 = vmatpush.bf16.msra.mxu1 %v393_v24  ;;  %v377_v29 = vor.u32 %v417_v27, %v376_v26  ;;  %v384_v31 = vld [vmem:[%s658_s3 + $0x98] sm:$0xf]  ;;  %v418_v32 = vld [vmem:[%s658_s3 + $0xa0] sm:$0xf0]  ;;  %v381_v33 = vor.u32 %v416_v28, %v378_v30  ;;  %v413_v37 = vld [vmem:[%s658_s3 + $0x7c] sm:$0xf] }
   0x6   :  { %278 = vmatpush.bf16.msra.mxu2 %v397_v25  ;;  %v385_v34 = vor.u32 %v418_v32, %v384_v31  ;;  %v364_v35 = vld [vmem:[%s658_s3 + $0x78] sm:$0xf]  ;;  %v414_v36 = vld [vmem:[%s658_s3 + $0x80] sm:$0xf0]  ;;  %v366_v39 = vld [vmem:[%s658_s3 + $0x84] sm:$0xf0] }
   0x7   :  { %v426_v3 = vpop.eup %425  ;;  %v365_v38 = vor.u32 %v414_v36, %v364_v35  ;;  %v372_v40 = vld [vmem:[%s658_s3 + $0x80] sm:$0xf]  ;;  %v415_v41 = vld [vmem:[%s658_s3 + $0x88] sm:$0xf0]  ;;  %v369_v42 = vor.u32 %v413_v37, %v366_v39  ;;  %v410_v46 = vld [vmem:[%s658_s3 + $0x64] sm:$0xf] }
   0x8   :  { %v27_v4 = vmul.f32 128.0, %v426_v3  ;;  %vm31_vm0 = vweird.f32 %v426_v3  ;;  %v373_v43 = vor.u32 %v415_v41, %v372_v40  ;;  %v352_v44 = vld [vmem:[%s658_s3 + $0x60] sm:$0xf]  ;;  %v411_v45 = vld [vmem:[%s658_s3 + $0x68] sm:$0xf0] }
   0x9   :  { %251 = vmatpush.bf16.msra.mxu0 %v377_v29  ;;  %265 = vmatpush.bf16.msra.mxu1 %v381_v33  ;;  %v353_v47 = vor.u32 %v411_v45, %v352_v44  ;;  %v354_v48 = vld [vmem:[%s658_s3 + $0x6c] sm:$0xf0]  ;;  %v360_v49 = vld [vmem:[%s658_s3 + $0x68] sm:$0xf]  ;;  %v412_v50 = vld [vmem:[%s658_s3 + $0x70] sm:$0xf0] }
   0xa   :  { %24 = vadd.xlane.f32.xlu0 %v21_v1  ;;  %v28_v5 = vsub.f32 1.0, %v27_v4  ;;  %279 = vmatpush.bf16.msra.mxu2 %v385_v34  ;;  %v357_v51 = vor.u32 %v410_v46, %v354_v48  ;;  %v361_v52 = vor.u32 %v412_v50, %v360_v49  ;;  %v340_v53 = vld [vmem:[%s658_s3 + $0x48] sm:$0xf]  ;;  %v408_v54 = vld [vmem:[%s658_s3 + $0x50] sm:$0xf0] }
   0xb   :  { %v407_v55 = vld [vmem:[%s658_s3 + $0x4c] sm:$0xf]  ;;  %v341_v56 = vor.u32 %v408_v54, %v340_v53  ;;  %v342_v57 = vld [vmem:[%s658_s3 + $0x54] sm:$0xf0]  ;;  %v348_v58 = vld [vmem:[%s658_s3 + $0x50] sm:$0xf] }
   0xc   :  { %v29_v6 = vmul.f32 %v426_v3, %v28_v5  ;;  %v409_v59 = vld [vmem:[%s658_s3 + $0x58] sm:$0xf0]  ;;  %v345_v60 = vor.u32 %v407_v55, %v342_v57  ;;  %v328_v62 = vld [vmem:[%s658_s3 + $0x30] sm:$0xf]  ;;  %v330_v2 = vld [vmem:[%s658_s3 + $0x3c] sm:$0xf0] }
   0xd   :  { %252 = vmatpush.bf16.msra.mxu0 %v365_v38  ;;  %266 = vmatpush.bf16.msra.mxu1 %v369_v42  ;;  %v349_v61 = vor.u32 %v409_v59, %v348_v58  ;;  %v405_v63 = vld [vmem:[%s658_s3 + $0x38] sm:$0xf0]  ;;  %v406_v4 = vld [vmem:[%s658_s3 + $0x40] sm:$0xf0]  ;;  %v304_v19 = vld [vmem:[%s658_s3] sm:$0xf] }
   0xe   :  { %v30_v7 = vadd.f32 %v426_v3, %v29_v6  ;;  %280 = vmatpush.bf16.msra.mxu2 %v373_v43  ;;  %v399_v20 = vld [vmem:[%s658_s3 + $0x8] sm:$0xf0]  ;;  %v398_v21 = vld [vmem:[%s658_s3 + $0x4] sm:$0xf]  ;;  %v306_v24 = vld [vmem:[%s658_s3 + $0xc] sm:$0xf0] }
   0xf   :  { %v305_v23 = vor.u32 %v399_v20, %v304_v19  ;;  %v312_v25 = vld [vmem:[%s658_s3 + $0x8] sm:$0xf]  ;;  %v400_v26 = vld [vmem:[%s658_s3 + $0x10] sm:$0xf0]  ;;  %v309_v28 = vor.u32 %v398_v21, %v306_v24  ;;  %v423_v46 = vld [vmem:[%s656_s1] ss:$0 sm:$0xff] }
  0x10   :  { %v468_v8 = vsel %vm31_vm0, %v426_v3, %v30_v7  ;;  %v336_v3 = vld [vmem:[%s658_s3 + $0x38] sm:$0xf]  ;;  %v313_v29 = vor.u32 %v400_v26, %v312_v25 }
  0x11   :  { %253 = vmatpush.bf16.msra.mxu0 %v353_v47  ;;  %267 = vmatpush.bf16.msra.mxu1 %v357_v51  ;;  %v337_v6 = vor.u32 %v406_v4, %v336_v3  ;;  %v316_v7 = vld [vmem:[%s658_s3 + $0x18] sm:$0xf]  ;;  %v424_v51 = vld [vmem:[%s657_s2] ss:$0 sm:$0xff] }
  0x12   :  { %281 = vmatpush.bf16.msra.mxu2 %v361_v52 }
  0x15   :  { %254 = vmatpush.bf16.msra.mxu0 %v341_v56  ;;  %268 = vmatpush.bf16.msra.mxu1 %v345_v60 }
  0x16   :  { %282 = vmatpush.bf16.msra.mxu2 %v349_v61 }
  0x1a   :  { %283 = vmatpush.bf16.msra.mxu2 %v337_v6 }
  0x75   :  { %v23_v9 = vpop.xlane.xlu0 %22 }
  0x76   :  { %v33_v10 = vmul.f32 %v468_v8, %v23_v9  ;;  %v402_v9 = vld [vmem:[%s658_s3 + $0x20] sm:$0xf0] }
  0x78   :  { %v471_v11 = vsub.f32 %v20_v0, %v33_v10  ;;  %v404_v0 = vld [vmem:[%s658_s3 + $0x34] sm:$0xf]  ;;  %v401_v10 = vld [vmem:[%s658_s3 + $0x1c] sm:$0xf] }
  0x79   :  { %v333_v5 = vor.u32 %v404_v0, %v330_v2 }
  0x7a   :  { %v37_v12 = vmul.f32 %v471_v11, %v471_v11 }
  0x7b   :  { %269 = vmatpush.bf16.msra.mxu1 %v333_v5 }
  0x7c   :  { %39 = vadd.xlane.f32.xlu1 %v37_v12  ;;  %v317_v12 = vor.u32 %v402_v9, %v316_v7 }
  0x7d   :  { %v25_v13 = vpop.xlane.xlu0 %24 }
  0x7e   :  { %v34_v14 = vmul.f32 %v468_v8, %v25_v13  ;;  %v318_v13 = vld [vmem:[%s658_s3 + $0x24] sm:$0xf0] }
  0x7f   :  { %v321_v17 = vor.u32 %v401_v10, %v318_v13 }
  0x80   :  { %v476_v15 = vsub.f32 %v21_v1, %v34_v14  ;;  %v329_v1 = vor.u32 %v405_v63, %v328_v62  ;;  %v324_v14 = vld [vmem:[%s658_s3 + $0x20] sm:$0xf] }
  0x81   :  { %270 = vmatpush.bf16.msra.mxu1 %v321_v17 }
  0x82   :  { %v38_v16 = vmul.f32 %v476_v15, %v476_v15  ;;  %255 = vmatpush.bf16.msra.mxu0 %v329_v1 }
  0x84   :  { %41 = vadd.xlane.f32.xlu1 %v38_v16  ;;  %v403_v16 = vld [vmem:[%s658_s3 + $0x28] sm:$0xf0] }
  0x85   :  { %v325_v18 = vor.u32 %v403_v16, %v324_v14  ;;  %271 = vmatpush.bf16.msra.mxu1 %v309_v28 }
  0x86   :  { %256 = vmatpush.bf16.msra.mxu0 %v317_v12 }
  0x87   :  { %284 = vmatpush.bf16.msra.mxu2 %v325_v18 }
  0x8a   :  { %257 = vmatpush.bf16.msra.mxu0 %v305_v23 }
  0x8b   :  { %285 = vmatpush.bf16.msra.mxu2 %v313_v29 }
  0xef   :  { %v40_v22 = vpop.xlane.xlu1 %39 }
  0xf0   :  { %v43_v27 = vmul.f32 %v40_v22, %v468_v8 }
  0xf2   :  { %v45_v30 = vadd.f32 1e-06, %v43_v27 }
  0xf4   :  { %427 = vrsqrt.f32 %v45_v30  ;;  %vm53_vm2 = vweird.f32 %v45_v30 }
  0xf7   :  { %v42_v31 = vpop.xlane.xlu1 %41 }
  0xf8   :  { %v44_v32 = vmul.f32 %v42_v31, %v468_v8 }
  0xfa   :  { %v428_v33 = vpop.eup %427  ;;  %v46_v34 = vadd.f32 1e-06, %v44_v32 }
  0xfb   :  { %v48_v35 = vmul.f32 %v428_v33, %v45_v30  ;;  %vm54_vm1 = vweird.f32 %v428_v33 }
  0xfc   :  { %429 = vrsqrt.f32 %v46_v34  ;;  %vm55_vm3 = vmor %vm53_vm2, %vm54_vm1  ;;  %vm63_vm5 = vweird.f32 %v46_v34 }
  0xfd   :  { %v49_v36 = vmul.f32 %v428_v33, %v48_v35 }
  0xff   :  { %v50_v37 = vmul.f32 0.5, %v49_v36 }
 0x101   :  { %v51_v38 = vsub.f32 1.5, %v50_v37 }
 0x102   :  { %v430_v39 = vpop.eup %429 }
 0x103   :  { %v52_v40 = vmul.f32 %v428_v33, %v51_v38  ;;  %v58_v41 = vmul.f32 %v430_v39, %v46_v34  ;;  %vm64_vm4 = vweird.f32 %v430_v39 }
 0x104   :  { %vm65_vm6 = vmor %vm63_vm5, %vm64_vm4 }
 0x105   :  { %v59_v42 = vmul.f32 %v430_v39, %v58_v41  ;;  %v56_v43 = vsel %vm55_vm3, %v428_v33, %v52_v40 }
 0x106   :  { %v67_v8 = vmul.f32 %v56_v43, %v471_v11  ;;  %v114_v11 = vld [vmem:[%s659_s4] sm:$0x7] }
 0x107   :  { %v60_v44 = vmul.f32 0.5, %v59_v42  ;;  %v116_v56 = vperm.slane %v114_v11, 0  ;;  %v117_v57 = vperm.slane %v114_v11, 1  ;;  %v118_v61 = vperm.slane %v114_v11, 2 }
 0x108   :  { %v73_v50 = vmul.f32 %v423_v46, %v67_v8 }
 0x109   :  { %v61_v45 = vsub.f32 1.5, %v60_v44 }
 0x10a   :  { %v79_v53 = vadd.f32 %v424_v51, %v73_v50 }
 0x10b   :  { %v62_v47 = vmul.f32 %v430_v39, %v61_v45 }
 0x10d   :  { %v66_v48 = vsel %vm65_vm6, %v430_v39, %v62_v47 }
 0x10e   :  { %v68_v49 = vmul.f32 %v66_v48, %v476_v15 }
 0x110   :  { %v74_v52 = vmul.f32 %v423_v46, %v68_v49 }
 0x112   :  { %v80_v54 = vadd.f32 %v424_v51, %v74_v52 }
 0x114   :  { %v81_v55 = vpack.c.bf16 %v80_v54, %v79_v53 }
 0x116   :  { %258 = vmatmul.bf16.vlgmr.msra.gmra.mxu0 %v81_v55  ;;  %272 = vmatmul.bf16.vlgmr.msra.gmra.mxu1 %v81_v55 }
 0x117   :  { %286 = vmatmul.bf16.vlgmr.msra.gmra.mxu2 %v81_v55 }
 0x193   :  { %v259_v58 = vpop.f32.mrf.mxu0  ;;  %v273_v15 = vpop.f32.mrf.mxu1 }
 0x194   :  { %v260_v59 = vadd.f32 %v259_v58, %v116_v56  ;;  %v274_v60 = vadd.f32 %v273_v15, %v117_v57 }
 0x196   :  { %292 = vst [vmem:[%s660_s5] sm:$0xff] %v260_v59 }
 0x197   :  { %293 = vst [vmem:[%s660_s5 + $0x8] sm:$0xff] %v274_v60 }
 0x19a   :  { %v287_v62 = vpop.f32.mrf.mxu2 }
 0x19b   :  { %v288_v63 = vadd.f32 %v287_v62, %v118_v61  ;;  %v261_v0 = vpop.f32.mrf.mxu0  ;;  %v275_v1 = vpop.f32.mrf.mxu1 }
 0x19c   :  { %v262_v2 = vadd.f32 %v261_v0, %v116_v56  ;;  %v276_v3 = vadd.f32 %v275_v1, %v117_v57 }
 0x19d   :  { %294 = vst [vmem:[%s660_s5 + $0x10] sm:$0xff] %v288_v63 }
 0x19e   :  { %295 = vst [vmem:[%s660_s5 + $0x18] sm:$0xff] %v262_v2 }
 0x19f   :  { %296 = vst [vmem:[%s660_s5 + $0x20] sm:$0xff] %v276_v3 }
 0x1a2   :  { %v289_v4 = vpop.f32.mrf.mxu2 }
 0x1a3   :  { %v290_v5 = vadd.f32 %v289_v4, %v118_v61 }
 0x1a5   :  { %297 = vst [vmem:[%s660_s5 + $0x28] sm:$0xff] %v290_v5 }

// kernel: ext_transformer_encoder_forward.17
= control target key start
LH: loop header
LB: loop body
LE: loop exit
PB: predicated region body
PF: predicated region fallthrough
CT: control target
= control target key end

     0   :  { %s239_s1 = inlined_call_operand.vmem [shape: f32[1,128], index: 1, kind: input, shape index: {}]   ;;  %s240_s2 = inlined_call_operand.vmem [shape: f32[1,128], index: 2, kind: input, shape index: {}]   ;;  %s241_s3 = inlined_call_operand.vmem [shape: bf16[128,128], index: 3, kind: input, shape index: {}]   ;;  %s242_s4 = inlined_call_operand.vmem [shape: f32[1,128], index: 4, kind: input, shape index: {}]   ;;  %s243_s0 = inlined_call_operand.vmem [shape: f32[16,128], index: 0, kind: input, shape index: {}]   ;;  %s244_s5 = inlined_call_operand.vmem [shape: f32[16,128], index: 5, kind: input, shape index: {}]   ;;  %s245_s6 = inlined_call_operand.vmem [shape: f32[16,128], index: 6, kind: output, shape index: {}]  }
   0x1   :  { %v157_v0 = vld [vmem:[%s241_s3 + $0x38] sm:$0xff]  ;;  %v156_v1 = vld [vmem:[%s241_s3 + $0x30] sm:$0xff]  ;;  %v155_v2 = vld [vmem:[%s241_s3 + $0x28] sm:$0xff] }
   0x2   :  { %94 = vmatpush.bf16.msra.mxu0 %v157_v0  ;;  %v154_v3 = vld [vmem:[%s241_s3 + $0x20] sm:$0xff]  ;;  %v153_v4 = vld [vmem:[%s241_s3 + $0x18] sm:$0xff]  ;;  %v152_v5 = vld [vmem:[%s241_s3 + $0x10] sm:$0xff] }
   0x3   :  { %v151_v6 = vld [vmem:[%s241_s3 + $0x8] sm:$0xff]  ;;  %v150_v7 = vld [vmem:[%s241_s3] sm:$0xff] }
   0x4   :  { %v23_v8 = vld [vmem:[%s243_s0] sm:$0xff]  ;;  %v24_v9 = vld [vmem:[%s243_s0 + $0x8] sm:$0xff] }
   0x5   :  { %v25_v10 = vpack.c.bf16 %v24_v9, %v23_v8  ;;  %v158_v11 = vld [vmem:[%s242_s4] ss:$0 sm:$0xff]  ;;  %v109_v17 = vld [vmem:[%s244_s5 + $0x8] sm:$0xff] }
   0x6   :  { %95 = vmatpush.bf16.msra.mxu0 %v156_v1  ;;  %v108_v13 = vld [vmem:[%s244_s5] sm:$0xff] }
   0xa   :  { %96 = vmatpush.bf16.msra.mxu0 %v155_v2 }
   0xe   :  { %97 = vmatpush.bf16.msra.mxu0 %v154_v3 }
  0x12   :  { %98 = vmatpush.bf16.msra.mxu0 %v153_v4 }
  0x16   :  { %99 = vmatpush.bf16.msra.mxu0 %v152_v5 }
  0x1a   :  { %100 = vmatpush.bf16.msra.mxu0 %v151_v6 }
  0x1e   :  { %101 = vmatpush.bf16.msra.mxu0 %v150_v7 }
  0x21   :  { %102 = vmatmul.bf16.vlgmr.msra.gmra.mxu0 %v25_v10 }
  0x9e   :  { %v103_v12 = vpop.f32.mrf.mxu0 }
  0x9f   :  { %v104_v14 = vadd.f32 %v158_v11, %v103_v12 }
  0xa1   :  { %v110_v15 = vadd.f32 %v108_v13, %v104_v14 }
  0xa3   :  { %112 = vst [vmem:[%s245_s6] sm:$0xff] %v110_v15 }
  0xa6   :  { %v105_v16 = vpop.f32.mrf.mxu0 }
  0xa7   :  { %v106_v18 = vadd.f32 %v158_v11, %v105_v16 }
  0xa9   :  { %v111_v19 = vadd.f32 %v109_v17, %v106_v18 }
  0xab   :  { %113 = vst [vmem:[%s245_s6 + $0x8] sm:$0xff] %v111_v19 }

// kernel: ext_transformer_encoder_forward.14
= control target key start
LH: loop header
LB: loop body
LE: loop exit
PB: predicated region body
PF: predicated region fallthrough
CT: control target
= control target key end

     0   :  { %12 = vsyncpa [#allocation6], 0  ;;  %s2211_s0 = inlined_call_operand.vmem [shape: f32[16,128], index: 0, kind: input, shape index: {}]   ;;  %s2212_s1 = inlined_call_operand.vmem [shape: f32[1,128], index: 1, kind: input, shape index: {}]   ;;  %s2213_s2 = inlined_call_operand.vmem [shape: f32[1,128], index: 2, kind: input, shape index: {}]   ;;  %s2214_s3 = inlined_call_operand.vmem [shape: bf16[128,1024], index: 3, kind: input, shape index: {}]   ;;  %s2215_s4 = inlined_call_operand.vmem [shape: f32[1,1024], index: 4, kind: input, shape index: {}]   ;;  %s2216_s5 = inlined_call_operand.hbm [shape: bf16[1024,128], index: 5, kind: input, shape index: {}]   ;;  %s2217_s6 = inlined_call_operand.vmem [shape: f32[1,128], index: 6, kind: input, shape index: {}]   ;;  %s2218_s7 = inlined_call_operand.vmem [shape: f32[16,128], index: 7, kind: output, shape index: {}]  }
   0x1   :  { %14 = vsyncpa [#allocation6 + $0x1], 0  ;;  %s1878_s24 = smov 0   ;;  %s1880_s25 = smov 0  }
   0x2   :  { %s1882_s26 = smov 0   ;;  %s1884_s27 = smov 0  }
   0x3   :  { %s1886_s28 = smov 0   ;;  %s1888_s29 = smov 0  }
   0x4 LB: > { %s1323_s30 = sadd.s32 4294967295, %s1832_s29   ;;  %s29_s8 = sadd.s32 1, %s1828_s28  ;;  %s1832_s29 = sphi %s1888_s29, %s20_s29   ;;  %s1828_s28 = sphi %s1886_s28, %s2225_s28   ;;  %s1824_s27 = sphi %s1884_s27, %s2224_s27   ;;  %s1820_s26 = sphi %s1882_s26, %s2223_s26   ;;  %s1816_s25 = sphi %s1880_s25, %s2222_s25   ;;  %s1812_s24 = sphi %s1878_s24, %s2221_s24  }
   0x5   : > { %p30_p0 = scmp.ge.s32.totalorder %s29_s8, 2  ;;  %s107_s9 = sadd.s32 1, %s1820_s26 }
   0x6   : > { %p114_p1 = scmp.ne.s32.totalorder %s1820_s26, %s1816_s25  ;;  %p115_p2 = scmp.eq.s32.totalorder %s1832_s29, 0 }
   0x7   : > { %s2227_s8 = smov (%p30_p0, %s29_s8), 0  ;;  %p172_p4 = scmp.ne.s32.totalorder %s1816_s25, %s1812_s24 }
   0x8   : > { %p1914_p3 = por %p115_p2, %p114_p1  ;;  %s104_s11 = ssub.s32 %s1828_s28, %s2227_s8 }
   0x9   : > { %p173_p5 = scmp.eq.s32.totalorder %s1323_s30, 0  ;;  %p105_p6 = scmp.eq.s32.totalorder %s104_s11, 0 }
   0xa   : > { %p1326_p8 = scmp.ge.s32.totalorder %s1832_s29, 2 }
   0xb   : > { %p1921_p7 = por %p173_p5, %p172_p4 }
   0xc   : > { %s1926_s13 = scalar_select %p105_p6, %s1820_s26, %s107_s9  }
   0xd   : > { %257 = sbr.rel (%p1326_p8) target bundleno = 60 (0x3c), region = 32 }
  0x12   : > { %260 = sbr.rel (!%p1914_p3) target bundleno = 54 (0x36), region = 36  ;;  %s262_s14 = sand.u32 (%p1914_p3), 1, %s1820_s26  }
  0x13   : > { %s1603_s15 = sshll.u32 (%p1914_p3), %s1828_s28, 4  ;;  %s1327_s16 = sshll.u32 (%p1914_p3), %s262_s14, 8 }
  0x14   : > { %s1936_s19 = scalar_lea.vmem (%p1914_p3), %s2214_s3, %s1603_s15  ;;  %s1941_s20 = scalar_lea.vmem (%p1914_p3), [#allocation4], %s1327_s16 }
  0x15   : > { %v280_v0 = vld [vmem:[%s1936_s19] sm:$0xff] (%p1914_p3)  ;;  %v282_v1 = vld [vmem:[%s1936_s19 + $0x8] sm:$0xff] (%p1914_p3) }
  0x16   : > { %v284_v2 = vld [vmem:[%s1936_s19 + $0x20] sm:$0xff] (%p1914_p3)  ;;  %281 = vst [vmem:[%s1941_s20] sm:$0xff] (%p1914_p3), %v280_v0  ;;  %v286_v3 = vld [vmem:[%s1936_s19 + $0x28] sm:$0xff] (%p1914_p3) }
  0x17   : > { %283 = vst [vmem:[%s1941_s20 + $0x8] sm:$0xff] %v282_v1  ;;  %v288_v4 = vld [vmem:[%s1936_s19 + $0x40] sm:$0xff]  ;;  %v290_v5 = vld [vmem:[%s1936_s19 + $0x48] sm:$0xff] }
  0x18   : > { %285 = vst [vmem:[%s1941_s20 + $0x10] sm:$0xff] %v284_v2  ;;  %v292_v6 = vld [vmem:[%s1936_s19 + $0x60] sm:$0xff]  ;;  %v294_v7 = vld [vmem:[%s1936_s19 + $0x68] sm:$0xff] }
  0x19   : > { %287 = vst [vmem:[%s1941_s20 + $0x18] sm:$0xff] %v286_v3  ;;  %v296_v8 = vld [vmem:[%s1936_s19 + $0x80] sm:$0xff]  ;;  %v298_v9 = vld [vmem:[%s1936_s19 + $0x88] sm:$0xff] }
  0x1a   : > { %289 = vst [vmem:[%s1941_s20 + $0x20] sm:$0xff] %v288_v4  ;;  %v300_v10 = vld [vmem:[%s1936_s19 + $0xa0] sm:$0xff]  ;;  %v302_v11 = vld [vmem:[%s1936_s19 + $0xa8] sm:$0xff] }
  0x1b   : > { %291 = vst [vmem:[%s1941_s20 + $0x28] sm:$0xff] %v290_v5  ;;  %v304_v12 = vld [vmem:[%s1936_s19 + $0xc0] sm:$0xff]  ;;  %v306_v13 = vld [vmem:[%s1936_s19 + $0xc8] sm:$0xff] }
  0x1c   : > { %293 = vst [vmem:[%s1941_s20 + $0x30] sm:$0xff] %v292_v6  ;;  %v308_v14 = vld [vmem:[%s1936_s19 + $0xe0] sm:$0xff]  ;;  %v310_v15 = vld [vmem:[%s1936_s19 + $0xe8] sm:$0xff] }
  0x1d   : > { %295 = vst [vmem:[%s1941_s20 + $0x38] sm:$0xff] %v294_v7  ;;  %v312_v16 = vld [vmem:[%s1936_s19 + $0x100] sm:$0xff]  ;;  %v314_v17 = vld [vmem:[%s1936_s19 + $0x108] sm:$0xff] }
  0x1e   : > { %297 = vst [vmem:[%s1941_s20 + $0x40] sm:$0xff] %v296_v8  ;;  %v316_v18 = vld [vmem:[%s1936_s19 + $0x120] sm:$0xff]  ;;  %v318_v19 = vld [vmem:[%s1936_s19 + $0x128] sm:$0xff] }
  0x1f   : > { %299 = vst [vmem:[%s1941_s20 + $0x48] sm:$0xff] %v298_v9  ;;  %v320_v20 = vld [vmem:[%s1936_s19 + $0x140] sm:$0xff]  ;;  %v322_v21 = vld [vmem:[%s1936_s19 + $0x148] sm:$0xff] }
  0x20   : > { %301 = vst [vmem:[%s1941_s20 + $0x50] sm:$0xff] %v300_v10  ;;  %v324_v22 = vld [vmem:[%s1936_s19 + $0x160] sm:$0xff]  ;;  %v326_v23 = vld [vmem:[%s1936_s19 + $0x168] sm:$0xff] }
  0x21   : > { %303 = vst [vmem:[%s1941_s20 + $0x58] sm:$0xff] %v302_v11  ;;  %v328_v24 = vld [vmem:[%s1936_s19 + $0x180] sm:$0xff]  ;;  %v330_v25 = vld [vmem:[%s1936_s19 + $0x188] sm:$0xff] }
  0x22   : > { %305 = vst [vmem:[%s1941_s20 + $0x60] sm:$0xff] %v304_v12  ;;  %v332_v26 = vld [vmem:[%s1936_s19 + $0x1a0] sm:$0xff]  ;;  %v334_v27 = vld [vmem:[%s1936_s19 + $0x1a8] sm:$0xff] }
  0x23   : > { %307 = vst [vmem:[%s1941_s20 + $0x68] sm:$0xff] %v306_v13  ;;  %v336_v28 = vld [vmem:[%s1936_s19 + $0x1c0] sm:$0xff]  ;;  %v338_v29 = vld [vmem:[%s1936_s19 + $0x1c8] sm:$0xff] }
  0x24   : > { %309 = vst [vmem:[%s1941_s20 + $0x70] sm:$0xff] %v308_v14  ;;  %v340_v30 = vld [vmem:[%s1936_s19 + $0x1e0] sm:$0xff]  ;;  %v342_v31 = vld [vmem:[%s1936_s19 + $0x1e8] sm:$0xff] }
  0x25   : > { %311 = vst [vmem:[%s1941_s20 + $0x78] sm:$0xff] %v310_v15 }
  0x26   : > { %313 = vst [vmem:[%s1941_s20 + $0x80] sm:$0xff] %v312_v16 }
  0x27   : > { %315 = vst [vmem:[%s1941_s20 + $0x88] sm:$0xff] %v314_v17 }
  0x28   : > { %317 = vst [vmem:[%s1941_s20 + $0x90] sm:$0xff] %v316_v18 }
  0x29   : > { %319 = vst [vmem:[%s1941_s20 + $0x98] sm:$0xff] %v318_v19 }
  0x2a   : > { %321 = vst [vmem:[%s1941_s20 + $0xa0] sm:$0xff] %v320_v20 }
  0x2b   : > { %323 = vst [vmem:[%s1941_s20 + $0xa8] sm:$0xff] %v322_v21 }
  0x2c   : > { %325 = vst [vmem:[%s1941_s20 + $0xb0] sm:$0xff] %v324_v22 }
  0x2d   : > { %327 = vst [vmem:[%s1941_s20 + $0xb8] sm:$0xff] %v326_v23 }
  0x2e   : > { %329 = vst [vmem:[%s1941_s20 + $0xc0] sm:$0xff] %v328_v24 }
  0x2f   : > { %331 = vst [vmem:[%s1941_s20 + $0xc8] sm:$0xff] %v330_v25 }
  0x30   : > { %333 = vst [vmem:[%s1941_s20 + $0xd0] sm:$0xff] %v332_v26 }
  0x31   : > { %335 = vst [vmem:[%s1941_s20 + $0xd8] sm:$0xff] %v334_v27 }
  0x32   : > { %337 = vst [vmem:[%s1941_s20 + $0xe0] sm:$0xff] %v336_v28 }
  0x33   : > { %339 = vst [vmem:[%s1941_s20 + $0xe8] sm:$0xff] %v338_v29 }
  0x34   : > { %341 = vst [vmem:[%s1941_s20 + $0xf0] sm:$0xff] %v340_v30 }
  0x35   : > { %343 = vst [vmem:[%s1941_s20 + $0xf8] sm:$0xff] %v342_v31 }
  0x36 PF: > { %s358_s21 = sand.u32 1, %s1820_s26   ;;  %s1604_s22 = sshll.u32 %s1828_s28, 8 }
  0x37   : > { %s1330_s23 = sshll.u32 %s358_s21, 8  ;;  %s367_s9 = scalar_lea.hbm %s2216_s5, %s1604_s22 }
  0x38   : > { %s368_s11 = sshll.u32 %s367_s9, 4  ;;  %s362_s14 = scalar_lea.vmem [#allocation5], %s1330_s23  ;;  %s369_s11 = int_to_ptr.hbm [resolvable:$true] %s368_s11 }
  0x39   : > { %s370_s15 = sshll.u32 %s362_s14, 4  ;;  %s359_s16 = scalar_lea.sflag [#allocation6], %s358_s21  ;;  %s371_s15 = int_to_ptr.vmem [resolvable:$true] %s370_s15 }
  0x3a   : > { %s1834_s17 = smov 64   ;;  %s1835_s18 = smov 4  }
  0x3b   : > { %1675 = dma.hbm_to_vmem [thread:$0]  (%p1914_p3), %s369_s11, 4096, %s371_s15, %s359_s16, %s1834_s17, %s1834_s17, %s1835_s18  }
  0x3c PF: > { %p1333_p9 = scmp.ge.s32.totalorder %s1832_s29, 1  ;;  %p378_p10 = scmp.lt.s32.totalorder %s1832_s29, 3 }
  0x3e   : > { %p379_p11 = pnand %p1333_p9, %p378_p10 }
  0x3f   : > { %s385_s19 = sand.u32 (!%p379_p11), 1, %s1816_s25  }
  0x40   : > { %382 = sbr.rel (%p379_p11) target bundleno = 714 (0x2ca), region = 67  ;;  %s1334_s20 = sshll.u32 (!%p379_p11), %s385_s19, 8 }
  0x41   : > { %s2014_s22 = scalar_lea.vmem (!%p379_p11), [#allocation4], %s1334_s20  ;;  %s392_s23 = scalar_lea.sflag (!%p379_p11), [#allocation6], %s385_s19 }
  0x42   : > { %s2016_s24 = scalar_lea.vmem (!%p379_p11), [#allocation5], %s1334_s20 }
  0x45   : > { %1807 = dma.done.wait (%p1921_p7), %s392_s23, 4096  }
  0x46   : > { %1809 = vsyncadd (%p1921_p7), %s392_s23, 4294963200  ;;  %s1336_s10 = sshll.u32 %s1824_s27, 2  ;;  %p1337_p13 = scmp.ne.s32.totalorder %s1824_s27, 0 }
  0x47   : > { %p448_p12 = scmp.lt.s32.totalorder %s1336_s10, 7 }
  0x48   : > { %462 = sbr.rel (%p1337_p13) target bundleno = 355 (0x163), region = 79 }
  0x49   : > { %s2229_s10 = smov (!%p448_p12, %s1336_s10), 7 }
  0x4a   : > { %s450_s9 = scalar_lea.vmem %s2215_s4, %s2229_s10 }
  0x4d   : > { %v463_v32 = vld [vmem:[%s2211_s0] sm:$0xff]  ;;  %v464_v33 = vld [vmem:[%s2211_s0 + $0x8] sm:$0xff]  ;;  %v1836_v34 = vmov 128.0   ;;  %v1837_v52 = vmov 0.0  }
  0x4e   : > { %465 = vadd.xlane.f32.xlu0 %v463_v32  ;;  %1731 = vrcp.f32 %v1836_v34  ;;  %528 = vst [vmem:[#allocation3] sm:$0xff] %v1837_v52  ;;  %v1729_v4 = vld [vmem:[%s2212_s1] ss:$0 sm:$0xff] }
  0x4f   : > { %529 = vst [vmem:[#allocation3 + $0x8] sm:$0xff] %v1837_v52  ;;  %v1730_v8 = vld [vmem:[%s2213_s2] ss:$0 sm:$0xff] }
  0x54   : > { %v1732_v35 = vpop.eup %1731 }
  0x55   : > { %v470_v36 = vmul.f32 128.0, %v1732_v35  ;;  %vm474_vm0 = vweird.f32 %v1732_v35 }
  0x56   : > { %467 = vadd.xlane.f32.xlu0 %v464_v33 }
  0x57   : > { %v471_v37 = vsub.f32 1.0, %v470_v36 }
  0x59   : > { %v472_v38 = vmul.f32 %v1732_v35, %v471_v37 }
  0x5b   : > { %v473_v39 = vadd.f32 %v1732_v35, %v472_v38 }
  0x5d   : > { %v475_v40 = vsel %vm474_vm0, %v1732_v35, %v473_v39 }
  0xc1   : > { %v466_v41 = vpop.xlane.xlu0 %465 }
  0xc2   : > { %v476_v42 = vmul.f32 %v475_v40, %v466_v41 }
  0xc4   : > { %v478_v43 = vsub.f32 %v463_v32, %v476_v42 }
  0xc6   : > { %v480_v44 = vmul.f32 %v478_v43, %v478_v43 }
  0xc8   : > { %482 = vadd.xlane.f32.xlu1 %v480_v44 }
  0xc9   : > { %v468_v45 = vpop.xlane.xlu0 %467 }
  0xca   : > { %v477_v46 = vmul.f32 %v475_v40, %v468_v45 }
  0xcc   : > { %v479_v47 = vsub.f32 %v464_v33, %v477_v46 }
  0xce   : > { %v481_v48 = vmul.f32 %v479_v47, %v479_v47 }
  0xd0   : > { %484 = vadd.xlane.f32.xlu1 %v481_v48 }
 0x13b   : > { %v483_v49 = vpop.xlane.xlu1 %482 }
 0x13c   : > { %v486_v50 = vmul.f32 %v483_v49, %v475_v40 }
 0x13e   : > { %v488_v51 = vadd.f32 1e-06, %v486_v50 }
 0x140   : > { %1733 = vrsqrt.f32 %v488_v51  ;;  %vm496_vm2 = vweird.f32 %v488_v51 }
 0x143   : > { %v485_v53 = vpop.xlane.xlu1 %484 }
 0x144   : > { %v487_v54 = vmul.f32 %v485_v53, %v475_v40 }
 0x146   : > { %v1734_v55 = vpop.eup %1733  ;;  %v489_v56 = vadd.f32 1e-06, %v487_v54 }
 0x147   : > { %v491_v57 = vmul.f32 %v1734_v55, %v488_v51  ;;  %vm497_vm1 = vweird.f32 %v1734_v55 }
 0x148   : > { %1735 = vrsqrt.f32 %v489_v56  ;;  %vm498_vm3 = vmor %vm496_vm2, %vm497_vm1  ;;  %vm506_vm5 = vweird.f32 %v489_v56 }
 0x149   : > { %v492_v58 = vmul.f32 %v1734_v55, %v491_v57 }
 0x14b   : > { %v493_v59 = vmul.f32 0.5, %v492_v58 }
 0x14d   : > { %v494_v60 = vsub.f32 1.5, %v493_v59 }
 0x14e   : > { %v1736_v61 = vpop.eup %1735 }
 0x14f   : > { %v495_v62 = vmul.f32 %v1734_v55, %v494_v60  ;;  %v501_v63 = vmul.f32 %v1736_v61, %v489_v56  ;;  %vm507_vm4 = vweird.f32 %v1736_v61 }
 0x150   : > { %vm508_vm6 = vmor %vm506_vm5, %vm507_vm4 }
 0x151   : > { %v502_v0 = vmul.f32 %v1736_v61, %v501_v63  ;;  %v499_v1 = vsel %vm498_vm3, %v1734_v55, %v495_v62 }
 0x152   : > { %v510_v5 = vmul.f32 %v499_v1, %v478_v43 }
 0x153   : > { %v503_v2 = vmul.f32 0.5, %v502_v0 }
 0x154   : > { %v516_v9 = vmul.f32 %v1729_v4, %v510_v5 }
 0x155   : > { %v504_v3 = vsub.f32 1.5, %v503_v2 }
 0x156   : > { %v522_v12 = vadd.f32 %v1730_v8, %v516_v9 }
 0x157   : > { %v505_v6 = vmul.f32 %v1736_v61, %v504_v3 }
 0x159   : > { %v509_v7 = vsel %vm508_vm6, %v1736_v61, %v505_v6 }
 0x15a   : > { %v511_v10 = vmul.f32 %v509_v7, %v479_v47 }
 0x15c   : > { %v517_v11 = vmul.f32 %v1729_v4, %v511_v10 }
 0x15e   : > { %v523_v13 = vadd.f32 %v1730_v8, %v517_v11 }
 0x160   : > { %v1673_v14 = vpack.c.bf16 %v523_v13, %v522_v12 }
 0x162   : > { %1674 = vst [vmem:[#allocation2] sm:$0xff] %v1673_v14  }
 0x163 PF: > { %v1456_v15 = vld [vmem:[%s2014_s22 + $0xe0] sm:$0xf]  ;;  %v1636_v16 = vld [vmem:[%s2014_s22 + $0xec] sm:$0xf0]  ;;  %v1634_v17 = vld [vmem:[%s2014_s22 + $0xe4] sm:$0xf] }
 0x164   : > { %v1457_v18 = vor.u32 %v1636_v16, %v1456_v15  ;;  %v1458_v19 = vld [vmem:[%s2014_s22 + $0xf0] sm:$0xf0]  ;;  %v1464_v20 = vld [vmem:[%s2014_s22 + $0xe8] sm:$0xf]  ;;  %v1637_v21 = vld [vmem:[%s2014_s22 + $0xf4] sm:$0xf0] }
 0x165   : > { %v1461_v22 = vor.u32 %v1634_v17, %v1458_v19  ;;  %v1465_v23 = vor.u32 %v1637_v21, %v1464_v20  ;;  %v1635_v24 = vld [vmem:[%s2014_s22 + $0xec] sm:$0xf]  ;;  %v1466_v25 = vld [vmem:[%s2014_s22 + $0xf8] sm:$0xf0]  ;;  %v1440_v26 = vld [vmem:[%s2014_s22 + $0xc0] sm:$0xf] }
 0x166   : > { %740 = vmatpush.bf16.msra.mxu0 %v1457_v18  ;;  %v1469_v27 = vor.u32 %v1635_v24, %v1466_v25  ;;  %v1632_v28 = vld [vmem:[%s2014_s22 + $0xcc] sm:$0xf0]  ;;  %v1630_v29 = vld [vmem:[%s2014_s22 + $0xc4] sm:$0xf]  ;;  %v1442_v30 = vld [vmem:[%s2014_s22 + $0xd0] sm:$0xf0] }
 0x167   : > { %754 = vmatpush.bf16.msra.mxu1 %v1461_v22  ;;  %768 = vmatpush.bf16.msra.mxu2 %v1465_v23  ;;  %v1441_v31 = vor.u32 %v1632_v28, %v1440_v26  ;;  %v1445_v32 = vor.u32 %v1630_v29, %v1442_v30  ;;  %v1448_v33 = vld [vmem:[%s2014_s22 + $0xc8] sm:$0xf]  ;;  %v1633_v34 = vld [vmem:[%s2014_s22 + $0xd4] sm:$0xf0]  ;;  %v1631_v35 = vld [vmem:[%s2014_s22 + $0xcc] sm:$0xf] }
 0x168   : > { %782 = vmatpush.bf16.msra.mxu3 %v1469_v27  ;;  %v1449_v36 = vor.u32 %v1633_v34, %v1448_v33  ;;  %v1450_v37 = vld [vmem:[%s2014_s22 + $0xd8] sm:$0xf0]  ;;  %v1424_v38 = vld [vmem:[%s2014_s22 + $0xa0] sm:$0xf]  ;;  %v1628_v39 = vld [vmem:[%s2014_s22 + $0xac] sm:$0xf0] }
 0x169   : > { %v1453_v40 = vor.u32 %v1631_v35, %v1450_v37  ;;  %v1626_v41 = vld [vmem:[%s2014_s22 + $0xa4] sm:$0xf]  ;;  %v1426_v42 = vld [vmem:[%s2014_s22 + $0xb0] sm:$0xf0]  ;;  %v1432_v43 = vld [vmem:[%s2014_s22 + $0xa8] sm:$0xf]  ;;  %v1425_v44 = vor.u32 %v1628_v39, %v1424_v38 }
 0x16a   : > { %741 = vmatpush.bf16.msra.mxu0 %v1441_v31  ;;  %v1629_v45 = vld [vmem:[%s2014_s22 + $0xb4] sm:$0xf0]  ;;  %v1627_v46 = vld [vmem:[%s2014_s22 + $0xac] sm:$0xf]  ;;  %v1434_v47 = vld [vmem:[%s2014_s22 + $0xb8] sm:$0xf0]  ;;  %v1429_v48 = vor.u32 %v1626_v41, %v1426_v42 }
 0x16b   : > { %755 = vmatpush.bf16.msra.mxu1 %v1445_v32  ;;  %769 = vmatpush.bf16.msra.mxu2 %v1449_v36  ;;  %v1433_v49 = vor.u32 %v1629_v45, %v1432_v43  ;;  %v1408_v50 = vld [vmem:[%s2014_s22 + $0x80] sm:$0xf]  ;;  %v1624_v51 = vld [vmem:[%s2014_s22 + $0x8c] sm:$0xf0]  ;;  %v1622_v52 = vld [vmem:[%s2014_s22 + $0x84] sm:$0xf]  ;;  %v1437_v53 = vor.u32 %v1627_v46, %v1434_v47 }
 0x16c   : > { %783 = vmatpush.bf16.msra.mxu3 %v1453_v40  ;;  %v1410_v54 = vld [vmem:[%s2014_s22 + $0x90] sm:$0xf0]  ;;  %v1416_v55 = vld [vmem:[%s2014_s22 + $0x88] sm:$0xf]  ;;  %v1625_v56 = vld [vmem:[%s2014_s22 + $0x94] sm:$0xf0]  ;;  %v1409_v59 = vor.u32 %v1624_v51, %v1408_v50 }
 0x16d   : > { %v1623_v57 = vld [vmem:[%s2014_s22 + $0x8c] sm:$0xf]  ;;  %v1418_v58 = vld [vmem:[%s2014_s22 + $0x98] sm:$0xf0]  ;;  %v1413_v60 = vor.u32 %v1622_v52, %v1410_v54  ;;  %v1417_v61 = vor.u32 %v1625_v56, %v1416_v55  ;;  %v1392_v62 = vld [vmem:[%s2014_s22 + $0x60] sm:$0xf] }
 0x16e   : > { %742 = vmatpush.bf16.msra.mxu0 %v1425_v44  ;;  %v1620_v63 = vld [vmem:[%s2014_s22 + $0x6c] sm:$0xf0]  ;;  %v1618_v0 = vld [vmem:[%s2014_s22 + $0x64] sm:$0xf]  ;;  %v1421_v1 = vor.u32 %v1623_v57, %v1418_v58  ;;  %v1394_v2 = vld [vmem:[%s2014_s22 + $0x70] sm:$0xf0] }
 0x16f   : > { %756 = vmatpush.bf16.msra.mxu1 %v1429_v48  ;;  %770 = vmatpush.bf16.msra.mxu2 %v1433_v49  ;;  %v1400_v3 = vld [vmem:[%s2014_s22 + $0x68] sm:$0xf]  ;;  %v1621_v4 = vld [vmem:[%s2014_s22 + $0x74] sm:$0xf0]  ;;  %v1619_v5 = vld [vmem:[%s2014_s22 + $0x6c] sm:$0xf]  ;;  %v1393_v7 = vor.u32 %v1620_v63, %v1392_v62  ;;  %v1397_v8 = vor.u32 %v1618_v0, %v1394_v2 }
 0x170   : > { %784 = vmatpush.bf16.msra.mxu3 %v1437_v53  ;;  %v1402_v6 = vld [vmem:[%s2014_s22 + $0x78] sm:$0xf0]  ;;  %v1401_v9 = vor.u32 %v1621_v4, %v1400_v3  ;;  %v1376_v10 = vld [vmem:[%s2014_s22 + $0x40] sm:$0xf]  ;;  %v1616_v11 = vld [vmem:[%s2014_s22 + $0x4c] sm:$0xf0] }
 0x171   : > { %v1614_v12 = vld [vmem:[%s2014_s22 + $0x44] sm:$0xf]  ;;  %v1405_v13 = vor.u32 %v1619_v5, %v1402_v6  ;;  %v1378_v14 = vld [vmem:[%s2014_s22 + $0x50] sm:$0xf0]  ;;  %v1384_v15 = vld [vmem:[%s2014_s22 + $0x48] sm:$0xf]  ;;  %v1377_v19 = vor.u32 %v1616_v11, %v1376_v10 }
 0x172   : > { %743 = vmatpush.bf16.msra.mxu0 %v1409_v59  ;;  %v1617_v16 = vld [vmem:[%s2014_s22 + $0x54] sm:$0xf0]  ;;  %v1615_v17 = vld [vmem:[%s2014_s22 + $0x4c] sm:$0xf]  ;;  %v1386_v18 = vld [vmem:[%s2014_s22 + $0x58] sm:$0xf0]  ;;  %v1381_v20 = vor.u32 %v1614_v12, %v1378_v14 }
 0x173   : > { %757 = vmatpush.bf16.msra.mxu1 %v1413_v60  ;;  %771 = vmatpush.bf16.msra.mxu2 %v1417_v61  ;;  %v1385_v21 = vor.u32 %v1617_v16, %v1384_v15  ;;  %v1360_v22 = vld [vmem:[%s2014_s22 + $0x20] sm:$0xf]  ;;  %v1612_v23 = vld [vmem:[%s2014_s22 + $0x2c] sm:$0xf0]  ;;  %v1610_v24 = vld [vmem:[%s2014_s22 + $0x24] sm:$0xf]  ;;  %v1389_v25 = vor.u32 %v1615_v17, %v1386_v18 }
 0x174   : > { %785 = vmatpush.bf16.msra.mxu3 %v1421_v1  ;;  %v1362_v26 = vld [vmem:[%s2014_s22 + $0x30] sm:$0xf0]  ;;  %v1368_v27 = vld [vmem:[%s2014_s22 + $0x28] sm:$0xf]  ;;  %v1613_v28 = vld [vmem:[%s2014_s22 + $0x34] sm:$0xf0]  ;;  %v1361_v31 = vor.u32 %v1612_v23, %v1360_v22 }
 0x175   : > { %v1611_v29 = vld [vmem:[%s2014_s22 + $0x2c] sm:$0xf]  ;;  %v1370_v30 = vld [vmem:[%s2014_s22 + $0x38] sm:$0xf0]  ;;  %v1365_v32 = vor.u32 %v1610_v24, %v1362_v26  ;;  %v1369_v33 = vor.u32 %v1613_v28, %v1368_v27  ;;  %v1344_v34 = vld [vmem:[%s2014_s22] sm:$0xf] }
 0x176   : > { %744 = vmatpush.bf16.msra.mxu0 %v1393_v7  ;;  %v1608_v35 = vld [vmem:[%s2014_s22 + $0xc] sm:$0xf0]  ;;  %v1606_v36 = vld [vmem:[%s2014_s22 + $0x4] sm:$0xf]  ;;  %v1373_v37 = vor.u32 %v1611_v29, %v1370_v30  ;;  %v1346_v38 = vld [vmem:[%s2014_s22 + $0x10] sm:$0xf0] }
 0x177   : > { %758 = vmatpush.bf16.msra.mxu1 %v1397_v8  ;;  %772 = vmatpush.bf16.msra.mxu2 %v1401_v9  ;;  %v1352_v39 = vld [vmem:[%s2014_s22 + $0x8] sm:$0xf]  ;;  %v1609_v40 = vld [vmem:[%s2014_s22 + $0x14] sm:$0xf0]  ;;  %v1607_v41 = vld [vmem:[%s2014_s22 + $0xc] sm:$0xf]  ;;  %v1345_v43 = vor.u32 %v1608_v35, %v1344_v34  ;;  %v1349_v44 = vor.u32 %v1606_v36, %v1346_v38 }
 0x178   : > { %786 = vmatpush.bf16.msra.mxu3 %v1405_v13  ;;  %v1354_v42 = vld [vmem:[%s2014_s22 + $0x18] sm:$0xf0]  ;;  %v1353_v45 = vor.u32 %v1609_v40, %v1352_v39  ;;  %v1605_v47 = vld [vmem:[#allocation2] sm:$0xff]  ;;  %v1644_v50 = vld [vmem:[%s2016_s24 + $0x30] sm:$0xff]  ;;  %p1598_p0 = scmp.ne.s32.totalorder %s1824_s27, 1 }
 0x179   : > { %v1357_v46 = vor.u32 %v1607_v41, %v1354_v42  ;;  %v1645_v48 = vld [vmem:[%s2016_s24 + $0x38] sm:$0xff]  ;;  %v1652_v51 = vld [vmem:[%s2016_s24 + $0x70] sm:$0xff]  ;;  %v1643_v54 = vld [vmem:[%s2016_s24 + $0x28] sm:$0xff] }
 0x17a   : > { %745 = vmatpush.bf16.msra.mxu0 %v1377_v19  ;;  %v1653_v49 = vld [vmem:[%s2016_s24 + $0x78] sm:$0xff]  ;;  %v1651_v55 = vld [vmem:[%s2016_s24 + $0x68] sm:$0xff]  ;;  %v1660_v56 = vld [vmem:[%s2016_s24 + $0xb0] sm:$0xff] }
 0x17b   : > { %759 = vmatpush.bf16.msra.mxu1 %v1381_v20  ;;  %773 = vmatpush.bf16.msra.mxu2 %v1385_v21  ;;  %v1661_v52 = vld [vmem:[%s2016_s24 + $0xb8] sm:$0xff]  ;;  %v1668_v57 = vld [vmem:[%s2016_s24 + $0xf0] sm:$0xff]  ;;  %v1642_v58 = vld [vmem:[%s2016_s24 + $0x20] sm:$0xff] }
 0x17c   : > { %787 = vmatpush.bf16.msra.mxu3 %v1389_v25  ;;  %v1669_v53 = vld [vmem:[%s2016_s24 + $0xf8] sm:$0xff]  ;;  %v1650_v59 = vld [vmem:[%s2016_s24 + $0x60] sm:$0xff]  ;;  %v1659_v60 = vld [vmem:[%s2016_s24 + $0xa8] sm:$0xff] }
 0x17d   : > { %v1667_v61 = vld [vmem:[%s2016_s24 + $0xe8] sm:$0xff]  ;;  %v1641_v62 = vld [vmem:[%s2016_s24 + $0x18] sm:$0xff]  ;;  %v1658_v0 = vld [vmem:[%s2016_s24 + $0xa0] sm:$0xff] }
 0x17e   : > { %746 = vmatpush.bf16.msra.mxu0 %v1361_v31  ;;  %v1649_v63 = vld [vmem:[%s2016_s24 + $0x58] sm:$0xff]  ;;  %v1666_v1 = vld [vmem:[%s2016_s24 + $0xe0] sm:$0xff]  ;;  %v1640_v2 = vld [vmem:[%s2016_s24 + $0x10] sm:$0xff] }
 0x17f   : > { %760 = vmatpush.bf16.msra.mxu1 %v1365_v32  ;;  %774 = vmatpush.bf16.msra.mxu2 %v1369_v33  ;;  %v1648_v3 = vld [vmem:[%s2016_s24 + $0x50] sm:$0xff]  ;;  %v1657_v4 = vld [vmem:[%s2016_s24 + $0x98] sm:$0xff]  ;;  %v1639_v6 = vld [vmem:[%s2016_s24 + $0x8] sm:$0xff] }
 0x180   : > { %788 = vmatpush.bf16.msra.mxu3 %v1373_v37  ;;  %v1665_v5 = vld [vmem:[%s2016_s24 + $0xd8] sm:$0xff]  ;;  %v1647_v7 = vld [vmem:[%s2016_s24 + $0x48] sm:$0xff]  ;;  %v1656_v9 = vld [vmem:[%s2016_s24 + $0x90] sm:$0xff] }
 0x181   : > { %v2135_v8 = vld [vmem:[%s450_s9] sm:$0xf]  ;;  %v1664_v10 = vld [vmem:[%s2016_s24 + $0xd0] sm:$0xff]  ;;  %v1638_v12 = vld [vmem:[%s2016_s24] sm:$0xff] }
 0x182   : > { %747 = vmatpush.bf16.msra.mxu0 %v1345_v43  ;;  %v566_v11 = vperm.slane %v2135_v8, 0  ;;  %v1646_v13 = vld [vmem:[%s2016_s24 + $0x40] sm:$0xff]  ;;  %v567_v14 = vperm.slane %v2135_v8, 1  ;;  %v1655_v15 = vld [vmem:[%s2016_s24 + $0x88] sm:$0xff]  ;;  %v568_v25 = vperm.slane %v2135_v8, 2  ;;  %v569_v27 = vperm.slane %v2135_v8, 3 }
 0x183   : > { %761 = vmatpush.bf16.msra.mxu1 %v1349_v44  ;;  %775 = vmatpush.bf16.msra.mxu2 %v1353_v45  ;;  %v1663_v16 = vld [vmem:[%s2016_s24 + $0xc8] sm:$0xff]  ;;  %v1654_v22 = vld [vmem:[%s2016_s24 + $0x80] sm:$0xff] }
 0x184   : > { %789 = vmatpush.bf16.msra.mxu3 %v1357_v46  ;;  %v1662_v23 = vld [vmem:[%s2016_s24 + $0xc0] sm:$0xff] }
 0x185   : > { %748 = vmatmul.bf16.vlgmr.msra.gmra.mxu0 %v1605_v47 }
 0x186   : > { %762 = vmatmul.bf16.vlgmr.msra.gmra.mxu1 %v1605_v47  ;;  %776 = vmatmul.bf16.vlgmr.msra.gmra.mxu2 %v1605_v47 }
 0x187   : > { %790 = vmatmul.bf16.vlgmr.msra.gmra.mxu3 %v1605_v47  ;;  %1130 = vmatpush.bf16.msrb.mxu0 %v1645_v48 }
 0x188   : > { %1144 = vmatpush.bf16.msrb.mxu1 %v1653_v49  ;;  %1158 = vmatpush.bf16.msrb.mxu2 %v1661_v52 }
 0x189   : > { %1172 = vmatpush.bf16.msrb.mxu3 %v1669_v53 }
 0x18b   : > { %1131 = vmatpush.bf16.msrb.mxu0 %v1644_v50 }
 0x18c   : > { %1145 = vmatpush.bf16.msrb.mxu1 %v1652_v51  ;;  %1159 = vmatpush.bf16.msrb.mxu2 %v1660_v56 }
 0x18d   : > { %1173 = vmatpush.bf16.msrb.mxu3 %v1668_v57 }
 0x18f   : > { %1132 = vmatpush.bf16.msrb.mxu0 %v1643_v54 }
 0x190   : > { %1146 = vmatpush.bf16.msrb.mxu1 %v1651_v55  ;;  %1160 = vmatpush.bf16.msrb.mxu2 %v1659_v60 }
 0x191   : > { %1174 = vmatpush.bf16.msrb.mxu3 %v1667_v61 }
 0x193   : > { %1133 = vmatpush.bf16.msrb.mxu0 %v1642_v58 }
 0x194   : > { %1147 = vmatpush.bf16.msrb.mxu1 %v1650_v59  ;;  %1161 = vmatpush.bf16.msrb.mxu2 %v1658_v0 }
 0x195   : > { %1175 = vmatpush.bf16.msrb.mxu3 %v1666_v1 }
 0x197   : > { %1134 = vmatpush.bf16.msrb.mxu0 %v1641_v62 }
 0x198   : > { %1148 = vmatpush.bf16.msrb.mxu1 %v1649_v63  ;;  %1162 = vmatpush.bf16.msrb.mxu2 %v1657_v4 }
 0x199   : > { %1176 = vmatpush.bf16.msrb.mxu3 %v1665_v5 }
 0x19b   : > { %1135 = vmatpush.bf16.msrb.mxu0 %v1640_v2 }
 0x19c   : > { %1149 = vmatpush.bf16.msrb.mxu1 %v1648_v3  ;;  %1163 = vmatpush.bf16.msrb.mxu2 %v1656_v9 }
 0x19d   : > { %1177 = vmatpush.bf16.msrb.mxu3 %v1664_v10 }
 0x19f   : > { %1136 = vmatpush.bf16.msrb.mxu0 %v1639_v6 }
 0x1a0   : > { %1150 = vmatpush.bf16.msrb.mxu1 %v1647_v7  ;;  %1164 = vmatpush.bf16.msrb.mxu2 %v1655_v15 }
 0x1a1   : > { %1178 = vmatpush.bf16.msrb.mxu3 %v1663_v16 }
 0x1a3   : > { %1137 = vmatpush.bf16.msrb.mxu0 %v1638_v12 }
 0x1a4   : > { %1151 = vmatpush.bf16.msrb.mxu1 %v1646_v13  ;;  %1165 = vmatpush.bf16.msrb.mxu2 %v1654_v22 }
 0x1a5   : > { %1179 = vmatpush.bf16.msrb.mxu3 %v1662_v23 }
 0x202   : > { %v749_v17 = vpop.f32.mrf.mxu0 }
 0x203   : > { %v2145_v18 = vadd.f32 %v749_v17, %v566_v11  ;;  %v763_v19 = vpop.f32.mrf.mxu1 }
 0x204   : > { %v2147_v20 = vadd.f32 %v763_v19, %v567_v14 }
 0x205   : > { %v804_v21 = vmul.f32 0.044715, %v2145_v18 }
 0x206   : > { %v805_v24 = vmul.f32 0.044715, %v2147_v20 }
 0x207   : > { %v812_v26 = vmul.f32 %v804_v21, %v2145_v18  ;;  %v796_v21 = vmul.f32 0.5, %v2145_v18 }
 0x208   : > { %v813_v28 = vmul.f32 %v805_v24, %v2147_v20  ;;  %v797_v24 = vmul.f32 0.5, %v2147_v20 }
 0x209   : > { %v777_v29 = vpop.f32.mrf.mxu2  ;;  %v820_v30 = vmul.f32 %v812_v26, %v2145_v18 }
 0x20a   : > { %v2158_v31 = vadd.f32 %v777_v29, %v568_v25  ;;  %v791_v32 = vpop.f32.mrf.mxu3  ;;  %v751_v33 = vpop.f32.mrf.mxu0  ;;  %v821_v34 = vmul.f32 %v813_v28, %v2147_v20 }
 0x20b   : > { %v2161_v35 = vadd.f32 %v791_v32, %v569_v27  ;;  %v752_v36 = vadd.f32 %v751_v33, %v566_v11  ;;  %v765_v37 = vpop.f32.mrf.mxu1  ;;  %v828_v38 = vadd.f32 %v820_v30, %v2145_v18 }
 0x20c   : > { %v806_v39 = vmul.f32 0.044715, %v2158_v31  ;;  %v766_v40 = vadd.f32 %v765_v37, %v567_v14  ;;  %v829_v41 = vadd.f32 %v821_v34, %v2147_v20 }
 0x20d   : > { %v807_v42 = vmul.f32 0.044715, %v2161_v35  ;;  %v808_v43 = vmul.f32 0.044715, %v752_v36  ;;  %v836_v48 = vmul.f32 0.7978846, %v828_v38 }
 0x20e   : > { %v814_v44 = vmul.f32 %v806_v39, %v2158_v31  ;;  %v809_v45 = vmul.f32 0.044715, %v766_v40  ;;  %v837_v50 = vmul.f32 0.7978846, %v829_v41  ;;  %v800_v22 = vmul.f32 0.5, %v752_v36 }
 0x20f   : > { %v815_v46 = vmul.f32 %v807_v42, %v2161_v35  ;;  %v816_v47 = vmul.f32 %v808_v43, %v752_v36  ;;  %1737 = vtanh.f32 %v836_v48  ;;  %v798_v41 = vmul.f32 0.5, %v2158_v31 }
 0x210   : > { %v817_v49 = vmul.f32 %v809_v45, %v766_v40  ;;  %v822_v51 = vmul.f32 %v814_v44, %v2158_v31  ;;  %1739 = vtanh.f32 %v837_v50  ;;  %v799_v42 = vmul.f32 0.5, %v2161_v35 }
 0x211   : > { %v779_v52 = vpop.f32.mrf.mxu2  ;;  %v824_v53 = vmul.f32 %v816_v47, %v752_v36  ;;  %v823_v54 = vmul.f32 %v815_v46, %v2161_v35 }
 0x212   : > { %v780_v55 = vadd.f32 %v779_v52, %v568_v25  ;;  %v793_v56 = vpop.f32.mrf.mxu3  ;;  %v825_v57 = vmul.f32 %v817_v49, %v766_v40  ;;  %v830_v58 = vadd.f32 %v822_v51, %v2158_v31  ;;  %v801_v25 = vmul.f32 0.5, %v766_v40 }
 0x213   : > { %v794_v59 = vadd.f32 %v793_v56, %v569_v27  ;;  %v832_v60 = vadd.f32 %v824_v53, %v752_v36  ;;  %v831_v61 = vadd.f32 %v823_v54, %v2161_v35 }
 0x214   : > { %v810_v62 = vmul.f32 0.044715, %v780_v55  ;;  %v833_v63 = vadd.f32 %v825_v57, %v766_v40  ;;  %v838_v4 = vmul.f32 0.7978846, %v830_v58  ;;  %v802_v20 = vmul.f32 0.5, %v780_v55 }
 0x215   : > { %v811_v0 = vmul.f32 0.044715, %v794_v59  ;;  %v840_v1 = vmul.f32 0.7978846, %v832_v60  ;;  %v839_v6 = vmul.f32 0.7978846, %v831_v61  ;;  %v1738_v8 = vpop.eup %1737 }
 0x216   : > { %v818_v2 = vmul.f32 %v810_v62, %v780_v55  ;;  %v841_v3 = vmul.f32 0.7978846, %v833_v63  ;;  %v1740_v10 = vpop.eup %1739  ;;  %v852_v13 = vadd.f32 1.0, %v1738_v8  ;;  %v803_v43 = vmul.f32 0.5, %v794_v59  ;;  %v869_v63 = vld [vmem:[#allocation3 + $0x8] sm:$0xff] }
 0x217   : > { %v819_v5 = vmul.f32 %v811_v0, %v794_v59  ;;  %1741 = vtanh.f32 %v840_v1  ;;  %v853_v16 = vadd.f32 1.0, %v1740_v10 }
 0x218   : > { %1743 = vtanh.f32 %v841_v3  ;;  %v826_v7 = vmul.f32 %v818_v2, %v780_v55  ;;  %v860_v28 = vmul.f32 %v852_v13, %v796_v21 }
 0x219   : > { %v827_v9 = vmul.f32 %v819_v5, %v794_v59  ;;  %1745 = vtanh.f32 %v838_v4  ;;  %v861_v32 = vmul.f32 %v853_v16, %v797_v24 }
 0x21a   : > { %v834_v11 = vadd.f32 %v826_v7, %v780_v55  ;;  %1747 = vtanh.f32 %v839_v6  ;;  %v868_v55 = vld [vmem:[#allocation3] sm:$0xff] }
 0x21b   : > { %v835_v12 = vadd.f32 %v827_v9, %v794_v59 }
 0x21c   : > { %v842_v14 = vmul.f32 0.7978846, %v834_v11 }
 0x21d   : > { %v1742_v15 = vpop.eup %1741  ;;  %v843_v17 = vmul.f32 0.7978846, %v835_v12 }
 0x21e   : > { %v1744_v19 = vpop.eup %1743  ;;  %v856_v23 = vadd.f32 1.0, %v1742_v15  ;;  %1749 = vtanh.f32 %v842_v14 }
 0x21f   : > { %v857_v26 = vadd.f32 1.0, %v1744_v19  ;;  %1751 = vtanh.f32 %v843_v17  ;;  %v1746_v27 = vpop.eup %1745 }
 0x220   : > { %v864_v29 = vmul.f32 %v856_v23, %v800_v22  ;;  %v1748_v30 = vpop.eup %1747  ;;  %v854_v38 = vadd.f32 1.0, %v1746_v27 }
 0x221   : > { %v865_v33 = vmul.f32 %v857_v26, %v801_v25  ;;  %v855_v18 = vadd.f32 1.0, %v1748_v30 }
 0x222   : > { %v870_v34 = vpack.c.bf16 %v864_v29, %v860_v28  ;;  %v862_v45 = vmul.f32 %v854_v38, %v798_v41 }
 0x223   : > { %v871_v37 = vpack.c.bf16 %v865_v33, %v861_v32  ;;  %v863_v47 = vmul.f32 %v855_v18, %v799_v42 }
 0x224   : > { %v1750_v39 = vpop.eup %1749  ;;  %1138 = vmatmul.bf16.vlgmr.msrb.gmra.mxu0 %v870_v34 }
 0x225   : > { %v1752_v36 = vpop.eup %1751  ;;  %1152 = vmatmul.bf16.vlgmr.msrb.gmra.mxu1 %v871_v37  ;;  %v858_v40 = vadd.f32 1.0, %v1750_v39 }
 0x226   : > { %v859_v44 = vadd.f32 1.0, %v1752_v36 }
 0x227   : > { %v866_v46 = vmul.f32 %v858_v40, %v802_v20 }
 0x228   : > { %v867_v48 = vmul.f32 %v859_v44, %v803_v43 }
 0x229   : > { %v872_v49 = vpack.c.bf16 %v866_v46, %v862_v45 }
 0x22a   : > { %v873_v50 = vpack.c.bf16 %v867_v48, %v863_v47 }
 0x22b   : > { %1166 = vmatmul.bf16.vlgmr.msrb.gmra.mxu2 %v872_v49 }
 0x22c   : > { %1180 = vmatmul.bf16.vlgmr.msrb.gmra.mxu3 %v873_v50 }
 0x2a1   : > { %v1139_v51 = vpop.f32.mrf.mxu0 }
 0x2a2   : > { %v1153_v52 = vpop.f32.mrf.mxu1 }
 0x2a3   : > { %v1154_v53 = vadd.f32 %v1153_v52, %v1139_v51 }
 0x2a9   : > { %v1141_v58 = vpop.f32.mrf.mxu0 }
 0x2aa   : > { %v1155_v35 = vpop.f32.mrf.mxu1 }
 0x2ab   : > { %v1156_v60 = vadd.f32 %v1155_v35, %v1141_v58 }
 0x2ae   : > { %v1167_v54 = vpop.f32.mrf.mxu2 }
 0x2af   : > { %v1168_v56 = vadd.f32 %v1167_v54, %v1154_v53  ;;  %v1181_v31 = vpop.f32.mrf.mxu3 }
 0x2b1   : > { %v1182_v57 = vadd.f32 %v1181_v31, %v1168_v56 }
 0x2b3   : > { %v1186_v59 = vadd.f32 %v1182_v57, %v868_v55 }
 0x2b5   : > { %1188 = vst [vmem:[#allocation3] sm:$0xff] %v1186_v59 }
 0x2b6   : > { %v1169_v61 = vpop.f32.mrf.mxu2 }
 0x2b7   : > { %v1170_v62 = vadd.f32 %v1169_v61, %v1156_v60  ;;  %v1183_v0 = vpop.f32.mrf.mxu3 }
 0x2b9   : > { %v1184_v1 = vadd.f32 %v1183_v0, %v1170_v62  ;;  %1193 = sbr.rel (%p1598_p0) target bundleno = 714 (0x2ca), region = 83 }
 0x2bb   : > { %v1187_v2 = vadd.f32 %v1184_v1, %v869_v63 }
 0x2bd   : > { %1189 = vst [vmem:[#allocation3 + $0x8] sm:$0xff] %v1187_v2 }
 0x2be   : > { %v1194_v3 = vld [vmem:[#allocation3] sm:$0xff]  ;;  %v1753_v4 = vld [vmem:[%s2217_s6] ss:$0 sm:$0xff] }
 0x2bf   : > { %v1202_v5 = vld [vmem:[%s2211_s0] sm:$0xff]  ;;  %v1203_v7 = vld [vmem:[%s2211_s0 + $0x8] sm:$0xff]  ;;  %v1200_v8 = vadd.f32 %v1753_v4, %v1194_v3 }
 0x2c1   : > { %v1204_v10 = vadd.f32 %v1202_v5, %v1200_v8 }
 0x2c3   : > { %1206 = vst [vmem:[%s2218_s7] sm:$0xff] %v1204_v10 }
 0x2c4   : > { %v1195_v6 = vld [vmem:[#allocation3 + $0x8] sm:$0xff] }
 0x2c5   : > { %v1201_v9 = vadd.f32 %v1753_v4, %v1195_v6 }
 0x2c7   : > { %v1205_v11 = vadd.f32 %v1203_v7, %v1201_v9 }
 0x2c9   : > { %1207 = vst [vmem:[%s2218_s7 + $0x8] sm:$0xff] %v1205_v11 }
 0x2ca PF: > { %s20_s29 = sadd.s32 1, %s1832_s29   ;;  %s2221_s24 = smov %s1816_s25 }
 0x2cb   : > { %p17_p1 = scmp.ge.s32.totalorder %s20_s29, 4   ;;  %s2222_s25 = smov %s1820_s26 }
 0x2cc   : > { %s2223_s26 = smov %s1926_s13  ;;  %s2224_s27 = smov %s1828_s28 }
 0x2cd   : > { %s2225_s28 = smov %s2227_s8  ;;  %19 = sbr.rel (!%p17_p1) target bundleno = 4 (0x4), region = 133 }
 0x2d2   :  { %1230 = vsyncpa [#allocation6], 1 }
 0x2d3   :  { %1232 = vsyncpa [#allocation6 + $0x1], 1 }

// kernel: ext_transformer_encoder_forward.18
= control target key start
LH: loop header
LB: loop body
LE: loop exit
PB: predicated region body
PF: predicated region fallthrough
CT: control target
= control target key end

     0   :  { %s1789_s24 = smov 0   ;;  %s1791_s25 = smov 0   ;;  %s2097_s0 = inlined_call_operand.vmem [shape: f32[16,128], index: 0, kind: input, shape index: {}]   ;;  %s2098_s1 = inlined_call_operand.vmem [shape: f32[1,128], index: 1, kind: input, shape index: {}]   ;;  %s2099_s2 = inlined_call_operand.vmem [shape: f32[1,128], index: 2, kind: input, shape index: {}]   ;;  %s2100_s3 = inlined_call_operand.vmem [shape: bf16[128,1024], index: 3, kind: input, shape index: {}]   ;;  %s2101_s4 = inlined_call_operand.vmem [shape: f32[1,1024], index: 4, kind: input, shape index: {}]   ;;  %s2102_s5 = inlined_call_operand.vmem [shape: bf16[1024,128], index: 5, kind: input, shape index: {}]   ;;  %s2103_s6 = inlined_call_operand.vmem [shape: f32[1,128], index: 6, kind: input, shape index: {}]   ;;  %s2104_s7 = inlined_call_operand.vmem [shape: f32[16,128], index: 7, kind: output, shape index: {}]  }
   0x1   :  { %s1793_s26 = smov 0   ;;  %s1795_s27 = smov 0  }
   0x2   :  { %s1797_s28 = smov 0  }
   0x3 LB: > { %s26_s29 = sadd.s32 1, %s1741_s27  ;;  %p111_p1 = scmp.ne.s32.totalorder %s1733_s25, %s1729_s24  ;;  %s1745_s28 = sphi %s1797_s28, %s17_s28   ;;  %s1741_s27 = sphi %s1795_s27, %s2108_s27   ;;  %s1737_s26 = sphi %s1793_s26, %s2107_s26   ;;  %s1733_s25 = sphi %s1791_s25, %s2106_s25   ;;  %s1729_s24 = sphi %s1789_s24, %s2105_s24  }
   0x4   : > { %p27_p0 = scmp.ge.s32.totalorder %s26_s29, 2  ;;  %p112_p2 = scmp.eq.s32.totalorder %s1745_s28, 0 }
   0x5   : > { %s104_s8 = sadd.s32 1, %s1733_s25  ;;  %p1294_p5 = scmp.ge.s32.totalorder %s1745_s28, 2 }
   0x6   : > { %s2110_s29 = smov (%p27_p0, %s26_s29), 0  ;;  %p113_p3 = por %p112_p2, %p111_p1 }
   0x7   : > { %s101_s30 = ssub.s32 %s1741_s27, %s2110_s29  ;;  %254 = sbr.rel (%p1294_p5) target bundleno = 48 (0x30), region = 32 }
   0x8   : > { %p102_p4 = scmp.eq.s32.totalorder %s101_s30, 0 }
   0xa   : > { %s1824_s9 = scalar_select %p102_p4, %s1733_s25, %s104_s8  }
   0xc   : > { %257 = sbr.rel (!%p113_p3) target bundleno = 48 (0x30), region = 36  ;;  %s259_s10 = sand.u32 (%p113_p3), 1, %s1733_s25  }
   0xd   : > { %s1569_s11 = sshll.u32 (%p113_p3), %s1741_s27, 4  ;;  %s1295_s12 = sshll.u32 (%p113_p3), %s259_s10, 8 }
   0xe   : > { %s1832_s15 = scalar_lea.vmem (%p113_p3), %s2100_s3, %s1569_s11  ;;  %s1837_s16 = scalar_lea.vmem (%p113_p3), [#allocation4], %s1295_s12 }
   0xf   : > { %v277_v0 = vld [vmem:[%s1832_s15] sm:$0xff] (%p113_p3)  ;;  %v279_v1 = vld [vmem:[%s1832_s15 + $0x8] sm:$0xff] (%p113_p3) }
  0x10   : > { %v281_v2 = vld [vmem:[%s1832_s15 + $0x20] sm:$0xff] (%p113_p3)  ;;  %278 = vst [vmem:[%s1837_s16] sm:$0xff] (%p113_p3), %v277_v0  ;;  %v283_v3 = vld [vmem:[%s1832_s15 + $0x28] sm:$0xff] (%p113_p3) }
  0x11   : > { %280 = vst [vmem:[%s1837_s16 + $0x8] sm:$0xff] %v279_v1  ;;  %v285_v4 = vld [vmem:[%s1832_s15 + $0x40] sm:$0xff]  ;;  %v287_v5 = vld [vmem:[%s1832_s15 + $0x48] sm:$0xff] }
  0x12   : > { %282 = vst [vmem:[%s1837_s16 + $0x10] sm:$0xff] %v281_v2  ;;  %v289_v6 = vld [vmem:[%s1832_s15 + $0x60] sm:$0xff]  ;;  %v291_v7 = vld [vmem:[%s1832_s15 + $0x68] sm:$0xff] }
  0x13   : > { %284 = vst [vmem:[%s1837_s16 + $0x18] sm:$0xff] %v283_v3  ;;  %v293_v8 = vld [vmem:[%s1832_s15 + $0x80] sm:$0xff]  ;;  %v295_v9 = vld [vmem:[%s1832_s15 + $0x88] sm:$0xff] }
  0x14   : > { %286 = vst [vmem:[%s1837_s16 + $0x20] sm:$0xff] %v285_v4  ;;  %v297_v10 = vld [vmem:[%s1832_s15 + $0xa0] sm:$0xff]  ;;  %v299_v11 = vld [vmem:[%s1832_s15 + $0xa8] sm:$0xff] }
  0x15   : > { %288 = vst [vmem:[%s1837_s16 + $0x28] sm:$0xff] %v287_v5  ;;  %v301_v12 = vld [vmem:[%s1832_s15 + $0xc0] sm:$0xff]  ;;  %v303_v13 = vld [vmem:[%s1832_s15 + $0xc8] sm:$0xff] }
  0x16   : > { %290 = vst [vmem:[%s1837_s16 + $0x30] sm:$0xff] %v289_v6  ;;  %v305_v14 = vld [vmem:[%s1832_s15 + $0xe0] sm:$0xff]  ;;  %v307_v15 = vld [vmem:[%s1832_s15 + $0xe8] sm:$0xff] }
  0x17   : > { %292 = vst [vmem:[%s1837_s16 + $0x38] sm:$0xff] %v291_v7  ;;  %v309_v16 = vld [vmem:[%s1832_s15 + $0x100] sm:$0xff]  ;;  %v311_v17 = vld [vmem:[%s1832_s15 + $0x108] sm:$0xff] }
  0x18   : > { %294 = vst [vmem:[%s1837_s16 + $0x40] sm:$0xff] %v293_v8  ;;  %v313_v18 = vld [vmem:[%s1832_s15 + $0x120] sm:$0xff]  ;;  %v315_v19 = vld [vmem:[%s1832_s15 + $0x128] sm:$0xff] }
  0x19   : > { %296 = vst [vmem:[%s1837_s16 + $0x48] sm:$0xff] %v295_v9  ;;  %v317_v20 = vld [vmem:[%s1832_s15 + $0x140] sm:$0xff]  ;;  %v319_v21 = vld [vmem:[%s1832_s15 + $0x148] sm:$0xff] }
  0x1a   : > { %298 = vst [vmem:[%s1837_s16 + $0x50] sm:$0xff] %v297_v10  ;;  %v321_v22 = vld [vmem:[%s1832_s15 + $0x160] sm:$0xff]  ;;  %v323_v23 = vld [vmem:[%s1832_s15 + $0x168] sm:$0xff] }
  0x1b   : > { %300 = vst [vmem:[%s1837_s16 + $0x58] sm:$0xff] %v299_v11  ;;  %v325_v24 = vld [vmem:[%s1832_s15 + $0x180] sm:$0xff]  ;;  %v327_v25 = vld [vmem:[%s1832_s15 + $0x188] sm:$0xff] }
  0x1c   : > { %302 = vst [vmem:[%s1837_s16 + $0x60] sm:$0xff] %v301_v12  ;;  %v329_v26 = vld [vmem:[%s1832_s15 + $0x1a0] sm:$0xff]  ;;  %v331_v27 = vld [vmem:[%s1832_s15 + $0x1a8] sm:$0xff] }
  0x1d   : > { %304 = vst [vmem:[%s1837_s16 + $0x68] sm:$0xff] %v303_v13  ;;  %v333_v28 = vld [vmem:[%s1832_s15 + $0x1c0] sm:$0xff]  ;;  %v335_v29 = vld [vmem:[%s1832_s15 + $0x1c8] sm:$0xff] }
  0x1e   : > { %306 = vst [vmem:[%s1837_s16 + $0x70] sm:$0xff] %v305_v14  ;;  %v337_v30 = vld [vmem:[%s1832_s15 + $0x1e0] sm:$0xff]  ;;  %v339_v31 = vld [vmem:[%s1832_s15 + $0x1e8] sm:$0xff] }
  0x1f   : > { %308 = vst [vmem:[%s1837_s16 + $0x78] sm:$0xff] %v307_v15 }
  0x20   : > { %310 = vst [vmem:[%s1837_s16 + $0x80] sm:$0xff] %v309_v16 }
  0x21   : > { %312 = vst [vmem:[%s1837_s16 + $0x88] sm:$0xff] %v311_v17 }
  0x22   : > { %314 = vst [vmem:[%s1837_s16 + $0x90] sm:$0xff] %v313_v18 }
  0x23   : > { %316 = vst [vmem:[%s1837_s16 + $0x98] sm:$0xff] %v315_v19 }
  0x24   : > { %318 = vst [vmem:[%s1837_s16 + $0xa0] sm:$0xff] %v317_v20 }
  0x25   : > { %320 = vst [vmem:[%s1837_s16 + $0xa8] sm:$0xff] %v319_v21 }
  0x26   : > { %322 = vst [vmem:[%s1837_s16 + $0xb0] sm:$0xff] %v321_v22 }
  0x27   : > { %324 = vst [vmem:[%s1837_s16 + $0xb8] sm:$0xff] %v323_v23 }
  0x28   : > { %326 = vst [vmem:[%s1837_s16 + $0xc0] sm:$0xff] %v325_v24 }
  0x29   : > { %328 = vst [vmem:[%s1837_s16 + $0xc8] sm:$0xff] %v327_v25 }
  0x2a   : > { %330 = vst [vmem:[%s1837_s16 + $0xd0] sm:$0xff] %v329_v26 }
  0x2b   : > { %332 = vst [vmem:[%s1837_s16 + $0xd8] sm:$0xff] %v331_v27 }
  0x2c   : > { %334 = vst [vmem:[%s1837_s16 + $0xe0] sm:$0xff] %v333_v28 }
  0x2d   : > { %336 = vst [vmem:[%s1837_s16 + $0xe8] sm:$0xff] %v335_v29 }
  0x2e   : > { %338 = vst [vmem:[%s1837_s16 + $0xf0] sm:$0xff] %v337_v30 }
  0x2f   : > { %340 = vst [vmem:[%s1837_s16 + $0xf8] sm:$0xff] %v339_v31 }
  0x30 PF: > { %p1298_p6 = scmp.ge.s32.totalorder %s1745_s28, 1  ;;  %p362_p7 = scmp.lt.s32.totalorder %s1745_s28, 3 }
  0x32   : > { %p363_p8 = pnand %p1298_p6, %p362_p7 }
  0x33   : > { %s369_s17 = sand.u32 (!%p363_p8), 1, %s1729_s24   ;;  %s1300_s18 = sshll.u32 (!%p363_p8), %s1737_s26, 2 }
  0x34   : > { %366 = sbr.rel (%p363_p8) target bundleno = 701 (0x2bd), region = 67  ;;  %s1299_s19 = sshll.u32 (!%p363_p8), %s369_s17, 8 }
  0x35   : > { %p422_p9 = scmp.lt.s32.totalorder (!%p363_p8), %s1300_s18, 7  ;;  %s1301_s20 = sshll.u32 (!%p363_p8), %s1737_s26, 6 }
  0x36   : > { %p427_p10 = scmp.lt.s32.totalorder (!%p363_p8), %s1301_s20, 127  ;;  %s1916_s24 = scalar_lea.vmem (!%p363_p8), [#allocation4], %s1299_s19 }
  0x37   : > { %p1303_p11 = scmp.ne.s32.totalorder (!%p363_p8), %s1737_s26, 0 }
  0x39   : > { %s2112_s18 = smov (!%p422_p9, %s1300_s18), 7  ;;  %s2114_s20 = smov (!%p427_p10, %s1301_s20), 127 }
  0x3a   : > { %s424_s23 = scalar_lea.vmem %s2101_s4, %s2112_s18  ;;  %s1302_s30 = sshll.u32 %s2114_s20, 2 }
  0x3b   : > { %s1914_s11 = scalar_lea.vmem %s2102_s5, %s1302_s30  ;;  %441 = sbr.rel (%p1303_p11) target bundleno = 342 (0x156), region = 75 }
  0x40   : > { %v442_v32 = vld [vmem:[%s2097_s0] sm:$0xff]  ;;  %v443_v33 = vld [vmem:[%s2097_s0 + $0x8] sm:$0xff]  ;;  %v1747_v34 = vmov 128.0   ;;  %v1748_v52 = vmov 0.0  }
  0x41   : > { %444 = vadd.xlane.f32.xlu0 %v442_v32  ;;  %1684 = vrcp.f32 %v1747_v34  ;;  %507 = vst [vmem:[#allocation3] sm:$0xff] %v1748_v52  ;;  %v1682_v4 = vld [vmem:[%s2098_s1] ss:$0 sm:$0xff] }
  0x42   : > { %508 = vst [vmem:[#allocation3 + $0x8] sm:$0xff] %v1748_v52  ;;  %v1683_v8 = vld [vmem:[%s2099_s2] ss:$0 sm:$0xff] }
  0x47   : > { %v1685_v35 = vpop.eup %1684 }
  0x48   : > { %v449_v36 = vmul.f32 128.0, %v1685_v35  ;;  %vm453_vm0 = vweird.f32 %v1685_v35 }
  0x49   : > { %446 = vadd.xlane.f32.xlu0 %v443_v33 }
  0x4a   : > { %v450_v37 = vsub.f32 1.0, %v449_v36 }
  0x4c   : > { %v451_v38 = vmul.f32 %v1685_v35, %v450_v37 }
  0x4e   : > { %v452_v39 = vadd.f32 %v1685_v35, %v451_v38 }
  0x50   : > { %v454_v40 = vsel %vm453_vm0, %v1685_v35, %v452_v39 }
  0xb4   : > { %v445_v41 = vpop.xlane.xlu0 %444 }
  0xb5   : > { %v455_v42 = vmul.f32 %v454_v40, %v445_v41 }
  0xb7   : > { %v457_v43 = vsub.f32 %v442_v32, %v455_v42 }
  0xb9   : > { %v459_v44 = vmul.f32 %v457_v43, %v457_v43 }
  0xbb   : > { %461 = vadd.xlane.f32.xlu1 %v459_v44 }
  0xbc   : > { %v447_v45 = vpop.xlane.xlu0 %446 }
  0xbd   : > { %v456_v46 = vmul.f32 %v454_v40, %v447_v45 }
  0xbf   : > { %v458_v47 = vsub.f32 %v443_v33, %v456_v46 }
  0xc1   : > { %v460_v48 = vmul.f32 %v458_v47, %v458_v47 }
  0xc3   : > { %463 = vadd.xlane.f32.xlu1 %v460_v48 }
 0x12e   : > { %v462_v49 = vpop.xlane.xlu1 %461 }
 0x12f   : > { %v465_v50 = vmul.f32 %v462_v49, %v454_v40 }
 0x131   : > { %v467_v51 = vadd.f32 1e-06, %v465_v50 }
 0x133   : > { %1686 = vrsqrt.f32 %v467_v51  ;;  %vm475_vm2 = vweird.f32 %v467_v51 }
 0x136   : > { %v464_v53 = vpop.xlane.xlu1 %463 }
 0x137   : > { %v466_v54 = vmul.f32 %v464_v53, %v454_v40 }
 0x139   : > { %v1687_v55 = vpop.eup %1686  ;;  %v468_v56 = vadd.f32 1e-06, %v466_v54 }
 0x13a   : > { %v470_v57 = vmul.f32 %v1687_v55, %v467_v51  ;;  %vm476_vm1 = vweird.f32 %v1687_v55 }
 0x13b   : > { %1688 = vrsqrt.f32 %v468_v56  ;;  %vm477_vm3 = vmor %vm475_vm2, %vm476_vm1  ;;  %vm485_vm5 = vweird.f32 %v468_v56 }
 0x13c   : > { %v471_v58 = vmul.f32 %v1687_v55, %v470_v57 }
 0x13e   : > { %v472_v59 = vmul.f32 0.5, %v471_v58 }
 0x140   : > { %v473_v60 = vsub.f32 1.5, %v472_v59 }
 0x141   : > { %v1689_v61 = vpop.eup %1688 }
 0x142   : > { %v474_v62 = vmul.f32 %v1687_v55, %v473_v60  ;;  %v480_v63 = vmul.f32 %v1689_v61, %v468_v56  ;;  %vm486_vm4 = vweird.f32 %v1689_v61 }
 0x143   : > { %vm487_vm6 = vmor %vm485_vm5, %vm486_vm4 }
 0x144   : > { %v481_v0 = vmul.f32 %v1689_v61, %v480_v63  ;;  %v478_v1 = vsel %vm477_vm3, %v1687_v55, %v474_v62 }
 0x145   : > { %v489_v5 = vmul.f32 %v478_v1, %v457_v43 }
 0x146   : > { %v482_v2 = vmul.f32 0.5, %v481_v0 }
 0x147   : > { %v495_v9 = vmul.f32 %v1682_v4, %v489_v5 }
 0x148   : > { %v483_v3 = vsub.f32 1.5, %v482_v2 }
 0x149   : > { %v501_v12 = vadd.f32 %v1683_v8, %v495_v9 }
 0x14a   : > { %v484_v6 = vmul.f32 %v1689_v61, %v483_v3 }
 0x14c   : > { %v488_v7 = vsel %vm487_vm6, %v1689_v61, %v484_v6 }
 0x14d   : > { %v490_v10 = vmul.f32 %v488_v7, %v458_v47 }
 0x14f   : > { %v496_v11 = vmul.f32 %v1682_v4, %v490_v10 }
 0x151   : > { %v502_v13 = vadd.f32 %v1683_v8, %v496_v11 }
 0x153   : > { %v1638_v14 = vpack.c.bf16 %v502_v13, %v501_v12 }
 0x155   : > { %1639 = vst [vmem:[#allocation2] sm:$0xff] %v1638_v14  }
 0x156 PF: > { %v1422_v15 = vld [vmem:[%s1916_s24 + $0xe0] sm:$0xf]  ;;  %v1601_v16 = vld [vmem:[%s1916_s24 + $0xec] sm:$0xf0]  ;;  %v1599_v17 = vld [vmem:[%s1916_s24 + $0xe4] sm:$0xf] }
 0x157   : > { %v1423_v18 = vor.u32 %v1601_v16, %v1422_v15  ;;  %v1424_v19 = vld [vmem:[%s1916_s24 + $0xf0] sm:$0xf0]  ;;  %v1430_v20 = vld [vmem:[%s1916_s24 + $0xe8] sm:$0xf]  ;;  %v1602_v21 = vld [vmem:[%s1916_s24 + $0xf4] sm:$0xf0] }
 0x158   : > { %v1427_v22 = vor.u32 %v1599_v17, %v1424_v19  ;;  %v1431_v23 = vor.u32 %v1602_v21, %v1430_v20  ;;  %v1600_v24 = vld [vmem:[%s1916_s24 + $0xec] sm:$0xf]  ;;  %v1432_v25 = vld [vmem:[%s1916_s24 + $0xf8] sm:$0xf0]  ;;  %v1406_v26 = vld [vmem:[%s1916_s24 + $0xc0] sm:$0xf] }
 0x159   : > { %719 = vmatpush.bf16.msra.mxu0 %v1423_v18  ;;  %v1435_v27 = vor.u32 %v1600_v24, %v1432_v25  ;;  %v1597_v28 = vld [vmem:[%s1916_s24 + $0xcc] sm:$0xf0]  ;;  %v1595_v29 = vld [vmem:[%s1916_s24 + $0xc4] sm:$0xf]  ;;  %v1408_v30 = vld [vmem:[%s1916_s24 + $0xd0] sm:$0xf0] }
 0x15a   : > { %733 = vmatpush.bf16.msra.mxu1 %v1427_v22  ;;  %747 = vmatpush.bf16.msra.mxu2 %v1431_v23  ;;  %v1407_v31 = vor.u32 %v1597_v28, %v1406_v26  ;;  %v1411_v32 = vor.u32 %v1595_v29, %v1408_v30  ;;  %v1414_v33 = vld [vmem:[%s1916_s24 + $0xc8] sm:$0xf]  ;;  %v1598_v34 = vld [vmem:[%s1916_s24 + $0xd4] sm:$0xf0]  ;;  %v1596_v35 = vld [vmem:[%s1916_s24 + $0xcc] sm:$0xf] }
 0x15b   : > { %761 = vmatpush.bf16.msra.mxu3 %v1435_v27  ;;  %v1415_v36 = vor.u32 %v1598_v34, %v1414_v33  ;;  %v1416_v37 = vld [vmem:[%s1916_s24 + $0xd8] sm:$0xf0]  ;;  %v1390_v38 = vld [vmem:[%s1916_s24 + $0xa0] sm:$0xf]  ;;  %v1593_v39 = vld [vmem:[%s1916_s24 + $0xac] sm:$0xf0] }
 0x15c   : > { %v1419_v40 = vor.u32 %v1596_v35, %v1416_v37  ;;  %v1591_v41 = vld [vmem:[%s1916_s24 + $0xa4] sm:$0xf]  ;;  %v1392_v42 = vld [vmem:[%s1916_s24 + $0xb0] sm:$0xf0]  ;;  %v1398_v43 = vld [vmem:[%s1916_s24 + $0xa8] sm:$0xf]  ;;  %v1391_v44 = vor.u32 %v1593_v39, %v1390_v38 }
 0x15d   : > { %720 = vmatpush.bf16.msra.mxu0 %v1407_v31  ;;  %v1594_v45 = vld [vmem:[%s1916_s24 + $0xb4] sm:$0xf0]  ;;  %v1592_v46 = vld [vmem:[%s1916_s24 + $0xac] sm:$0xf]  ;;  %v1400_v47 = vld [vmem:[%s1916_s24 + $0xb8] sm:$0xf0]  ;;  %v1395_v48 = vor.u32 %v1591_v41, %v1392_v42 }
 0x15e   : > { %734 = vmatpush.bf16.msra.mxu1 %v1411_v32  ;;  %748 = vmatpush.bf16.msra.mxu2 %v1415_v36  ;;  %v1399_v49 = vor.u32 %v1594_v45, %v1398_v43  ;;  %v1374_v50 = vld [vmem:[%s1916_s24 + $0x80] sm:$0xf]  ;;  %v1589_v51 = vld [vmem:[%s1916_s24 + $0x8c] sm:$0xf0]  ;;  %v1587_v52 = vld [vmem:[%s1916_s24 + $0x84] sm:$0xf]  ;;  %v1403_v53 = vor.u32 %v1592_v46, %v1400_v47 }
 0x15f   : > { %762 = vmatpush.bf16.msra.mxu3 %v1419_v40  ;;  %v1376_v54 = vld [vmem:[%s1916_s24 + $0x90] sm:$0xf0]  ;;  %v1382_v55 = vld [vmem:[%s1916_s24 + $0x88] sm:$0xf]  ;;  %v1590_v56 = vld [vmem:[%s1916_s24 + $0x94] sm:$0xf0]  ;;  %v1375_v59 = vor.u32 %v1589_v51, %v1374_v50 }
 0x160   : > { %v1588_v57 = vld [vmem:[%s1916_s24 + $0x8c] sm:$0xf]  ;;  %v1384_v58 = vld [vmem:[%s1916_s24 + $0x98] sm:$0xf0]  ;;  %v1379_v60 = vor.u32 %v1587_v52, %v1376_v54  ;;  %v1383_v61 = vor.u32 %v1590_v56, %v1382_v55  ;;  %v1358_v62 = vld [vmem:[%s1916_s24 + $0x60] sm:$0xf] }
 0x161   : > { %721 = vmatpush.bf16.msra.mxu0 %v1391_v44  ;;  %v1585_v63 = vld [vmem:[%s1916_s24 + $0x6c] sm:$0xf0]  ;;  %v1583_v0 = vld [vmem:[%s1916_s24 + $0x64] sm:$0xf]  ;;  %v1387_v1 = vor.u32 %v1588_v57, %v1384_v58  ;;  %v1360_v2 = vld [vmem:[%s1916_s24 + $0x70] sm:$0xf0] }
 0x162   : > { %735 = vmatpush.bf16.msra.mxu1 %v1395_v48  ;;  %749 = vmatpush.bf16.msra.mxu2 %v1399_v49  ;;  %v1366_v3 = vld [vmem:[%s1916_s24 + $0x68] sm:$0xf]  ;;  %v1586_v4 = vld [vmem:[%s1916_s24 + $0x74] sm:$0xf0]  ;;  %v1584_v5 = vld [vmem:[%s1916_s24 + $0x6c] sm:$0xf]  ;;  %v1359_v7 = vor.u32 %v1585_v63, %v1358_v62  ;;  %v1363_v8 = vor.u32 %v1583_v0, %v1360_v2 }
 0x163   : > { %763 = vmatpush.bf16.msra.mxu3 %v1403_v53  ;;  %v1368_v6 = vld [vmem:[%s1916_s24 + $0x78] sm:$0xf0]  ;;  %v1367_v9 = vor.u32 %v1586_v4, %v1366_v3  ;;  %v1342_v10 = vld [vmem:[%s1916_s24 + $0x40] sm:$0xf]  ;;  %v1581_v11 = vld [vmem:[%s1916_s24 + $0x4c] sm:$0xf0] }
 0x164   : > { %v1579_v12 = vld [vmem:[%s1916_s24 + $0x44] sm:$0xf]  ;;  %v1371_v13 = vor.u32 %v1584_v5, %v1368_v6  ;;  %v1344_v14 = vld [vmem:[%s1916_s24 + $0x50] sm:$0xf0]  ;;  %v1350_v15 = vld [vmem:[%s1916_s24 + $0x48] sm:$0xf]  ;;  %v1343_v19 = vor.u32 %v1581_v11, %v1342_v10 }
 0x165   : > { %722 = vmatpush.bf16.msra.mxu0 %v1375_v59  ;;  %v1582_v16 = vld [vmem:[%s1916_s24 + $0x54] sm:$0xf0]  ;;  %v1580_v17 = vld [vmem:[%s1916_s24 + $0x4c] sm:$0xf]  ;;  %v1352_v18 = vld [vmem:[%s1916_s24 + $0x58] sm:$0xf0]  ;;  %v1347_v20 = vor.u32 %v1579_v12, %v1344_v14 }
 0x166   : > { %736 = vmatpush.bf16.msra.mxu1 %v1379_v60  ;;  %750 = vmatpush.bf16.msra.mxu2 %v1383_v61  ;;  %v1351_v21 = vor.u32 %v1582_v16, %v1350_v15  ;;  %v1326_v22 = vld [vmem:[%s1916_s24 + $0x20] sm:$0xf]  ;;  %v1577_v23 = vld [vmem:[%s1916_s24 + $0x2c] sm:$0xf0]  ;;  %v1575_v24 = vld [vmem:[%s1916_s24 + $0x24] sm:$0xf]  ;;  %v1355_v25 = vor.u32 %v1580_v17, %v1352_v18 }
 0x167   : > { %764 = vmatpush.bf16.msra.mxu3 %v1387_v1  ;;  %v1328_v26 = vld [vmem:[%s1916_s24 + $0x30] sm:$0xf0]  ;;  %v1334_v27 = vld [vmem:[%s1916_s24 + $0x28] sm:$0xf]  ;;  %v1578_v28 = vld [vmem:[%s1916_s24 + $0x34] sm:$0xf0]  ;;  %v1327_v31 = vor.u32 %v1577_v23, %v1326_v22 }
 0x168   : > { %v1576_v29 = vld [vmem:[%s1916_s24 + $0x2c] sm:$0xf]  ;;  %v1336_v30 = vld [vmem:[%s1916_s24 + $0x38] sm:$0xf0]  ;;  %v1331_v32 = vor.u32 %v1575_v24, %v1328_v26  ;;  %v1335_v33 = vor.u32 %v1578_v28, %v1334_v27  ;;  %v1310_v34 = vld [vmem:[%s1916_s24] sm:$0xf] }
 0x169   : > { %723 = vmatpush.bf16.msra.mxu0 %v1359_v7  ;;  %v1573_v35 = vld [vmem:[%s1916_s24 + $0xc] sm:$0xf0]  ;;  %v1571_v36 = vld [vmem:[%s1916_s24 + $0x4] sm:$0xf]  ;;  %v1339_v37 = vor.u32 %v1576_v29, %v1336_v30  ;;  %v1312_v38 = vld [vmem:[%s1916_s24 + $0x10] sm:$0xf0] }
 0x16a   : > { %737 = vmatpush.bf16.msra.mxu1 %v1363_v8  ;;  %751 = vmatpush.bf16.msra.mxu2 %v1367_v9  ;;  %v1318_v39 = vld [vmem:[%s1916_s24 + $0x8] sm:$0xf]  ;;  %v1574_v40 = vld [vmem:[%s1916_s24 + $0x14] sm:$0xf0]  ;;  %v1572_v41 = vld [vmem:[%s1916_s24 + $0xc] sm:$0xf]  ;;  %v1311_v43 = vor.u32 %v1573_v35, %v1310_v34  ;;  %v1315_v44 = vor.u32 %v1571_v36, %v1312_v38 }
 0x16b   : > { %765 = vmatpush.bf16.msra.mxu3 %v1371_v13  ;;  %v1320_v42 = vld [vmem:[%s1916_s24 + $0x18] sm:$0xf0]  ;;  %v1319_v45 = vor.u32 %v1574_v40, %v1318_v39  ;;  %v1570_v47 = vld [vmem:[#allocation2] sm:$0xff]  ;;  %v1610_v48 = vld [vmem:[%s1914_s11 + $0x38] sm:$0xff]  ;;  %p1564_p12 = scmp.ne.s32.totalorder %s1737_s26, 1 }
 0x16c   : > { %v1323_v46 = vor.u32 %v1572_v41, %v1320_v42  ;;  %v1618_v49 = vld [vmem:[%s1914_s11 + $0x78] sm:$0xff]  ;;  %v1609_v50 = vld [vmem:[%s1914_s11 + $0x30] sm:$0xff]  ;;  %v1608_v54 = vld [vmem:[%s1914_s11 + $0x28] sm:$0xff] }
 0x16d   : > { %724 = vmatpush.bf16.msra.mxu0 %v1343_v19  ;;  %v1617_v51 = vld [vmem:[%s1914_s11 + $0x70] sm:$0xff]  ;;  %v1626_v52 = vld [vmem:[%s1914_s11 + $0xb8] sm:$0xff]  ;;  %v1616_v55 = vld [vmem:[%s1914_s11 + $0x68] sm:$0xff] }
 0x16e   : > { %738 = vmatpush.bf16.msra.mxu1 %v1347_v20  ;;  %752 = vmatpush.bf16.msra.mxu2 %v1351_v21  ;;  %v1634_v53 = vld [vmem:[%s1914_s11 + $0xf8] sm:$0xff]  ;;  %v1625_v56 = vld [vmem:[%s1914_s11 + $0xb0] sm:$0xff]  ;;  %v1607_v58 = vld [vmem:[%s1914_s11 + $0x20] sm:$0xff] }
 0x16f   : > { %766 = vmatpush.bf16.msra.mxu3 %v1355_v25  ;;  %v1633_v57 = vld [vmem:[%s1914_s11 + $0xf0] sm:$0xff]  ;;  %v1615_v59 = vld [vmem:[%s1914_s11 + $0x60] sm:$0xff]  ;;  %v1624_v60 = vld [vmem:[%s1914_s11 + $0xa8] sm:$0xff] }
 0x170   : > { %v1632_v61 = vld [vmem:[%s1914_s11 + $0xe8] sm:$0xff]  ;;  %v1606_v62 = vld [vmem:[%s1914_s11 + $0x18] sm:$0xff]  ;;  %v1623_v0 = vld [vmem:[%s1914_s11 + $0xa0] sm:$0xff] }
 0x171   : > { %725 = vmatpush.bf16.msra.mxu0 %v1327_v31  ;;  %v1614_v63 = vld [vmem:[%s1914_s11 + $0x58] sm:$0xff]  ;;  %v1631_v1 = vld [vmem:[%s1914_s11 + $0xe0] sm:$0xff]  ;;  %v1605_v2 = vld [vmem:[%s1914_s11 + $0x10] sm:$0xff] }
 0x172   : > { %739 = vmatpush.bf16.msra.mxu1 %v1331_v32  ;;  %753 = vmatpush.bf16.msra.mxu2 %v1335_v33  ;;  %v1613_v3 = vld [vmem:[%s1914_s11 + $0x50] sm:$0xff]  ;;  %v1622_v4 = vld [vmem:[%s1914_s11 + $0x98] sm:$0xff]  ;;  %v1604_v6 = vld [vmem:[%s1914_s11 + $0x8] sm:$0xff] }
 0x173   : > { %767 = vmatpush.bf16.msra.mxu3 %v1339_v37  ;;  %v1630_v5 = vld [vmem:[%s1914_s11 + $0xd8] sm:$0xff]  ;;  %v1612_v7 = vld [vmem:[%s1914_s11 + $0x48] sm:$0xff]  ;;  %v2024_v8 = vld [vmem:[%s424_s23] sm:$0xf] }
 0x174   : > { %v1621_v9 = vld [vmem:[%s1914_s11 + $0x90] sm:$0xff]  ;;  %v545_v11 = vperm.slane %v2024_v8, 0  ;;  %v1603_v12 = vld [vmem:[%s1914_s11] sm:$0xff]  ;;  %v546_v14 = vperm.slane %v2024_v8, 1  ;;  %v1620_v15 = vld [vmem:[%s1914_s11 + $0x88] sm:$0xff]  ;;  %v547_v25 = vperm.slane %v2024_v8, 2 }
 0x175   : > { %726 = vmatpush.bf16.msra.mxu0 %v1311_v43  ;;  %v1629_v10 = vld [vmem:[%s1914_s11 + $0xd0] sm:$0xff]  ;;  %v1611_v13 = vld [vmem:[%s1914_s11 + $0x40] sm:$0xff]  ;;  %v1628_v16 = vld [vmem:[%s1914_s11 + $0xc8] sm:$0xff]  ;;  %v548_v27 = vperm.slane %v2024_v8, 3 }
 0x176   : > { %740 = vmatpush.bf16.msra.mxu1 %v1315_v44  ;;  %754 = vmatpush.bf16.msra.mxu2 %v1319_v45  ;;  %v1619_v22 = vld [vmem:[%s1914_s11 + $0x80] sm:$0xff] }
 0x177   : > { %768 = vmatpush.bf16.msra.mxu3 %v1323_v46  ;;  %v1627_v23 = vld [vmem:[%s1914_s11 + $0xc0] sm:$0xff] }
 0x178   : > { %727 = vmatmul.bf16.vlgmr.msra.gmra.mxu0 %v1570_v47 }
 0x179   : > { %741 = vmatmul.bf16.vlgmr.msra.gmra.mxu1 %v1570_v47  ;;  %755 = vmatmul.bf16.vlgmr.msra.gmra.mxu2 %v1570_v47 }
 0x17a   : > { %769 = vmatmul.bf16.vlgmr.msra.gmra.mxu3 %v1570_v47  ;;  %1109 = vmatpush.bf16.msrb.mxu0 %v1610_v48 }
 0x17b   : > { %1123 = vmatpush.bf16.msrb.mxu1 %v1618_v49  ;;  %1137 = vmatpush.bf16.msrb.mxu2 %v1626_v52 }
 0x17c   : > { %1151 = vmatpush.bf16.msrb.mxu3 %v1634_v53 }
 0x17e   : > { %1110 = vmatpush.bf16.msrb.mxu0 %v1609_v50 }
 0x17f   : > { %1124 = vmatpush.bf16.msrb.mxu1 %v1617_v51  ;;  %1138 = vmatpush.bf16.msrb.mxu2 %v1625_v56 }
 0x180   : > { %1152 = vmatpush.bf16.msrb.mxu3 %v1633_v57 }
 0x182   : > { %1111 = vmatpush.bf16.msrb.mxu0 %v1608_v54 }
 0x183   : > { %1125 = vmatpush.bf16.msrb.mxu1 %v1616_v55  ;;  %1139 = vmatpush.bf16.msrb.mxu2 %v1624_v60 }
 0x184   : > { %1153 = vmatpush.bf16.msrb.mxu3 %v1632_v61 }
 0x186   : > { %1112 = vmatpush.bf16.msrb.mxu0 %v1607_v58 }
 0x187   : > { %1126 = vmatpush.bf16.msrb.mxu1 %v1615_v59  ;;  %1140 = vmatpush.bf16.msrb.mxu2 %v1623_v0 }
 0x188   : > { %1154 = vmatpush.bf16.msrb.mxu3 %v1631_v1 }
 0x18a   : > { %1113 = vmatpush.bf16.msrb.mxu0 %v1606_v62 }
 0x18b   : > { %1127 = vmatpush.bf16.msrb.mxu1 %v1614_v63  ;;  %1141 = vmatpush.bf16.msrb.mxu2 %v1622_v4 }
 0x18c   : > { %1155 = vmatpush.bf16.msrb.mxu3 %v1630_v5 }
 0x18e   : > { %1114 = vmatpush.bf16.msrb.mxu0 %v1605_v2 }
 0x18f   : > { %1128 = vmatpush.bf16.msrb.mxu1 %v1613_v3  ;;  %1142 = vmatpush.bf16.msrb.mxu2 %v1621_v9 }
 0x190   : > { %1156 = vmatpush.bf16.msrb.mxu3 %v1629_v10 }
 0x192   : > { %1115 = vmatpush.bf16.msrb.mxu0 %v1604_v6 }
 0x193   : > { %1129 = vmatpush.bf16.msrb.mxu1 %v1612_v7  ;;  %1143 = vmatpush.bf16.msrb.mxu2 %v1620_v15 }
 0x194   : > { %1157 = vmatpush.bf16.msrb.mxu3 %v1628_v16 }
 0x196   : > { %1116 = vmatpush.bf16.msrb.mxu0 %v1603_v12 }
 0x197   : > { %1130 = vmatpush.bf16.msrb.mxu1 %v1611_v13  ;;  %1144 = vmatpush.bf16.msrb.mxu2 %v1619_v22 }
 0x198   : > { %1158 = vmatpush.bf16.msrb.mxu3 %v1627_v23 }
 0x1f5   : > { %v728_v17 = vpop.f32.mrf.mxu0 }
 0x1f6   : > { %v2034_v18 = vadd.f32 %v728_v17, %v545_v11  ;;  %v742_v19 = vpop.f32.mrf.mxu1 }
 0x1f7   : > { %v2036_v20 = vadd.f32 %v742_v19, %v546_v14 }
 0x1f8   : > { %v783_v21 = vmul.f32 0.044715, %v2034_v18 }
 0x1f9   : > { %v784_v24 = vmul.f32 0.044715, %v2036_v20 }
 0x1fa   : > { %v791_v26 = vmul.f32 %v783_v21, %v2034_v18  ;;  %v775_v21 = vmul.f32 0.5, %v2034_v18 }
 0x1fb   : > { %v792_v28 = vmul.f32 %v784_v24, %v2036_v20  ;;  %v776_v24 = vmul.f32 0.5, %v2036_v20 }
 0x1fc   : > { %v756_v29 = vpop.f32.mrf.mxu2  ;;  %v799_v30 = vmul.f32 %v791_v26, %v2034_v18 }
 0x1fd   : > { %v2047_v31 = vadd.f32 %v756_v29, %v547_v25  ;;  %v770_v32 = vpop.f32.mrf.mxu3  ;;  %v730_v33 = vpop.f32.mrf.mxu0  ;;  %v800_v34 = vmul.f32 %v792_v28, %v2036_v20 }
 0x1fe   : > { %v2050_v35 = vadd.f32 %v770_v32, %v548_v27  ;;  %v731_v36 = vadd.f32 %v730_v33, %v545_v11  ;;  %v744_v37 = vpop.f32.mrf.mxu1  ;;  %v807_v38 = vadd.f32 %v799_v30, %v2034_v18 }
 0x1ff   : > { %v785_v39 = vmul.f32 0.044715, %v2047_v31  ;;  %v745_v40 = vadd.f32 %v744_v37, %v546_v14  ;;  %v808_v41 = vadd.f32 %v800_v34, %v2036_v20 }
 0x200   : > { %v786_v42 = vmul.f32 0.044715, %v2050_v35  ;;  %v787_v43 = vmul.f32 0.044715, %v731_v36  ;;  %v815_v48 = vmul.f32 0.7978846, %v807_v38 }
 0x201   : > { %v793_v44 = vmul.f32 %v785_v39, %v2047_v31  ;;  %v788_v45 = vmul.f32 0.044715, %v745_v40  ;;  %v816_v50 = vmul.f32 0.7978846, %v808_v41  ;;  %v779_v22 = vmul.f32 0.5, %v731_v36 }
 0x202   : > { %v794_v46 = vmul.f32 %v786_v42, %v2050_v35  ;;  %v795_v47 = vmul.f32 %v787_v43, %v731_v36  ;;  %1690 = vtanh.f32 %v815_v48  ;;  %v777_v41 = vmul.f32 0.5, %v2047_v31 }
 0x203   : > { %v796_v49 = vmul.f32 %v788_v45, %v745_v40  ;;  %v801_v51 = vmul.f32 %v793_v44, %v2047_v31  ;;  %1692 = vtanh.f32 %v816_v50  ;;  %v778_v42 = vmul.f32 0.5, %v2050_v35 }
 0x204   : > { %v758_v52 = vpop.f32.mrf.mxu2  ;;  %v803_v53 = vmul.f32 %v795_v47, %v731_v36  ;;  %v802_v54 = vmul.f32 %v794_v46, %v2050_v35 }
 0x205   : > { %v759_v55 = vadd.f32 %v758_v52, %v547_v25  ;;  %v772_v56 = vpop.f32.mrf.mxu3  ;;  %v804_v57 = vmul.f32 %v796_v49, %v745_v40  ;;  %v809_v58 = vadd.f32 %v801_v51, %v2047_v31  ;;  %v780_v25 = vmul.f32 0.5, %v745_v40 }
 0x206   : > { %v773_v59 = vadd.f32 %v772_v56, %v548_v27  ;;  %v811_v60 = vadd.f32 %v803_v53, %v731_v36  ;;  %v810_v61 = vadd.f32 %v802_v54, %v2050_v35 }
 0x207   : > { %v789_v62 = vmul.f32 0.044715, %v759_v55  ;;  %v812_v63 = vadd.f32 %v804_v57, %v745_v40  ;;  %v817_v4 = vmul.f32 0.7978846, %v809_v58  ;;  %v781_v20 = vmul.f32 0.5, %v759_v55 }
 0x208   : > { %v790_v0 = vmul.f32 0.044715, %v773_v59  ;;  %v819_v1 = vmul.f32 0.7978846, %v811_v60  ;;  %v818_v6 = vmul.f32 0.7978846, %v810_v61  ;;  %v1691_v8 = vpop.eup %1690 }
 0x209   : > { %v797_v2 = vmul.f32 %v789_v62, %v759_v55  ;;  %v820_v3 = vmul.f32 0.7978846, %v812_v63  ;;  %v1693_v10 = vpop.eup %1692  ;;  %v831_v13 = vadd.f32 1.0, %v1691_v8  ;;  %v782_v43 = vmul.f32 0.5, %v773_v59  ;;  %v848_v63 = vld [vmem:[#allocation3 + $0x8] sm:$0xff] }
 0x20a   : > { %v798_v5 = vmul.f32 %v790_v0, %v773_v59  ;;  %1694 = vtanh.f32 %v819_v1  ;;  %v832_v16 = vadd.f32 1.0, %v1693_v10 }
 0x20b   : > { %1696 = vtanh.f32 %v820_v3  ;;  %v805_v7 = vmul.f32 %v797_v2, %v759_v55  ;;  %v839_v28 = vmul.f32 %v831_v13, %v775_v21 }
 0x20c   : > { %v806_v9 = vmul.f32 %v798_v5, %v773_v59  ;;  %1698 = vtanh.f32 %v817_v4  ;;  %v840_v32 = vmul.f32 %v832_v16, %v776_v24 }
 0x20d   : > { %v813_v11 = vadd.f32 %v805_v7, %v759_v55  ;;  %1700 = vtanh.f32 %v818_v6  ;;  %v847_v55 = vld [vmem:[#allocation3] sm:$0xff] }
 0x20e   : > { %v814_v12 = vadd.f32 %v806_v9, %v773_v59 }
 0x20f   : > { %v821_v14 = vmul.f32 0.7978846, %v813_v11 }
 0x210   : > { %v1695_v15 = vpop.eup %1694  ;;  %v822_v17 = vmul.f32 0.7978846, %v814_v12 }
 0x211   : > { %v1697_v19 = vpop.eup %1696  ;;  %v835_v23 = vadd.f32 1.0, %v1695_v15  ;;  %1702 = vtanh.f32 %v821_v14 }
 0x212   : > { %v836_v26 = vadd.f32 1.0, %v1697_v19  ;;  %1704 = vtanh.f32 %v822_v17  ;;  %v1699_v27 = vpop.eup %1698 }
 0x213   : > { %v843_v29 = vmul.f32 %v835_v23, %v779_v22  ;;  %v1701_v30 = vpop.eup %1700  ;;  %v833_v38 = vadd.f32 1.0, %v1699_v27 }
 0x214   : > { %v844_v33 = vmul.f32 %v836_v26, %v780_v25  ;;  %v834_v18 = vadd.f32 1.0, %v1701_v30 }
 0x215   : > { %v849_v34 = vpack.c.bf16 %v843_v29, %v839_v28  ;;  %v841_v45 = vmul.f32 %v833_v38, %v777_v41 }
 0x216   : > { %v850_v37 = vpack.c.bf16 %v844_v33, %v840_v32  ;;  %v842_v47 = vmul.f32 %v834_v18, %v778_v42 }
 0x217   : > { %v1703_v39 = vpop.eup %1702  ;;  %1117 = vmatmul.bf16.vlgmr.msrb.gmra.mxu0 %v849_v34 }
 0x218   : > { %v1705_v36 = vpop.eup %1704  ;;  %1131 = vmatmul.bf16.vlgmr.msrb.gmra.mxu1 %v850_v37  ;;  %v837_v40 = vadd.f32 1.0, %v1703_v39 }
 0x219   : > { %v838_v44 = vadd.f32 1.0, %v1705_v36 }
 0x21a   : > { %v845_v46 = vmul.f32 %v837_v40, %v781_v20 }
 0x21b   : > { %v846_v48 = vmul.f32 %v838_v44, %v782_v43 }
 0x21c   : > { %v851_v49 = vpack.c.bf16 %v845_v46, %v841_v45 }
 0x21d   : > { %v852_v50 = vpack.c.bf16 %v846_v48, %v842_v47 }
 0x21e   : > { %1145 = vmatmul.bf16.vlgmr.msrb.gmra.mxu2 %v851_v49 }
 0x21f   : > { %1159 = vmatmul.bf16.vlgmr.msrb.gmra.mxu3 %v852_v50 }
 0x294   : > { %v1118_v51 = vpop.f32.mrf.mxu0 }
 0x295   : > { %v1132_v52 = vpop.f32.mrf.mxu1 }
 0x296   : > { %v1133_v53 = vadd.f32 %v1132_v52, %v1118_v51 }
 0x29c   : > { %v1120_v58 = vpop.f32.mrf.mxu0 }
 0x29d   : > { %v1134_v35 = vpop.f32.mrf.mxu1 }
 0x29e   : > { %v1135_v60 = vadd.f32 %v1134_v35, %v1120_v58 }
 0x2a1   : > { %v1146_v54 = vpop.f32.mrf.mxu2 }
 0x2a2   : > { %v1147_v56 = vadd.f32 %v1146_v54, %v1133_v53  ;;  %v1160_v31 = vpop.f32.mrf.mxu3 }
 0x2a4   : > { %v1161_v57 = vadd.f32 %v1160_v31, %v1147_v56 }
 0x2a6   : > { %v1165_v59 = vadd.f32 %v1161_v57, %v847_v55 }
 0x2a8   : > { %1167 = vst [vmem:[#allocation3] sm:$0xff] %v1165_v59 }
 0x2a9   : > { %v1148_v61 = vpop.f32.mrf.mxu2 }
 0x2aa   : > { %v1149_v62 = vadd.f32 %v1148_v61, %v1135_v60  ;;  %v1162_v0 = vpop.f32.mrf.mxu3 }
 0x2ac   : > { %v1163_v1 = vadd.f32 %v1162_v0, %v1149_v62  ;;  %1172 = sbr.rel (%p1564_p12) target bundleno = 701 (0x2bd), region = 79 }
 0x2ae   : > { %v1166_v2 = vadd.f32 %v1163_v1, %v848_v63 }
 0x2b0   : > { %1168 = vst [vmem:[#allocation3 + $0x8] sm:$0xff] %v1166_v2 }
 0x2b1   : > { %v1173_v3 = vld [vmem:[#allocation3] sm:$0xff]  ;;  %v1706_v4 = vld [vmem:[%s2103_s6] ss:$0 sm:$0xff] }
 0x2b2   : > { %v1181_v5 = vld [vmem:[%s2097_s0] sm:$0xff]  ;;  %v1182_v7 = vld [vmem:[%s2097_s0 + $0x8] sm:$0xff]  ;;  %v1179_v8 = vadd.f32 %v1706_v4, %v1173_v3 }
 0x2b4   : > { %v1183_v10 = vadd.f32 %v1181_v5, %v1179_v8 }
 0x2b6   : > { %1185 = vst [vmem:[%s2104_s7] sm:$0xff] %v1183_v10 }
 0x2b7   : > { %v1174_v6 = vld [vmem:[#allocation3 + $0x8] sm:$0xff] }
 0x2b8   : > { %v1180_v9 = vadd.f32 %v1706_v4, %v1174_v6 }
 0x2ba   : > { %v1184_v11 = vadd.f32 %v1182_v7, %v1180_v9 }
 0x2bc   : > { %1186 = vst [vmem:[%s2104_s7 + $0x8] sm:$0xff] %v1184_v11 }
 0x2bd PF: > { %s17_s28 = sadd.s32 1, %s1745_s28   ;;  %s2105_s24 = smov %s1733_s25 }
 0x2be   : > { %p14_p13 = scmp.ge.s32.totalorder %s17_s28, 4   ;;  %s2106_s25 = smov %s1824_s9 }
 0x2bf   : > { %s2107_s26 = smov %s1741_s27  ;;  %s2108_s27 = smov %s2110_s29 }
 0x2c0   :  { %16 = sbr.rel (!%p14_p13) target bundleno = 3 (0x3), region = 123 }

// kernel: ext_transformer_encoder_forward.19
= control target key start
LH: loop header
LB: loop body
LE: loop exit
PB: predicated region body
PF: predicated region fallthrough
CT: control target
= control target key end

     0   :  { %v170_v2 = vmov 128.0   ;;  %vm144_vm11 = vcmask 7168   ;;  %s238_s0 = inlined_call_operand.vmem [shape: f32[16,128], index: 0, kind: input, shape index: {}]   ;;  %s239_s1 = inlined_call_operand.vmem [shape: f32[1,128], index: 1, kind: input, shape index: {}]   ;;  %s240_s2 = inlined_call_operand.vmem [shape: f32[1,128], index: 2, kind: input, shape index: {}]   ;;  %s241_s3 = inlined_call_operand.vmem [shape: f32[1,128], index: 3, kind: input, shape index: {}]   ;;  %s242_s4 = inlined_call_operand.<no memory space> [shape: f32[1,1], index: 4, kind: input, shape index: {}]   ;;  %s243_s5 = inlined_call_operand.vmem [shape: f32[16,1], index: 5, kind: input, shape index: {}]   ;;  %s244_s6 = inlined_call_operand.vmem [shape: f32[16,1], index: 6, kind: output, shape index: {}]  }
   0x1   :  { %v25_v0 = vld [vmem:[%s238_s0] sm:$0xff]  ;;  %v26_v1 = vld [vmem:[%s238_s0 + $0x8] sm:$0xff]  ;;  %156 = vrcp.f32 %v170_v2  ;;  %v11_v20 = vstv %s242_s4 }
   0x2   :  { %27 = vadd.xlane.f32.xlu0 %v25_v0  ;;  %12 = vst [vmem:[#allocation2] sm:$0x1] %v11_v20  ;;  %v152_v32 = vld [vmem:[%s239_s1] ss:$0 sm:$0xff] }
   0x3   :  { %v153_v36 = vld [vmem:[%s240_s2] ss:$0 sm:$0xff] }
   0x4   :  { %v154_v39 = vld [vmem:[%s241_s3] ss:$0 sm:$0xff] }
   0x7   :  { %v157_v3 = vpop.eup %156 }
   0x8   :  { %v32_v4 = vmul.f32 128.0, %v157_v3  ;;  %vm36_vm0 = vweird.f32 %v157_v3 }
   0x9   :  { %v155_v49 = vld [vmem:[#allocation2] ss:$0 sm:$0xff] }
   0xa   :  { %29 = vadd.xlane.f32.xlu0 %v26_v1  ;;  %v33_v5 = vsub.f32 1.0, %v32_v4 }
   0xc   :  { %v34_v6 = vmul.f32 %v157_v3, %v33_v5 }
   0xe   :  { %v35_v7 = vadd.f32 %v157_v3, %v34_v6  ;;  %v140_v6 = vld [vmem:[%s243_s5] sm:$0xff] }
  0x10   :  { %v37_v8 = vsel %vm36_vm0, %v157_v3, %v35_v7 }
  0x75   :  { %v28_v9 = vpop.xlane.xlu0 %27 }
  0x76   :  { %v38_v10 = vmul.f32 %v37_v8, %v28_v9 }
  0x78   :  { %v40_v11 = vsub.f32 %v25_v0, %v38_v10 }
  0x7a   :  { %v42_v12 = vmul.f32 %v40_v11, %v40_v11 }
  0x7c   :  { %44 = vadd.xlane.f32.xlu1 %v42_v12 }
  0x7d   :  { %v30_v13 = vpop.xlane.xlu0 %29 }
  0x7e   :  { %v39_v14 = vmul.f32 %v37_v8, %v30_v13 }
  0x80   :  { %v41_v15 = vsub.f32 %v26_v1, %v39_v14 }
  0x82   :  { %v43_v16 = vmul.f32 %v41_v15, %v41_v15 }
  0x84   :  { %46 = vadd.xlane.f32.xlu1 %v43_v16 }
  0xef   :  { %v45_v17 = vpop.xlane.xlu1 %44 }
  0xf0   :  { %v48_v18 = vmul.f32 %v45_v17, %v37_v8  ;;  %v141_v17 = vld [vmem:[%s243_s5 + $0x8] sm:$0xff] }
  0xf2   :  { %v50_v19 = vadd.f32 1e-06, %v48_v18 }
  0xf4   :  { %158 = vrsqrt.f32 %v50_v19  ;;  %vm58_vm2 = vweird.f32 %v50_v19 }
  0xf7   :  { %v47_v21 = vpop.xlane.xlu1 %46 }
  0xf8   :  { %v49_v22 = vmul.f32 %v47_v21, %v37_v8 }
  0xfa   :  { %v159_v23 = vpop.eup %158  ;;  %v51_v24 = vadd.f32 1e-06, %v49_v22 }
  0xfb   :  { %v53_v25 = vmul.f32 %v159_v23, %v50_v19  ;;  %vm59_vm1 = vweird.f32 %v159_v23 }
  0xfc   :  { %160 = vrsqrt.f32 %v51_v24  ;;  %vm60_vm3 = vmor %vm58_vm2, %vm59_vm1  ;;  %vm68_vm5 = vweird.f32 %v51_v24 }
  0xfd   :  { %v54_v26 = vmul.f32 %v159_v23, %v53_v25 }
  0xff   :  { %v55_v27 = vmul.f32 0.5, %v54_v26 }
 0x101   :  { %v56_v28 = vsub.f32 1.5, %v55_v27 }
 0x102   :  { %v161_v29 = vpop.eup %160 }
 0x103   :  { %v57_v30 = vmul.f32 %v159_v23, %v56_v28  ;;  %v63_v31 = vmul.f32 %v161_v29, %v51_v24  ;;  %vm69_vm4 = vweird.f32 %v161_v29 }
 0x104   :  { %vm70_vm6 = vmor %vm68_vm5, %vm69_vm4 }
 0x105   :  { %v64_v33 = vmul.f32 %v161_v29, %v63_v31  ;;  %v61_v34 = vsel %vm60_vm3, %v159_v23, %v57_v30 }
 0x106   :  { %v72_v35 = vmul.f32 %v61_v34, %v40_v11 }
 0x107   :  { %v65_v37 = vmul.f32 0.5, %v64_v33 }
 0x108   :  { %v78_v38 = vmul.f32 %v152_v32, %v72_v35 }
 0x109   :  { %v66_v40 = vsub.f32 1.5, %v65_v37 }
 0x10a   :  { %v84_v41 = vadd.f32 %v153_v36, %v78_v38 }
 0x10b   :  { %v67_v42 = vmul.f32 %v161_v29, %v66_v40 }
 0x10c   :  { %v90_v43 = vmul.f32 %v154_v39, %v84_v41 }
 0x10d   :  { %v71_v44 = vsel %vm70_vm6, %v161_v29, %v67_v42 }
 0x10e   :  { %92 = vadd.xlane.f32.xlu2 %v90_v43  ;;  %v73_v45 = vmul.f32 %v71_v44, %v41_v15 }
 0x110   :  { %v79_v46 = vmul.f32 %v152_v32, %v73_v45 }
 0x112   :  { %v85_v47 = vadd.f32 %v153_v36, %v79_v46 }
 0x114   :  { %v91_v48 = vmul.f32 %v154_v39, %v85_v47 }
 0x116   :  { %94 = vadd.xlane.f32.xlu2 %v91_v48 }
 0x181   :  { %v93_v50 = vpop.xlane.xlu2 %92 }
 0x182   :  { %v100_v51 = vadd.f32 %v155_v49, %v93_v50 }
 0x184   :  { %v102_v52 = vsub.f32 0.0, %v100_v51 }
 0x186   :  { %v104_v53 = vmul.f32 1.442695, %v102_v52 }
 0x188   :  { %162 = vpow2.f32 %v104_v53 }
 0x189   :  { %v95_v54 = vpop.xlane.xlu2 %94 }
 0x18a   :  { %v101_v55 = vadd.f32 %v155_v49, %v95_v54 }
 0x18c   :  { %v103_v56 = vsub.f32 0.0, %v101_v55 }
 0x18e   :  { %v163_v57 = vpop.eup %162  ;;  %v106_v58 = vmul.f32 1.442695, %v103_v56 }
 0x18f   :  { %v108_v59 = vadd.f32 1.0, %v163_v57 }
 0x190   :  { %164 = vpow2.f32 %v106_v58 }
 0x191   :  { %166 = vrcp.f32 %v108_v59  ;;  %v121_v1 = vand.u32 2147483648, %v108_v59  ;;  %v119_v3 = vand.u32 2147483647, %v108_v59  ;;  %vm115_vm8 = vweird.f32 %v108_v59 }
 0x193   :  { %v122_v7 = vor.u32 1.1754944e-38, %v121_v1  ;;  %vm120_vm10 = vcmp.eq.f32.partialorder %v119_v3, 8.507059e+37 }
 0x196   :  { %v165_v60 = vpop.eup %164 }
 0x197   :  { %v167_v61 = vpop.eup %166  ;;  %v109_v62 = vadd.f32 1.0, %v165_v60 }
 0x198   :  { %v111_v63 = vmul.f32 %v167_v61, %v108_v59  ;;  %vm116_vm7 = vweird.f32 %v167_v61 }
 0x199   :  { %168 = vrcp.f32 %v109_v62  ;;  %vm117_vm9 = vmor %vm115_vm8, %vm116_vm7  ;;  %v136_v13 = vand.u32 2147483648, %v109_v62  ;;  %v134_v15 = vand.u32 2147483647, %v109_v62  ;;  %vm130_vm13 = vweird.f32 %v109_v62 }
 0x19a   :  { %v112_v0 = vsub.f32 1.0, %v111_v63 }
 0x19b   :  { %v137_v18 = vor.u32 1.1754944e-38, %v136_v13  ;;  %vm135_vm15 = vcmp.eq.f32.partialorder %v134_v15, 8.507059e+37 }
 0x19c   :  { %v113_v2 = vmul.f32 %v167_v61, %v112_v0 }
 0x19e   :  { %v114_v4 = vadd.f32 %v167_v61, %v113_v2 }
 0x19f   :  { %v169_v5 = vpop.eup %168 }
 0x1a0   :  { %v118_v8 = vsel %vm117_vm9, %v167_v61, %v114_v4  ;;  %v126_v9 = vmul.f32 %v169_v5, %v109_v62  ;;  %vm131_vm12 = vweird.f32 %v169_v5 }
 0x1a1   :  { %v123_v10 = vsel %vm120_vm10, %v122_v7, %v118_v8  ;;  %vm132_vm14 = vmor %vm130_vm13, %vm131_vm12 }
 0x1a2   :  { %v142_v11 = vmul.f32 %v140_v6, %v123_v10  ;;  %v127_v12 = vsub.f32 1.0, %v126_v9 }
 0x1a4   :  { %145 = vst.msk [vmem:[%s244_s6] sm:$0xff] %vm144_vm11, %v142_v11  ;;  %v128_v14 = vmul.f32 %v169_v5, %v127_v12 }
 0x1a6   :  { %v129_v16 = vadd.f32 %v169_v5, %v128_v14 }
 0x1a8   :  { %v133_v19 = vsel %vm132_vm14, %v169_v5, %v129_v16 }
 0x1a9   :  { %v138_v20 = vsel %vm135_vm15, %v137_v18, %v133_v19 }
 0x1aa   :  { %v143_v21 = vmul.f32 %v141_v17, %v138_v20 }
 0x1ac   :  { %146 = vst.msk [vmem:[%s244_s6 + $0x8] sm:$0xff] %vm144_vm11, %v143_v21 }

</bundles_post_ra>
